<compile_context>
chip_gen: v5e
topology: v5e:2x2
jax: 0.10.0
libtpu: 0.0.40
codegen_flags: <defaults>
</compile_context>

<pallas_src>
import jax
import jax.numpy as jnp
from jax import lax
from jax.experimental import pallas as pl
from jax.experimental.pallas import tpu as pltpu

E = 320            # ESM2-t6-8M hidden size
EP = 384           # E padded up to a multiple of 128 (lane-tile aligned)
NUM_CLASSES = 2
HEAD_W = 128       # prediction head computed 128 lanes wide (lane-dense store)
LN_EPS = 1e-5      # torch.nn.LayerNorm default
NEG_BIG = -1e30    # bias for padded logit lanes -> exp() underflows to 0
KEY_PAD_BIAS = -1e9  # float-mask bias for keys that only exist due to padding


def _attention_kernel(t1_ref, t2_ref, pro_m_ref, pep_m_ref,
                      wq_ref, wkv_ref, wo_ref, wp_ref, vec_ref,
                      pooled_ref, probs_ref,
                      k_scr, v_scr, den_scr):
    BB, TQ, _ = t1_ref.shape
    Lk = t2_ref.shape[1]
    qi = pl.program_id(1)
    last_q = pl.num_programs(1) - 1

    # Packed affine vectors (one DMA stream instead of eight tiny ones).
    bq = vec_ref[0:1, :EP]                         # (1, EP)   (pre-scaled)
    bkv = vec_ref[1:2, :]                          # (1, 2*EP)
    bo = vec_ref[2:3, :E]                          # (1, E)
    gamma = vec_ref[3:4, :E]
    beta = vec_ref[4:5, :E]
    bp = vec_ref[5:6, :HEAD_W]                     # (1, HEAD_W), pads = -1e30

    # ---- once per batch block: project K/V into VMEM scratch, reset accums --
    @pl.when(qi == 0)
    def _():
        t2_2d = t2_ref[...].reshape(BB * Lk, E)                    # bf16
        kv = jnp.dot(t2_2d, wkv_ref[...],
                     preferred_element_type=jnp.float32) + bkv     # (BB*Lk,768)
        k_scr[...] = kv[:, :EP].reshape(BB, Lk, EP).astype(jnp.bfloat16)
        v_scr[...] = kv[:, EP:].reshape(BB, Lk, EP).astype(jnp.bfloat16)
        pooled_ref[...] = jnp.zeros_like(pooled_ref)
        den_scr[...] = jnp.zeros_like(den_scr)

    t1 = t1_ref[...]                               # (BB, TQ, E)   bf16
    pro_m = pro_m_ref[...]                         # (BB, TQ, 1)   f32
    pep_m = pep_m_ref[...]                         # (BB, 1, Lk)   f32

    # ---- Q projection (1/sqrt(E) folded into wq / bq in the wrapper) --------
    q = jnp.dot(t1.reshape(BB * TQ, E), wq_ref[...],
                preferred_element_type=jnp.float32) + bq           # (BB*TQ,EP)
    q3 = q.reshape(BB, TQ, EP).astype(jnp.bfloat16)

    # ---- scaled-dot-product attention (float attn_mask added) ---------------
    scores = lax.dot_general(                      # (BB, TQ, Lk), no k.T
        q3, k_scr[...], (((2,), (2,)), ((0,), (0,))),
        preferred_element_type=jnp.float32)
    scores = scores + pro_m * pep_m                # PyTorch float-mask add

    m = jnp.max(scores, axis=-1, keepdims=True)
    e = jnp.exp(scores - m)
    attn = e * pl.reciprocal(jnp.sum(e, axis=-1, keepdims=True), approx=True)

    ctx = lax.dot_general(                         # (BB, TQ, EP)
        attn.astype(jnp.bfloat16), v_scr[...], (((2,), (1,)), ((0,), (0,))),
        preferred_element_type=jnp.float32)

    out = jnp.dot(ctx.reshape(BB * TQ, EP).astype(jnp.bfloat16), wo_ref[...],
                  preferred_element_type=jnp.float32) + bo         # (BB*TQ, E)

    # ---- LayerNorm (one-pass variance) + residual ----------------------------
    mean = jnp.mean(out, axis=-1, keepdims=True)
    var = jnp.maximum(
        jnp.mean(out * out, axis=-1, keepdims=True) - mean * mean, 0.0)
    ln = (out - mean) * lax.rsqrt(var + LN_EPS) * gamma + beta
    res = ln.reshape(BB, TQ, E) + t1.astype(jnp.float32)           # (BB, TQ, E)

    # ---- masked mean pooling: accumulate numerator / denominator ------------
    pooled_ref[...] += jnp.sum(res * pro_m, axis=1)                # (BB, E)
    den_scr[...] += jnp.sum(pro_m, axis=1)                         # (BB, 1)

    # ---- last query tile: finish pooling, prediction head, probs ------------
    @pl.when(qi == last_q)
    def _():
        den = jnp.maximum(den_scr[...], 1e-6)                      # torch clamp
        pooled = pooled_ref[...] / den             # exact divide (user-facing)
        pooled_ref[...] = pooled
        logits = jnp.dot(pooled.astype(jnp.bfloat16), wp_ref[...],
                         preferred_element_type=jnp.float32) + bp  # (BB, 128)
        lm = jnp.max(logits, axis=-1, keepdims=True)
        le = jnp.exp(logits - lm)                  # padded lanes -> exactly 0
        probs_ref[...] = le / jnp.sum(le, axis=-1, keepdims=True)  # exact


def _round_up(x, m):
    return (x + m - 1) // m * m


def _pick_blocks(B, Lq, Lk):
    """VMEM-aware (BB, TQ, Lq_pad, Lk_pad).

    Keeps roughly <=1024 query rows of f32 intermediates and <=~8 MiB of bf16
    K/V scratch per grid step (fits v7x's 64 MiB physical VMEM with double-
    buffered bf16 input blocks and the default scoped limits on v5e/v6e), and
    guarantees >=2 batch grid steps whenever B >= 2 so the "parallel" batch
    axis can shard across v7x's two TensorCores.
    """
    lk_pad = _round_up(Lk, 16)
    if Lq <= 256:
        tq = _round_up(Lq, 16)
        lq_pad = tq
    else:  # pick the query tile (multiple of 16) with the least padding waste
        tq, lq_pad = min(((t, _round_up(Lq, t)) for t in (256, 192, 128)),
                         key=lambda c: c[1])
    rows_budget = 1024
    kv_budget = 8 * 1024 * 1024
    bb = max(1, min(B, rows_budget // tq, kv_budget // (lk_pad * 2 * EP * 2)))
    while B % bb:
        bb -= 1
    if B >= 2 and B // bb < 2:      # ensure >=2 batch steps for megacore
        bb = B // 2
        while B % bb:
            bb -= 1
    return bb, tq, lq_pad, lk_pad


def _prepare_params(p):
    """Pad / fuse weights to MXU-aligned lane widths; cast matmul weights bf16.

    The 1/sqrt(E) attention scale is folded into Wq and bq so the kernel never
    multiplies the (BB, TQ, Lk) score tensor.
    """
    scale = 1.0 / jnp.sqrt(jnp.float32(E))
    wq = jnp.zeros((E, EP), jnp.float32).at[:, :E].set(p["wq"] * scale)
    wk = jnp.zeros((E, EP), jnp.float32).at[:, :E].set(p["wk"])
    wv = jnp.zeros((E, EP), jnp.float32).at[:, :E].set(p["wv"])
    wkv = jnp.concatenate([wk, wv], axis=1)                      # (E, 2*EP)
    wo = jnp.zeros((EP, E), jnp.float32).at[:E, :].set(p["wo"])
    wp = jnp.zeros((E, HEAD_W), jnp.float32).at[:, :NUM_CLASSES].set(p["wp"])

    vec = jnp.zeros((8, 2 * EP), jnp.float32)
    vec = vec.at[0, :E].set(p["bq"][0] * scale)
    vec = vec.at[1, :E].set(p["bk"][0])
    vec = vec.at[1, EP:EP + E].set(p["bv"][0])
    vec = vec.at[2, :E].set(p["bo"][0])
    vec = vec.at[3, :E].set(p["gamma"][0])
    vec = vec.at[4, :E].set(p["beta"][0])
    vec = vec.at[5, :HEAD_W].set(NEG_BIG)          # mask the padded logit lanes
    vec = vec.at[5, :NUM_CLASSES].set(p["bp"][0])
    return (wq.astype(jnp.bfloat16), wkv.astype(jnp.bfloat16),
            wo.astype(jnp.bfloat16), wp.astype(jnp.bfloat16), vec)


@jax.jit
def attention_model_forward(t1, t2, pro_mask, pep_mask, params):
    """t1: (B, Lq, E), t2: (B, Lk, E); masks: (B, Lq) / (B, Lk) float."""
    B, Lq, _ = t1.shape
    Lk = t2.shape[1]
    BB, TQ, Lq_pad, Lk_pad = _pick_blocks(B, Lq, Lk)
    NB, NQ = B // BB, Lq_pad // TQ

    # bf16 activation streams (halves the dominant HBM traffic + block size).
    t1b = t1.astype(jnp.bfloat16)
    t2b = t2.astype(jnp.bfloat16)
    pro_mask = pro_mask.astype(jnp.float32)
    pep_mask = pep_mask.astype(jnp.float32)
    if Lq_pad != Lq:
        t1b = jnp.pad(t1b, ((0, 0), (0, Lq_pad - Lq), (0, 0)))
        pro_mask = jnp.pad(pro_mask, ((0, 0), (0, Lq_pad - Lq)))   # mask = 0
    if Lk_pad != Lk:
        t2b = jnp.pad(t2b, ((0, 0), (0, Lk_pad - Lk), (0, 0)))
        # Keys that only exist because of padding must never receive attention
        # weight from valid queries: bias them by -1e9 through the float mask
        # (finite, so pro_m == 0 rows stay NaN-free).
        pep_mask = jnp.pad(pep_mask, ((0, 0), (0, Lk_pad - Lk)),
                           constant_values=KEY_PAD_BIAS)
    pro_m = pro_mask.reshape(B, Lq_pad, 1)
    pep_m = pep_mask.reshape(B, 1, Lk_pad)

    wq, wkv, wo, wp, vec = _prepare_params(params)

    full2d = lambda shape: pl.BlockSpec(shape, lambda b, q: (0, 0))
    grid_spec = pltpu.PrefetchScalarGridSpec(
        num_scalar_prefetch=0,
        grid=(NB, NQ),
        in_specs=[
            pl.BlockSpec((BB, TQ, E), lambda b, q: (b, q, 0)),       # t1 bf16
            pl.BlockSpec((BB, Lk_pad, E), lambda b, q: (b, 0, 0)),   # t2 bf16
            pl.BlockSpec((BB, TQ, 1), lambda b, q: (b, q, 0)),       # pro mask
            pl.BlockSpec((BB, 1, Lk_pad), lambda b, q: (b, 0, 0)),   # pep mask
            full2d((E, EP)),                                         # Wq*scale
            full2d((E, 2 * EP)),                                     # W[k|v]
            full2d((EP, E)),                                         # Wo
            full2d((E, HEAD_W)),                                     # Wp
            full2d((8, 2 * EP)),                                     # vectors
        ],
        out_specs=(
            pl.BlockSpec((None, BB, E), lambda b, q: (b, 0, 0)),       # pooled
            pl.BlockSpec((None, BB, HEAD_W), lambda b, q: (b, 0, 0)),  # probs
        ),
        scratch_shapes=[
            pltpu.VMEM((BB, Lk_pad, EP), jnp.bfloat16),   # K (per batch block)
            pltpu.VMEM((BB, Lk_pad, EP), jnp.bfloat16),   # V
            pltpu.VMEM((BB, 1), jnp.float32),             # pooling denominator
        ],
    )

    pooled, probs_pad = pl.pallas_call(
        _attention_kernel,
        out_shape=(
            jax.ShapeDtypeStruct((NB, BB, E), jnp.float32),
            jax.ShapeDtypeStruct((NB, BB, HEAD_W), jnp.float32),
        ),
        grid_spec=grid_spec,
        compiler_params=pltpu.CompilerParams(
            # batch blocks shard across v7x's 2 TCs; q-tiles accumulate.
            dimension_semantics=("parallel", "arbitrary"),
            vmem_limit_bytes=48 * 1024 * 1024,
        ),
    )(t1b, t2b, pro_m, pep_m, wq, wkv, wo, wp, vec)

    pooled = pooled.reshape(B, E)
    probs = probs_pad.reshape(B, HEAD_W)[:, :NUM_CLASSES]
    return probs, pooled


def _reference_forward(t1, t2, pro_mask, pep_mask, p):
    """Pure-JAX f32 reference mirroring the PyTorch forward (for validation)."""
    q = t1 @ p["wq"] + p["bq"]
    k = t2 @ p["wk"] + p["bk"]
    v = t2 @ p["wv"] + p["bv"]
    scores = jnp.einsum("bqe,bke->bqk", q, k) / jnp.sqrt(jnp.float32(E))
    scores = scores + pro_mask[:, :, None] * pep_mask[:, None, :]
    attn = jax.nn.softmax(scores, axis=-1)
    out = jnp.einsum("bqk,bke->bqe", attn, v) @ p["wo"] + p["bo"]
    mean = out.mean(-1, keepdims=True)
    var = ((out - mean) ** 2).mean(-1, keepdims=True)
    ln = (out - mean) / jnp.sqrt(var + LN_EPS) * p["gamma"] + p["beta"]
    res = ln + t1
    msum = jnp.clip(pro_mask.sum(1, keepdims=True), 1e-6, None)
    pooled = (res * pro_mask[:, :, None]).sum(1) / msum
    logits = pooled @ p["wp"] + p["bp"]
    return jax.nn.softmax(logits, axis=1), pooled


def init_params(key):
    ks = jax.random.split(key, 8)
    scale = 1.0 / jnp.sqrt(jnp.float32(E))
    # Weights stored pre-transposed: y = x @ W  (W: (in, out)).
    return {
        "wq": jax.random.normal(ks[0], (E, E), jnp.float32) * scale,
        "wk": jax.random.normal(ks[1], (E, E), jnp.float32) * scale,
        "wv": jax.random.normal(ks[2], (E, E), jnp.float32) * scale,
        "wo": jax.random.normal(ks[3], (E, E), jnp.float32) * scale,
        "bq": jnp.zeros((1, E), jnp.float32),
        "bk": jnp.zeros((1, E), jnp.float32),
        "bv": jnp.zeros((1, E), jnp.float32),
        "bo": jnp.zeros((1, E), jnp.float32),
        "gamma": jnp.ones((1, E), jnp.float32),
        "beta": jnp.zeros((1, E), jnp.float32),
        "wp": jax.random.normal(ks[4], (E, NUM_CLASSES), jnp.float32) * scale,
        "bp": jnp.zeros((1, NUM_CLASSES), jnp.float32),
    }


if __name__ == "__main__":
    key = jax.random.PRNGKey(0)
    k_emb1, k_emb2, k_ids1, k_ids2, k_par = jax.random.split(key, 5)

    B, Lq, Lk, VOCAB = 2, 16, 8, 33   # protein seq 16, peptide seq 8

    # Stand-in for frozen ESM encoders: deterministic embedding lookup.
    pro_ids = jax.random.randint(k_ids1, (B, Lq), 0, VOCAB)
    pep_ids = jax.random.randint(k_ids2, (B, Lk), 0, VOCAB)
    emb_pro = jax.random.normal(k_emb1, (VOCAB, E), jnp.float32) * 0.05
    emb_pep = jax.random.normal(k_emb2, (VOCAB, E), jnp.float32) * 0.05
    t1 = emb_pro[pro_ids]              # (B, Lq, E)  ~ PLM hidden_states[-1]
    t2 = emb_pep[pep_ids]              # (B, Lk, E)  ~ plm hidden_states[-1]

    # Attention masks with some padding zeros.
    pro_mask = jnp.concatenate(
        [jnp.ones((B, Lq - 3)), jnp.zeros((B, 3))], axis=1).astype(jnp.float32)
    pep_mask = jnp.concatenate(
        [jnp.ones((B, Lk - 2)), jnp.zeros((B, 2))], axis=1).astype(jnp.float32)

    params = init_params(k_par)

    probs, pooled = attention_model_forward(t1, t2, pro_mask, pep_mask, params)
    jax.block_until_ready((probs, pooled))

    ref_probs, ref_pooled = _reference_forward(t1, t2, pro_mask, pep_mask, params)
    assert probs.shape == (B, NUM_CLASSES) and pooled.shape == (B, E)
    # bf16 matmuls + approx softmax reciprocal vs. f32 reference -> ~1e-2 tol.
    assert jnp.allclose(probs, ref_probs, atol=2e-2, rtol=2e-2), (
        float(jnp.max(jnp.abs(probs - ref_probs))))
    assert jnp.allclose(pooled, ref_pooled, atol=2e-2, rtol=2e-2), (
        float(jnp.max(jnp.abs(pooled - ref_pooled))))

    print("KERNEL_OK")
</pallas_src>

<mosaic_0001>
module attributes {stable_mosaic.version = 11 : i64} {
  func.func @_attention_kernel(%arg0: i32, %arg1: i32, %arg2: memref<1x16x320xbf16, #tpu.memory_space<vmem>>, %arg3: memref<1x16x320xbf16, #tpu.memory_space<vmem>>, %arg4: memref<1x16x1xf32, #tpu.memory_space<vmem>>, %arg5: memref<1x1x16xf32, #tpu.memory_space<vmem>>, %arg6: memref<320x384xbf16, #tpu.memory_space<vmem>>, %arg7: memref<320x768xbf16, #tpu.memory_space<vmem>>, %arg8: memref<384x320xbf16, #tpu.memory_space<vmem>>, %arg9: memref<320x128xbf16, #tpu.memory_space<vmem>>, %arg10: memref<8x768xf32, #tpu.memory_space<vmem>>, %arg11: memref<1x1x320xf32, #tpu.memory_space<vmem>>, %arg12: memref<1x1x128xf32, #tpu.memory_space<vmem>>, %arg13: memref<1x16x384xbf16, #tpu.memory_space<vmem>>, %arg14: memref<1x16x384xbf16, #tpu.memory_space<vmem>>, %arg15: memref<1x1xf32, #tpu.memory_space<vmem>>) attributes {dimension_semantics = [#tpu.dimension_semantics<parallel>, #tpu.dimension_semantics<arbitrary>], iteration_bounds = array<i64: 2, 1>, scalar_prefetch = 0 : i64, scratch_operands = 3 : i64, tpu.core_type = #tpu.core_type<tc>, window_params = [{transform_indices = @transform_0, window_bounds = array<i64: 1, 16, 320>}, {transform_indices = @transform_1, window_bounds = array<i64: 1, 16, 320>}, {transform_indices = @transform_2, window_bounds = array<i64: 1, 16, 1>}, {transform_indices = @transform_3, window_bounds = array<i64: 1, 1, 16>}, {pipeline_mode = #tpu.pipeline_mode<synchronous>, transform_indices = @transform_4, window_bounds = array<i64: 320, 384>}, {pipeline_mode = #tpu.pipeline_mode<synchronous>, transform_indices = @transform_5, window_bounds = array<i64: 320, 768>}, {pipeline_mode = #tpu.pipeline_mode<synchronous>, transform_indices = @transform_6, window_bounds = array<i64: 384, 320>}, {pipeline_mode = #tpu.pipeline_mode<synchronous>, transform_indices = @transform_7, window_bounds = array<i64: 320, 128>}, {pipeline_mode = #tpu.pipeline_mode<synchronous>, transform_indices = @transform_8, window_bounds = array<i64: 8, 768>}, {transform_indices = @transform_9, window_bounds = array<i64: 1, 1, 320>}, {transform_indices = @transform_10, window_bounds = array<i64: 1, 1, 128>}]} {
    %c0 = arith.constant 0 : index
    %c0_0 = arith.constant 0 : index
    %0 = vector.load %arg10[%c0, %c0_0] : memref<8x768xf32, #tpu.memory_space<vmem>>, vector<1x384xf32>
    %c1 = arith.constant 1 : index
    %c0_1 = arith.constant 0 : index
    %1 = vector.load %arg10[%c1, %c0_1] : memref<8x768xf32, #tpu.memory_space<vmem>>, vector<1x768xf32>
    %c2 = arith.constant 2 : index
    %c0_2 = arith.constant 0 : index
    %2 = vector.load %arg10[%c2, %c0_2] : memref<8x768xf32, #tpu.memory_space<vmem>>, vector<1x320xf32>
    %c3 = arith.constant 3 : index
    %c0_3 = arith.constant 0 : index
    %3 = vector.load %arg10[%c3, %c0_3] : memref<8x768xf32, #tpu.memory_space<vmem>>, vector<1x320xf32>
    %c4 = arith.constant 4 : index
    %c0_4 = arith.constant 0 : index
    %4 = vector.load %arg10[%c4, %c0_4] : memref<8x768xf32, #tpu.memory_space<vmem>>, vector<1x320xf32>
    %c5 = arith.constant 5 : index
    %c0_5 = arith.constant 0 : index
    %5 = vector.load %arg10[%c5, %c0_5] : memref<8x768xf32, #tpu.memory_space<vmem>>, vector<1x128xf32>
    %c0_i32 = arith.constant 0 : i32
    %6 = arith.cmpi eq, %arg1, %c0_i32 : i32
    %7 = arith.extui %6 : i1 to i32
    %c0_i32_6 = arith.constant 0 : i32
    %8 = arith.cmpi ne, %7, %c0_i32_6 : i32
    scf.if %8 {
      %c0_51 = arith.constant 0 : index
      %c0_52 = arith.constant 0 : index
      %c0_53 = arith.constant 0 : index
      %87 = vector.load %arg3[%c0_51, %c0_52, %c0_53] : memref<1x16x320xbf16, #tpu.memory_space<vmem>>, vector<1x16x320xbf16>
      %88 = vector.shape_cast %87 : vector<1x16x320xbf16> to vector<16x320xbf16>
      %c0_54 = arith.constant 0 : index
      %c0_55 = arith.constant 0 : index
      %89 = vector.load %arg7[%c0_54, %c0_55] : memref<320x768xbf16, #tpu.memory_space<vmem>>, vector<320x768xbf16>
      %cst_56 = arith.constant dense<0.000000e+00> : vector<16x768xf32>
      %90 = tpu.matmul %88, %89, %cst_56 {dimension_numbers = #tpu.dot_dimension_numbers<[1], [0], [0], [1], [0, 0, 1, 1], [], []>} : vector<16x320xbf16>, vector<320x768xbf16>, vector<16x768xf32> -> vector<16x768xf32>
      %91 = vector.broadcast %1 : vector<1x768xf32> to vector<16x768xf32>
      %92 = arith.addf %90, %91 : vector<16x768xf32>
      %93 = vector.extract_strided_slice %92 {offsets = [0, 0], sizes = [16, 384], strides = [1, 1]} : vector<16x768xf32> to vector<16x384xf32>
      %94 = vector.shape_cast %93 : vector<16x384xf32> to vector<1x16x384xf32>
      %95 = arith.truncf %94 : vector<1x16x384xf32> to vector<1x16x384xbf16>
      %c0_57 = arith.constant 0 : index
      %c0_58 = arith.constant 0 : index
      %c0_59 = arith.constant 0 : index
      %96 = vector.load %arg13[%c0_57, %c0_58, %c0_59] : memref<1x16x384xbf16, #tpu.memory_space<vmem>>, vector<1x16x384xbf16>
      tpu.vector_store %arg13[%c0_57, %c0_58, %c0_59], %95 {strides = array<i32>} : memref<1x16x384xbf16, #tpu.memory_space<vmem>>, vector<1x16x384xbf16>,
      %97 = vector.extract_strided_slice %92 {offsets = [0, 384], sizes = [16, 384], strides = [1, 1]} : vector<16x768xf32> to vector<16x384xf32>
      %98 = vector.shape_cast %97 : vector<16x384xf32> to vector<1x16x384xf32>
      %99 = arith.truncf %98 : vector<1x16x384xf32> to vector<1x16x384xbf16>
      %c0_60 = arith.constant 0 : index
      %c0_61 = arith.constant 0 : index
      %c0_62 = arith.constant 0 : index
      %100 = vector.load %arg14[%c0_60, %c0_61, %c0_62] : memref<1x16x384xbf16, #tpu.memory_space<vmem>>, vector<1x16x384xbf16>
      tpu.vector_store %arg14[%c0_60, %c0_61, %c0_62], %99 {strides = array<i32>} : memref<1x16x384xbf16, #tpu.memory_space<vmem>>, vector<1x16x384xbf16>,
      %cst_63 = arith.constant 0.000000e+00 : f32
      %101 = vector.broadcast %cst_63 : f32 to vector<1x320xf32>
      %c0_64 = arith.constant 0 : index
      %c0_65 = arith.constant 0 : index
      %c0_66 = arith.constant 0 : index
      %102 = vector.load %arg11[%c0_64, %c0_65, %c0_66] : memref<1x1x320xf32, #tpu.memory_space<vmem>>, vector<1x1x320xf32>
      %103 = vector.shape_cast %102 : vector<1x1x320xf32> to vector<1x320xf32>
      %104 = vector.shape_cast %101 : vector<1x320xf32> to vector<1x1x320xf32>
      tpu.vector_store %arg11[%c0_64, %c0_65, %c0_66], %104 {strides = array<i32>} : memref<1x1x320xf32, #tpu.memory_space<vmem>>, vector<1x1x320xf32>,
      %cst_67 = arith.constant 0.000000e+00 : f32
      %105 = vector.broadcast %cst_67 : f32 to vector<1x1xf32>
      %c0_68 = arith.constant 0 : index
      %c0_69 = arith.constant 0 : index
      %106 = vector.load %arg15[%c0_68, %c0_69] : memref<1x1xf32, #tpu.memory_space<vmem>>, vector<1x1xf32>
      tpu.vector_store %arg15[%c0_68, %c0_69], %105 {strides = array<i32>} : memref<1x1xf32, #tpu.memory_space<vmem>>, vector<1x1xf32>,
    } else {
    }
    %c0_7 = arith.constant 0 : index
    %c0_8 = arith.constant 0 : index
    %c0_9 = arith.constant 0 : index
    %9 = vector.load %arg2[%c0_7, %c0_8, %c0_9] : memref<1x16x320xbf16, #tpu.memory_space<vmem>>, vector<1x16x320xbf16>
    %c0_10 = arith.constant 0 : index
    %c0_11 = arith.constant 0 : index
    %c0_12 = arith.constant 0 : index
    %10 = vector.load %arg4[%c0_10, %c0_11, %c0_12] : memref<1x16x1xf32, #tpu.memory_space<vmem>>, vector<1x16x1xf32>
    %c0_13 = arith.constant 0 : index
    %c0_14 = arith.constant 0 : index
    %c0_15 = arith.constant 0 : index
    %11 = vector.load %arg5[%c0_13, %c0_14, %c0_15] : memref<1x1x16xf32, #tpu.memory_space<vmem>>, vector<1x1x16xf32>
    %12 = vector.shape_cast %9 : vector<1x16x320xbf16> to vector<16x320xbf16>
    %c0_16 = arith.constant 0 : index
    %c0_17 = arith.constant 0 : index
    %13 = vector.load %arg6[%c0_16, %c0_17] : memref<320x384xbf16, #tpu.memory_space<vmem>>, vector<320x384xbf16>
    %cst = arith.constant dense<0.000000e+00> : vector<16x384xf32>
    %14 = tpu.matmul %12, %13, %cst {dimension_numbers = #tpu.dot_dimension_numbers<[1], [0], [0], [1], [0, 0, 1, 1], [], []>} : vector<16x320xbf16>, vector<320x384xbf16>, vector<16x384xf32> -> vector<16x384xf32>
    %15 = vector.broadcast %0 : vector<1x384xf32> to vector<16x384xf32>
    %16 = arith.addf %14, %15 : vector<16x384xf32>
    %17 = vector.shape_cast %16 : vector<16x384xf32> to vector<1x16x384xf32>
    %18 = arith.truncf %17 : vector<1x16x384xf32> to vector<1x16x384xbf16>
    %c0_18 = arith.constant 0 : index
    %c0_19 = arith.constant 0 : index
    %c0_20 = arith.constant 0 : index
    %19 = vector.load %arg13[%c0_18, %c0_19, %c0_20] : memref<1x16x384xbf16, #tpu.memory_space<vmem>>, vector<1x16x384xbf16>
    %cst_21 = arith.constant dense<0.000000e+00> : vector<1x16x16xf32>
    %20 = tpu.matmul %18, %19, %cst_21 {dimension_numbers = #tpu.dot_dimension_numbers<[2], [2], [1], [1], [0, 0, 0, 1, 1, 1], [0], [0]>} : vector<1x16x384xbf16>, vector<1x16x384xbf16>, vector<1x16x16xf32> -> vector<1x16x16xf32>
    %21 = vector.broadcast %10 : vector<1x16x1xf32> to vector<1x16x16xf32>
    %22 = vector.broadcast %11 : vector<1x1x16xf32> to vector<1x16x16xf32>
    %23 = arith.mulf %21, %22 : vector<1x16x16xf32>
    %24 = arith.addf %20, %23 : vector<1x16x16xf32>
    %cst_22 = arith.constant dense<0xFF800000> : vector<1x16xf32>
    %25 = vector.multi_reduction <maximumf>, %24, %cst_22 [2] : vector<1x16x16xf32> to vector<1x16xf32>
    %26 = vector.shape_cast %25 : vector<1x16xf32> to vector<1x16x1xf32>
    %27 = vector.broadcast %26 : vector<1x16x1xf32> to vector<1x16x16xf32>
    %28 = arith.subf %24, %27 : vector<1x16x16xf32>
    %29 = math.exp %28 : vector<1x16x16xf32>
    %cst_23 = arith.constant dense<0.000000e+00> : vector<1x16xf32>
    %30 = vector.multi_reduction <add>, %29, %cst_23 [2] : vector<1x16x16xf32> to vector<1x16xf32>
    %31 = vector.shape_cast %30 : vector<1x16xf32> to vector<1x16x1xf32>
    %32 = tpu.reciprocal %31 {approx = true} : vector<1x16x1xf32> -> vector<1x16x1xf32>
    %33 = vector.broadcast %32 : vector<1x16x1xf32> to vector<1x16x16xf32>
    %34 = arith.mulf %29, %33 : vector<1x16x16xf32>
    %35 = arith.truncf %34 : vector<1x16x16xf32> to vector<1x16x16xbf16>
    %c0_24 = arith.constant 0 : index
    %c0_25 = arith.constant 0 : index
    %c0_26 = arith.constant 0 : index
    %36 = vector.load %arg14[%c0_24, %c0_25, %c0_26] : memref<1x16x384xbf16, #tpu.memory_space<vmem>>, vector<1x16x384xbf16>
    %cst_27 = arith.constant dense<0.000000e+00> : vector<1x16x384xf32>
    %37 = tpu.matmul %35, %36, %cst_27 {dimension_numbers = #tpu.dot_dimension_numbers<[2], [1], [1], [2], [0, 0, 0, 1, 1, 2], [0], [0]>} : vector<1x16x16xbf16>, vector<1x16x384xbf16>, vector<1x16x384xf32> -> vector<1x16x384xf32>
    %38 = vector.shape_cast %37 : vector<1x16x384xf32> to vector<16x384xf32>
    %39 = arith.truncf %38 : vector<16x384xf32> to vector<16x384xbf16>
    %c0_28 = arith.constant 0 : index
    %c0_29 = arith.constant 0 : index
    %40 = vector.load %arg8[%c0_28, %c0_29] : memref<384x320xbf16, #tpu.memory_space<vmem>>, vector<384x320xbf16>
    %cst_30 = arith.constant dense<0.000000e+00> : vector<16x320xf32>
    %41 = tpu.matmul %39, %40, %cst_30 {dimension_numbers = #tpu.dot_dimension_numbers<[1], [0], [0], [1], [0, 0, 1, 1], [], []>} : vector<16x384xbf16>, vector<384x320xbf16>, vector<16x320xf32> -> vector<16x320xf32>
    %42 = vector.broadcast %2 : vector<1x320xf32> to vector<16x320xf32>
    %43 = arith.addf %41, %42 : vector<16x320xf32>
    %cst_31 = arith.constant dense<0.000000e+00> : vector<16xf32>
    %44 = vector.multi_reduction <add>, %43, %cst_31 [1] : vector<16x320xf32> to vector<16xf32>
    %45 = vector.shape_cast %44 : vector<16xf32> to vector<16x1xf32>
    %cst_32 = arith.constant 3.200000e+02 : f32
    %46 = vector.broadcast %cst_32 : f32 to vector<16x1xf32>
    %47 = arith.divf %45, %46 : vector<16x1xf32>
    %48 = arith.mulf %43, %43 : vector<16x320xf32>
    %cst_33 = arith.constant dense<0.000000e+00> : vector<16xf32>
    %49 = vector.multi_reduction <add>, %48, %cst_33 [1] : vector<16x320xf32> to vector<16xf32>
    %50 = vector.shape_cast %49 : vector<16xf32> to vector<16x1xf32>
    %cst_34 = arith.constant 3.200000e+02 : f32
    %51 = vector.broadcast %cst_34 : f32 to vector<16x1xf32>
    %52 = arith.divf %50, %51 : vector<16x1xf32>
    %53 = arith.mulf %47, %47 : vector<16x1xf32>
    %54 = arith.subf %52, %53 : vector<16x1xf32>
    %cst_35 = arith.constant 0.000000e+00 : f32
    %55 = vector.broadcast %cst_35 : f32 to vector<16x1xf32>
    %56 = arith.maximumf %54, %55 : vector<16x1xf32>
    %57 = vector.broadcast %47 : vector<16x1xf32> to vector<16x320xf32>
    %58 = arith.subf %43, %57 : vector<16x320xf32>
    %cst_36 = arith.constant 9.99999974E-6 : f32
    %59 = vector.broadcast %cst_36 : f32 to vector<16x1xf32>
    %60 = arith.addf %56, %59 : vector<16x1xf32>
    %61 = math.rsqrt %60 : vector<16x1xf32>
    %62 = vector.broadcast %61 : vector<16x1xf32> to vector<16x320xf32>
    %63 = arith.mulf %58, %62 : vector<16x320xf32>
    %64 = vector.broadcast %3 : vector<1x320xf32> to vector<16x320xf32>
    %65 = arith.mulf %63, %64 : vector<16x320xf32>
    %66 = vector.broadcast %4 : vector<1x320xf32> to vector<16x320xf32>
    %67 = arith.addf %65, %66 : vector<16x320xf32>
    %68 = vector.shape_cast %67 : vector<16x320xf32> to vector<1x16x320xf32>
    %69 = arith.extf %9 : vector<1x16x320xbf16> to vector<1x16x320xf32>
    %70 = arith.addf %68, %69 : vector<1x16x320xf32>
    %c0_37 = arith.constant 0 : index
    %c0_38 = arith.constant 0 : index
    %c0_39 = arith.constant 0 : index
    %71 = vector.load %arg11[%c0_37, %c0_38, %c0_39] : memref<1x1x320xf32, #tpu.memory_space<vmem>>, vector<1x1x320xf32>
    %72 = vector.shape_cast %71 : vector<1x1x320xf32> to vector<1x320xf32>
    %73 = vector.broadcast %10 : vector<1x16x1xf32> to vector<1x16x320xf32>
    %74 = arith.mulf %70, %73 : vector<1x16x320xf32>
    %cst_40 = arith.constant dense<0.000000e+00> : vector<1x320xf32>
    %75 = vector.multi_reduction <add>, %74, %cst_40 [1] : vector<1x16x320xf32> to vector<1x320xf32>
    %76 = arith.addf %72, %75 : vector<1x320xf32>
    %c0_41 = arith.constant 0 : index
    %c0_42 = arith.constant 0 : index
    %c0_43 = arith.constant 0 : index
    %77 = vector.load %arg11[%c0_41, %c0_42, %c0_43] : memref<1x1x320xf32, #tpu.memory_space<vmem>>, vector<1x1x320xf32>
    %78 = vector.shape_cast %77 : vector<1x1x320xf32> to vector<1x320xf32>
    %79 = vector.shape_cast %76 : vector<1x320xf32> to vector<1x1x320xf32>
    tpu.vector_store %arg11[%c0_41, %c0_42, %c0_43], %79 {strides = array<i32>} : memref<1x1x320xf32, #tpu.memory_space<vmem>>, vector<1x1x320xf32>,
    %c0_44 = arith.constant 0 : index
    %c0_45 = arith.constant 0 : index
    %80 = vector.load %arg15[%c0_44, %c0_45] : memref<1x1xf32, #tpu.memory_space<vmem>>, vector<1x1xf32>
    %cst_46 = arith.constant dense<0.000000e+00> : vector<1x1xf32>
    %81 = vector.multi_reduction <add>, %10, %cst_46 [1] : vector<1x16x1xf32> to vector<1x1xf32>
    %82 = arith.addf %80, %81 : vector<1x1xf32>
    %c0_47 = arith.constant 0 : index
    %c0_48 = arith.constant 0 : index
    %83 = vector.load %arg15[%c0_47, %c0_48] : memref<1x1xf32, #tpu.memory_space<vmem>>, vector<1x1xf32>
    tpu.vector_store %arg15[%c0_47, %c0_48], %82 {strides = array<i32>} : memref<1x1xf32, #tpu.memory_space<vmem>>, vector<1x1xf32>,
    %c0_i32_49 = arith.constant 0 : i32
    %84 = arith.cmpi eq, %arg1, %c0_i32_49 : i32
    %85 = arith.extui %84 : i1 to i32
    %c0_i32_50 = arith.constant 0 : i32
    %86 = arith.cmpi ne, %85, %c0_i32_50 : i32
    scf.if %86 {
      %c0_51 = arith.constant 0 : index
      %c0_52 = arith.constant 0 : index
      %87 = vector.load %arg15[%c0_51, %c0_52] : memref<1x1xf32, #tpu.memory_space<vmem>>, vector<1x1xf32>
      %cst_53 = arith.constant 9.99999997E-7 : f32
      %88 = vector.broadcast %cst_53 : f32 to vector<1x1xf32>
      %89 = arith.maximumf %87, %88 : vector<1x1xf32>
      %c0_54 = arith.constant 0 : index
      %c0_55 = arith.constant 0 : index
      %c0_56 = arith.constant 0 : index
      %90 = vector.load %arg11[%c0_54, %c0_55, %c0_56] : memref<1x1x320xf32, #tpu.memory_space<vmem>>, vector<1x1x320xf32>
      %91 = vector.shape_cast %90 : vector<1x1x320xf32> to vector<1x320xf32>
      %92 = vector.broadcast %89 : vector<1x1xf32> to vector<1x320xf32>
      %93 = arith.divf %91, %92 : vector<1x320xf32>
      %c0_57 = arith.constant 0 : index
      %c0_58 = arith.constant 0 : index
      %c0_59 = arith.constant 0 : index
      %94 = vector.load %arg11[%c0_57, %c0_58, %c0_59] : memref<1x1x320xf32, #tpu.memory_space<vmem>>, vector<1x1x320xf32>
      %95 = vector.shape_cast %94 : vector<1x1x320xf32> to vector<1x320xf32>
      %96 = vector.shape_cast %93 : vector<1x320xf32> to vector<1x1x320xf32>
      tpu.vector_store %arg11[%c0_57, %c0_58, %c0_59], %96 {strides = array<i32>} : memref<1x1x320xf32, #tpu.memory_space<vmem>>, vector<1x1x320xf32>,
      %97 = arith.truncf %93 : vector<1x320xf32> to vector<1x320xbf16>
      %c0_60 = arith.constant 0 : index
      %c0_61 = arith.constant 0 : index
      %98 = vector.load %arg9[%c0_60, %c0_61] : memref<320x128xbf16, #tpu.memory_space<vmem>>, vector<320x128xbf16>
      %cst_62 = arith.constant dense<0.000000e+00> : vector<1x128xf32>
      %99 = tpu.matmul %97, %98, %cst_62 {dimension_numbers = #tpu.dot_dimension_numbers<[1], [0], [0], [1], [0, 0, 1, 1], [], []>} : vector<1x320xbf16>, vector<320x128xbf16>, vector<1x128xf32> -> vector<1x128xf32>
      %100 = arith.addf %99, %5 : vector<1x128xf32>
      %cst_63 = arith.constant dense<0xFF800000> : vector<1xf32>
      %101 = vector.multi_reduction <maximumf>, %100, %cst_63 [1] : vector<1x128xf32> to vector<1xf32>
      %102 = vector.shape_cast %101 : vector<1xf32> to vector<1x1xf32>
      %103 = vector.broadcast %102 : vector<1x1xf32> to vector<1x128xf32>
      %104 = arith.subf %100, %103 : vector<1x128xf32>
      %105 = math.exp %104 : vector<1x128xf32>
      %cst_64 = arith.constant dense<0.000000e+00> : vector<1xf32>
      %106 = vector.multi_reduction <add>, %105, %cst_64 [1] : vector<1x128xf32> to vector<1xf32>
      %107 = vector.shape_cast %106 : vector<1xf32> to vector<1x1xf32>
      %108 = vector.broadcast %107 : vector<1x1xf32> to vector<1x128xf32>
      %109 = arith.divf %105, %108 : vector<1x128xf32>
      %c0_65 = arith.constant 0 : index
      %c0_66 = arith.constant 0 : index
      %c0_67 = arith.constant 0 : index
      %110 = vector.load %arg12[%c0_65, %c0_66, %c0_67] : memref<1x1x128xf32, #tpu.memory_space<vmem>>, vector<1x1x128xf32>
      %111 = vector.shape_cast %110 : vector<1x1x128xf32> to vector<1x128xf32>
      %112 = vector.shape_cast %109 : vector<1x128xf32> to vector<1x1x128xf32>
      tpu.vector_store %arg12[%c0_65, %c0_66, %c0_67], %112 {strides = array<i32>} : memref<1x1x128xf32, #tpu.memory_space<vmem>>, vector<1x1x128xf32>,
    } else {
    }
    return
  }
  func.func @transform_0(%arg0: i32, %arg1: i32) -> (i32, i32, i32) {
    %c0_i32 = arith.constant 0 : i32
    %c0_i32_0 = arith.constant 0 : i32
    return %arg0, %arg1, %c0_i32 : i32, i32, i32
  }
  func.func @transform_1(%arg0: i32, %arg1: i32) -> (i32, i32, i32) {
    %c0_i32 = arith.constant 0 : i32
    %c0_i32_0 = arith.constant 0 : i32
    %c0_i32_1 = arith.constant 0 : i32
    return %arg0, %c0_i32, %c0_i32_0 : i32, i32, i32
  }
  func.func @transform_2(%arg0: i32, %arg1: i32) -> (i32, i32, i32) {
    %c0_i32 = arith.constant 0 : i32
    %c0_i32_0 = arith.constant 0 : i32
    return %arg0, %arg1, %c0_i32 : i32, i32, i32
  }
  func.func @transform_3(%arg0: i32, %arg1: i32) -> (i32, i32, i32) {
    %c0_i32 = arith.constant 0 : i32
    %c0_i32_0 = arith.constant 0 : i32
    %c0_i32_1 = arith.constant 0 : i32
    return %arg0, %c0_i32, %c0_i32_0 : i32, i32, i32
  }
  func.func @transform_4(%arg0: i32, %arg1: i32) -> (i32, i32) {
    %c0_i32 = arith.constant 0 : i32
    %c0_i32_0 = arith.constant 0 : i32
    %c0_i32_1 = arith.constant 0 : i32
    return %c0_i32, %c0_i32_0 : i32, i32
  }
  func.func @transform_5(%arg0: i32, %arg1: i32) -> (i32, i32) {
    %c0_i32 = arith.constant 0 : i32
    %c0_i32_0 = arith.constant 0 : i32
    %c0_i32_1 = arith.constant 0 : i32
    return %c0_i32, %c0_i32_0 : i32, i32
  }
  func.func @transform_6(%arg0: i32, %arg1: i32) -> (i32, i32) {
    %c0_i32 = arith.constant 0 : i32
    %c0_i32_0 = arith.constant 0 : i32
    %c0_i32_1 = arith.constant 0 : i32
    return %c0_i32, %c0_i32_0 : i32, i32
  }
  func.func @transform_7(%arg0: i32, %arg1: i32) -> (i32, i32) {
    %c0_i32 = arith.constant 0 : i32
    %c0_i32_0 = arith.constant 0 : i32
    %c0_i32_1 = arith.constant 0 : i32
    return %c0_i32, %c0_i32_0 : i32, i32
  }
  func.func @transform_8(%arg0: i32, %arg1: i32) -> (i32, i32) {
    %c0_i32 = arith.constant 0 : i32
    %c0_i32_0 = arith.constant 0 : i32
    %c0_i32_1 = arith.constant 0 : i32
    return %c0_i32, %c0_i32_0 : i32, i32
  }
  func.func @transform_9(%arg0: i32, %arg1: i32) -> (i32, i32, i32) {
    %c0_i32 = arith.constant 0 : i32
    %c0_i32_0 = arith.constant 0 : i32
    %c0_i32_1 = arith.constant 0 : i32
    return %arg0, %c0_i32, %c0_i32_0 : i32, i32, i32
  }
  func.func @transform_10(%arg0: i32, %arg1: i32) -> (i32, i32, i32) {
    %c0_i32 = arith.constant 0 : i32
    %c0_i32_0 = arith.constant 0 : i32
    %c0_i32_1 = arith.constant 0 : i32
    return %arg0, %c0_i32, %c0_i32_0 : i32, i32, i32
  }
}

</mosaic_0001>

<bundles_post_ra>
// kernel: attention_model_forward.1
= control target key start
LH: loop header
LB: loop body
LE: loop exit
PB: predicated region body
PF: predicated region fallthrough
CT: control target
= control target key end

     0   :  { %s7068_s0 = inlined_call_operand.vmem [shape: bf16[2,16,320], index: 0, kind: input, shape index: {}]   ;;  %s7069_s1 = inlined_call_operand.vmem [shape: bf16[2,16,320], index: 1, kind: input, shape index: {}]   ;;  %s7070_s2 = inlined_call_operand.vmem [shape: f32[2,16,1], index: 2, kind: input, shape index: {}]   ;;  %s7071_s3 = inlined_call_operand.vmem [shape: f32[2,1,16], index: 3, kind: input, shape index: {}]   ;;  %s7072_s4 = inlined_call_operand.vmem [shape: bf16[320,384], index: 4, kind: input, shape index: {}]   ;;  %s7073_s5 = inlined_call_operand.vmem [shape: bf16[320,768], index: 5, kind: input, shape index: {}]   ;;  %s7074_s6 = inlined_call_operand.vmem [shape: bf16[384,320], index: 6, kind: input, shape index: {}]   ;;  %s7075_s7 = inlined_call_operand.vmem [shape: bf16[320,128], index: 7, kind: input, shape index: {}]   ;;  %s7076_s8 = inlined_call_operand.vmem [shape: f32[8,768], index: 8, kind: input, shape index: {}]   ;;  %s7077_s9 = inlined_call_operand.vmem [shape: f32[2,1,320], index: 9, kind: output, shape index: {0}]   ;;  %s7078_s10 = inlined_call_operand.hbm [shape: f32[2,1,128], index: 10, kind: output, shape index: {1}]  }
   0x1   :  { %7082 = sst [smem:[#allocation11_spill]] %s7068_s0 }
   0x2   :  { %16 = vsyncpa [#allocation6], 0 }
   0x3   :  { %18 = vsyncpa [#allocation6 + $0x1], 0  ;;  %s5150_s13 = smov 0   ;;  %s5152_s14 = smov 0  }
   0x4   :  { %s5154_s15 = smov 0   ;;  %s5156_s16 = smov 0  }
   0x5   :  { %s5158_s17 = smov 0   ;;  %s5160_s18 = smov 0  }
   0x6 LB: > { %7083 = sst [smem:[#allocation8_spill]] %s5086_s17  ;;  %s3479_s19 = sadd.s32 4294967295, %s5090_s18   ;;  %s5090_s18 = sphi %s5160_s18, %s24_s18   ;;  %s5086_s17 = sphi %s5158_s17, %s7094_s17   ;;  %s5082_s16 = sphi %s5156_s16, %s7093_s16   ;;  %s5078_s15 = sphi %s5154_s15, %s7097_s15   ;;  %s5074_s14 = sphi %s5152_s14, %s7096_s14   ;;  %s5070_s13 = sphi %s5150_s13, %s7095_s13  }
   0x7   : > { %s3480_s20 = sadd.s32 4294967294, %s5090_s18   ;;  %s36_s21 = sadd.s32 1, %s5086_s17 }
   0x8   : > { %s282_s22 = sadd.s32 1, %s5078_s15  ;;  %p38_p0 = scmp.ge.s32.totalorder %s36_s21, 2 }
   0x9   : > { %p292_p1 = scmp.ne.s32.totalorder %s5078_s15, %s5074_s14  ;;  %p293_p2 = scmp.eq.s32.totalorder %s3479_s19, 1 }
   0xa   : > { %p298_p3 = scmp.ne.s32.totalorder %s5074_s14, %s5070_s13  ;;  %s7099_s21 = smov (%p38_p0, %s36_s21), 0 }
   0xb   : > { %7084 = sst [smem:[#allocation9_spill]] %s7099_s21  ;;  %p5190_p4 = por %p293_p2, %p292_p1 }
   0xc   : > { %p299_p5 = scmp.eq.s32.totalorder %s3480_s20, 1  ;;  %s279_s24 = ssub.s32 %s5086_s17, %s7099_s21 }
   0xd   : > { %p3483_p6 = scmp.ge.s32.totalorder %s5090_s18, 1  ;;  %p280_p7 = scmp.eq.s32.totalorder %s279_s24, 0 }
   0xe   : > { %p5197_p8 = por %p299_p5, %p298_p3  ;;  %p373_p9 = scmp.lt.s32.totalorder %s5090_s18, 3 }
   0xf   : > { %s5203_s26 = scalar_select %p280_p7, %s5078_s15, %s282_s22  }
  0x10   : > { %p374_p10 = pnand %p3483_p6, %p373_p9 }
  0x11   : > { %7087 = sst [smem:[#allocation10_spill]] %s5203_s26  ;;  %p437_p11 = scmp.lt.s32.totalorder (!%p374_p10), %s5082_s16, 1 }
  0x12   : > { %377 = sbr.rel (%p374_p10) target bundleno = 1673 (0x689), region = 56  ;;  %s7089_s0 = sld [smem:[#allocation11_spill]] (!%p374_p10) }
  0x13   : > { %s5032_s29 = scalar_lea.hbm (!%p374_p10), %s7078_s10, 2 }
  0x17   : > { %v3675_v0 = vld [vmem:[%s7073_s5 + $0x150] sm:$0xf]  ;;  %v4693_v1 = vld [vmem:[%s7073_s5 + $0x164] sm:$0xf0]  ;;  %v4690_v9 = vld [vmem:[%s7073_s5 + $0x154] sm:$0xf] }
  0x18   : > { %v3867_v2 = vld [vmem:[%s7073_s5 + $0x2d0] sm:$0xf]  ;;  %v3676_v3 = vor.u32 %v4693_v1, %v3675_v0  ;;  %v4741_v4 = vld [vmem:[%s7073_s5 + $0x2e4] sm:$0xf0]  ;;  %v3677_v10 = vld [vmem:[%s7073_s5 + $0x168] sm:$0xf0] }
  0x19   : > { %v3963_v5 = vld [vmem:[%s7073_s5 + $0x390] sm:$0xf]  ;;  %v4765_v6 = vld [vmem:[%s7073_s5 + $0x3a4] sm:$0xf0]  ;;  %v3868_v7 = vor.u32 %v4741_v4, %v3867_v2  ;;  %v3651_v11 = vld [vmem:[%s7073_s5 + $0x120] sm:$0xf]  ;;  %v3680_v12 = vor.u32 %v4690_v9, %v3677_v10 }
  0x1a   : > { %v3964_v8 = vor.u32 %v4765_v6, %v3963_v5  ;;  %1242 = vmatpush.bf16.msra.mxu0 %v3676_v3  ;;  %v4687_v13 = vld [vmem:[%s7073_s5 + $0x134] sm:$0xf0]  ;;  %v3843_v14 = vld [vmem:[%s7073_s5 + $0x2a0] sm:$0xf]  ;;  %v4684_v20 = vld [vmem:[%s7073_s5 + $0x124] sm:$0xf] }
  0x1b   : > { %v4735_v15 = vld [vmem:[%s7073_s5 + $0x2b4] sm:$0xf0]  ;;  %1256 = vmatpush.bf16.msra.mxu1 %v3868_v7  ;;  %v3652_v16 = vor.u32 %v4687_v13, %v3651_v11  ;;  %v3939_v18 = vld [vmem:[%s7073_s5 + $0x360] sm:$0xf]  ;;  %1284 = vmatpush.bf16.msra.mxu3 %v3680_v12  ;;  %v3653_v22 = vld [vmem:[%s7073_s5 + $0x138] sm:$0xf0] }
  0x1c   : > { %1274 = vmatpush.bf16.msra.mxu2 %v3964_v8  ;;  %v3844_v17 = vor.u32 %v4735_v15, %v3843_v14  ;;  %v4759_v19 = vld [vmem:[%s7073_s5 + $0x374] sm:$0xf0]  ;;  %v3627_v23 = vld [vmem:[%s7073_s5 + $0xf0] sm:$0xf]  ;;  %v4681_v24 = vld [vmem:[%s7073_s5 + $0x104] sm:$0xf0]  ;;  %v3656_v25 = vor.u32 %v4684_v20, %v3653_v22 }
  0x1d   : > { %v3940_v21 = vor.u32 %v4759_v19, %v3939_v18  ;;  %v3819_v26 = vld [vmem:[%s7073_s5 + $0x270] sm:$0xf]  ;;  %v4729_v27 = vld [vmem:[%s7073_s5 + $0x284] sm:$0xf0]  ;;  %v3628_v29 = vor.u32 %v4681_v24, %v3627_v23  ;;  %v4678_v31 = vld [vmem:[%s7073_s5 + $0xf4] sm:$0xf] }
  0x1e   : > { %v3915_v28 = vld [vmem:[%s7073_s5 + $0x330] sm:$0xf]  ;;  %1243 = vmatpush.bf16.msra.mxu0 %v3652_v16  ;;  %v4753_v30 = vld [vmem:[%s7073_s5 + $0x344] sm:$0xf0]  ;;  %v3629_v32 = vld [vmem:[%s7073_s5 + $0x108] sm:$0xf0]  ;;  %v3820_v33 = vor.u32 %v4729_v27, %v3819_v26 }
  0x1f   : > { %1257 = vmatpush.bf16.msra.mxu1 %v3844_v17  ;;  %v3916_v34 = vor.u32 %v4753_v30, %v3915_v28  ;;  %v3603_v35 = vld [vmem:[%s7073_s5 + $0xc0] sm:$0xf]  ;;  %v4675_v36 = vld [vmem:[%s7073_s5 + $0xd4] sm:$0xf0]  ;;  %1285 = vmatpush.bf16.msra.mxu3 %v3656_v25  ;;  %v3632_v38 = vor.u32 %v4678_v31, %v3629_v32  ;;  %v4672_v42 = vld [vmem:[%s7073_s5 + $0xc4] sm:$0xf] }
  0x20   : > { %1275 = vmatpush.bf16.msra.mxu2 %v3940_v21  ;;  %v3795_v37 = vld [vmem:[%s7073_s5 + $0x240] sm:$0xf]  ;;  %v4723_v39 = vld [vmem:[%s7073_s5 + $0x254] sm:$0xf0]  ;;  %v3605_v43 = vld [vmem:[%s7073_s5 + $0xd8] sm:$0xf0]  ;;  %v3604_v45 = vor.u32 %v4675_v36, %v3603_v35 }
  0x21   : > { %v3891_v40 = vld [vmem:[%s7073_s5 + $0x300] sm:$0xf]  ;;  %v4747_v41 = vld [vmem:[%s7073_s5 + $0x314] sm:$0xf0]  ;;  %v4738_v44 = vld [vmem:[%s7073_s5 + $0x2d4] sm:$0xf]  ;;  %v3796_v47 = vor.u32 %v4723_v39, %v3795_v37  ;;  %v3608_v51 = vor.u32 %v4672_v42, %v3605_v43 }
  0x22   : > { %1244 = vmatpush.bf16.msra.mxu0 %v3628_v29  ;;  %v3869_v46 = vld [vmem:[%s7073_s5 + $0x2e8] sm:$0xf0]  ;;  %v3892_v48 = vor.u32 %v4747_v41, %v3891_v40  ;;  %v3579_v49 = vld [vmem:[%s7073_s5 + $0x90] sm:$0xf]  ;;  %v4669_v50 = vld [vmem:[%s7073_s5 + $0xa4] sm:$0xf0] }
  0x23   : > { %1258 = vmatpush.bf16.msra.mxu1 %v3820_v33  ;;  %1286 = vmatpush.bf16.msra.mxu3 %v3632_v38  ;;  %v3872_v52 = vor.u32 %v4738_v44, %v3869_v46  ;;  %v3771_v53 = vld [vmem:[%s7073_s5 + $0x210] sm:$0xf]  ;;  %v4717_v54 = vld [vmem:[%s7073_s5 + $0x224] sm:$0xf0]  ;;  %v4666_v55 = vld [vmem:[%s7073_s5 + $0x94] sm:$0xf]  ;;  %v3580_v59 = vor.u32 %v4669_v50, %v3579_v49 }
  0x24   : > { %1276 = vmatpush.bf16.msra.mxu2 %v3916_v34  ;;  %v3581_v56 = vld [vmem:[%s7073_s5 + $0xa8] sm:$0xf0]  ;;  %v4732_v57 = vld [vmem:[%s7073_s5 + $0x2a4] sm:$0xf]  ;;  %v3845_v58 = vld [vmem:[%s7073_s5 + $0x2b8] sm:$0xf0]  ;;  %v3772_v60 = vor.u32 %v4717_v54, %v3771_v53 }
  0x25   : > { %v3555_v61 = vld [vmem:[%s7073_s5 + $0x60] sm:$0xf]  ;;  %v4663_v62 = vld [vmem:[%s7073_s5 + $0x74] sm:$0xf0]  ;;  %v3584_v63 = vor.u32 %v4666_v55, %v3581_v56  ;;  %v3848_v0 = vor.u32 %v4732_v57, %v3845_v58  ;;  %v4660_v3 = vld [vmem:[%s7073_s5 + $0x64] sm:$0xf] }
  0x26   : > { %1245 = vmatpush.bf16.msra.mxu0 %v3604_v45  ;;  %v3747_v1 = vld [vmem:[%s7073_s5 + $0x1e0] sm:$0xf]  ;;  %v4711_v2 = vld [vmem:[%s7073_s5 + $0x1f4] sm:$0xf0]  ;;  %v3557_v4 = vld [vmem:[%s7073_s5 + $0x78] sm:$0xf0]  ;;  %v3556_v7 = vor.u32 %v4663_v62, %v3555_v61 }
  0x27   : > { %1259 = vmatpush.bf16.msra.mxu1 %v3796_v47  ;;  %1287 = vmatpush.bf16.msra.mxu3 %v3608_v51  ;;  %v4726_v5 = vld [vmem:[%s7073_s5 + $0x274] sm:$0xf]  ;;  %v3821_v6 = vld [vmem:[%s7073_s5 + $0x288] sm:$0xf0]  ;;  %v3531_v8 = vld [vmem:[%s7073_s5 + $0x30] sm:$0xf]  ;;  %v3748_v10 = vor.u32 %v4711_v2, %v3747_v1  ;;  %v3560_v13 = vor.u32 %v4660_v3, %v3557_v4 }
  0x28   : > { %1277 = vmatpush.bf16.msra.mxu2 %v3892_v48  ;;  %v4657_v9 = vld [vmem:[%s7073_s5 + $0x44] sm:$0xf0]  ;;  %v3723_v11 = vld [vmem:[%s7073_s5 + $0x1b0] sm:$0xf]  ;;  %v3824_v14 = vor.u32 %v4726_v5, %v3821_v6  ;;  %v4654_v15 = vld [vmem:[%s7073_s5 + $0x34] sm:$0xf] }
  0x29   : > { %v4705_v12 = vld [vmem:[%s7073_s5 + $0x1c4] sm:$0xf0]  ;;  %v3533_v16 = vld [vmem:[%s7073_s5 + $0x48] sm:$0xf0]  ;;  %v4720_v17 = vld [vmem:[%s7073_s5 + $0x244] sm:$0xf]  ;;  %v3532_v20 = vor.u32 %v4657_v9, %v3531_v8 }
  0x2a   : > { %1246 = vmatpush.bf16.msra.mxu0 %v3580_v59  ;;  %v3797_v18 = vld [vmem:[%s7073_s5 + $0x258] sm:$0xf0]  ;;  %v3507_v19 = vld [vmem:[%s7073_s5] sm:$0xf]  ;;  %s5384_s30 = scalar_select %p437_p11, %s5082_s16, 1  ;;  %v3724_v24 = vor.u32 %v4705_v12, %v3723_v11  ;;  %vm1238_vm0 = vcmask 523264   ;;  %v3536_v28 = vor.u32 %v4654_v15, %v3533_v16 }
  0x2b   : > { %1260 = vmatpush.bf16.msra.mxu1 %v3772_v60  ;;  %1288 = vmatpush.bf16.msra.mxu3 %v3584_v63  ;;  %v4651_v21 = vld [vmem:[%s7073_s5 + $0x14] sm:$0xf0]  ;;  %v3699_v22 = vld [vmem:[%s7073_s5 + $0x180] sm:$0xf]  ;;  %v4648_v25 = vld [vmem:[%s7073_s5 + $0x4] sm:$0xf]  ;;  %v3800_v29 = vor.u32 %v4720_v17, %v3797_v18 }
  0x2c   : > { %1298 = vmatpush.bf16.msrb.mxu2 %v3872_v52  ;;  %v4699_v23 = vld [vmem:[%s7073_s5 + $0x194] sm:$0xf0]  ;;  %s7081_s21 = smul.u32 24, %s5384_s30  ;;  %v3509_v26 = vld [vmem:[%s7073_s5 + $0x18] sm:$0xf0]  ;;  %v3508_v36 = vor.u32 %v4651_v21, %v3507_v19  ;;  %vm3046_vm1 = vcmask 7168  }
  0x2d   : > { %v4714_v27 = vld [vmem:[%s7073_s5 + $0x214] sm:$0xf]  ;;  %v3773_v30 = vld [vmem:[%s7073_s5 + $0x228] sm:$0xf0]  ;;  %v3683_v33 = vld [vmem:[%s7073_s5 + $0x158] sm:$0xf]  ;;  %v3700_v40 = vor.u32 %v4699_v23, %v3699_v22  ;;  %v3512_v45 = vor.u32 %v4648_v25, %v3509_v26 }
  0x2e   : > { %1247 = vmatpush.bf16.msra.mxu0 %v3556_v7  ;;  %v4762_v31 = vld [vmem:[%s7073_s5 + $0x394] sm:$0xf]  ;;  %v3965_v32 = vld [vmem:[%s7073_s5 + $0x3a8] sm:$0xf0]  ;;  %s5419_s11 = scalar_lea.vmem %s7069_s1, %s7081_s21  ;;  %v4694_v34 = vld [vmem:[%s7073_s5 + $0x16c] sm:$0xf0]  ;;  %v3776_v46 = vor.u32 %v4714_v27, %v3773_v30 }
  0x2f   : > { %1261 = vmatpush.bf16.msra.mxu1 %v3748_v10  ;;  %1289 = vmatpush.bf16.msra.mxu3 %v3560_v13  ;;  %v3875_v35 = vld [vmem:[%s7073_s5 + $0x2d8] sm:$0xf]  ;;  %v3503_v37 = vld [vmem:[%s5419_s11 + $0x8] sm:$0xf]  ;;  %v4647_v38 = vld [vmem:[%s5419_s11 + $0x10] sm:$0xf0]  ;;  %v3968_v42 = vor.u32 %v4762_v31, %v3965_v32  ;;  %v3684_v49 = vor.u32 %v4694_v34, %v3683_v33 }
  0x30   : > { %1299 = vmatpush.bf16.msrb.mxu2 %v3848_v0  ;;  %v4742_v39 = vld [vmem:[%s7073_s5 + $0x2ec] sm:$0xf0]  ;;  %v5435_v41 = vor.u32 %v4647_v38, %v3503_v37  ;;  %v3495_v43 = vld [vmem:[%s5419_s11] sm:$0xf]  ;;  %v4646_v44 = vld [vmem:[%s5419_s11 + $0x8] sm:$0xf0] }
  0x31   : > { %v4756_v47 = vld [vmem:[%s7073_s5 + $0x364] sm:$0xf]  ;;  %v3941_v48 = vld [vmem:[%s7073_s5 + $0x378] sm:$0xf0]  ;;  %v3876_v50 = vor.u32 %v4742_v39, %v3875_v35  ;;  %v3659_v53 = vld [vmem:[%s7073_s5 + $0x128] sm:$0xf]  ;;  %v5465_v57 = vor.u32 %v4646_v44, %v3495_v43 }
  0x32   : > { %1248 = vmatpush.bf16.msra.mxu0 %v3532_v20  ;;  %3985 = vmatmul.msk.bf16.vlgmr.msra.gmra.mxu2 %vm1238_vm0, %v5435_v41  ;;  %v4708_v51 = vld [vmem:[%s7073_s5 + $0x1e4] sm:$0xf]  ;;  %v3749_v52 = vld [vmem:[%s7073_s5 + $0x1f8] sm:$0xf0]  ;;  %v4688_v54 = vld [vmem:[%s7073_s5 + $0x13c] sm:$0xf0]  ;;  %v3944_v58 = vor.u32 %v4756_v47, %v3941_v48 }
  0x33   : > { %1262 = vmatpush.bf16.msra.mxu1 %v3724_v24  ;;  %1290 = vmatpush.bf16.msra.mxu3 %v3536_v28  ;;  %v3851_v55 = vld [vmem:[%s7073_s5 + $0x2a8] sm:$0xf]  ;;  %v4736_v56 = vld [vmem:[%s7073_s5 + $0x2bc] sm:$0xf0]  ;;  %v3752_v59 = vor.u32 %v4708_v51, %v3749_v52  ;;  %v4702_v60 = vld [vmem:[%s7073_s5 + $0x1b4] sm:$0xf]  ;;  %v3660_v63 = vor.u32 %v4688_v54, %v3659_v53 }
  0x34   : > { %1300 = vmatpush.bf16.msrb.mxu2 %v3824_v14  ;;  %v4750_v61 = vld [vmem:[%s7073_s5 + $0x334] sm:$0xf]  ;;  %v3917_v62 = vld [vmem:[%s7073_s5 + $0x348] sm:$0xf0]  ;;  %v3852_v0 = vor.u32 %v4736_v56, %v3851_v55  ;;  %v3635_v2 = vld [vmem:[%s7073_s5 + $0xf8] sm:$0xf] }
  0x35   : > { %v3725_v1 = vld [vmem:[%s7073_s5 + $0x1c8] sm:$0xf0]  ;;  %v4682_v3 = vld [vmem:[%s7073_s5 + $0x10c] sm:$0xf0]  ;;  %v3827_v4 = vld [vmem:[%s7073_s5 + $0x278] sm:$0xf]  ;;  %v3920_v7 = vor.u32 %v4750_v61, %v3917_v62 }
  0x36   : > { %1249 = vmatpush.bf16.msra.mxu0 %v3508_v36  ;;  %v4730_v5 = vld [vmem:[%s7073_s5 + $0x28c] sm:$0xf0]  ;;  %v4645_v6 = vld [vmem:[%s5419_s11 + $0x4] sm:$0xf]  ;;  %v3728_v10 = vor.u32 %v4702_v60, %v3725_v1  ;;  %v3701_v11 = vld [vmem:[%s7073_s5 + $0x198] sm:$0xf0]  ;;  %v3636_v15 = vor.u32 %v4682_v3, %v3635_v2 }
  0x37   : > { %1263 = vmatpush.bf16.msra.mxu1 %v3700_v40  ;;  %1291 = vmatpush.bf16.msra.mxu3 %v3512_v45  ;;  %v4696_v8 = vld [vmem:[%s7073_s5 + $0x184] sm:$0xf]  ;;  %v3497_v9 = vld [vmem:[%s5419_s11 + $0xc] sm:$0xf0]  ;;  %v3893_v13 = vld [vmem:[%s7073_s5 + $0x318] sm:$0xf0]  ;;  %v3828_v16 = vor.u32 %v4730_v5, %v3827_v4 }
  0x38   : > { %1301 = vmatpush.bf16.msrb.mxu2 %v3800_v29  ;;  %v4744_v12 = vld [vmem:[%s7073_s5 + $0x304] sm:$0xf]  ;;  %v5507_v14 = vor.u32 %v4645_v6, %v3497_v9  ;;  %v3611_v17 = vld [vmem:[%s7073_s5 + $0xc8] sm:$0xf]  ;;  %v3971_v18 = vld [vmem:[%s7073_s5 + $0x398] sm:$0xf]  ;;  %v3704_v26 = vor.u32 %v4696_v8, %v3701_v11 }
  0x39   : > { %1250 = vmatmul.bf16.vlgmr.msra.gmra.mxu0 %v5465_v57  ;;  %v4766_v19 = vld [vmem:[%s7073_s5 + $0x3ac] sm:$0xf0]  ;;  %v4676_v20 = vld [vmem:[%s7073_s5 + $0xdc] sm:$0xf0]  ;;  %v3803_v21 = vld [vmem:[%s7073_s5 + $0x248] sm:$0xf]  ;;  %v3896_v23 = vor.u32 %v4744_v12, %v3893_v13 }
  0x3a   : > { %1316 = vmatpush.bf16.msrb.mxu0 %v3968_v42  ;;  %1292 = vmatmul.bf16.vlgmr.msra.gmra.mxu3 %v5465_v57  ;;  %v4724_v22 = vld [vmem:[%s7073_s5 + $0x25c] sm:$0xf0]  ;;  %v4691_v24 = vld [vmem:[%s7073_s5 + $0x15c] sm:$0xf]  ;;  %v3685_v25 = vld [vmem:[%s7073_s5 + $0x170] sm:$0xf0]  ;;  %v3972_v27 = vor.u32 %v4766_v19, %v3971_v18  ;;  %v3612_v28 = vor.u32 %v4676_v20, %v3611_v17 }
  0x3b   : > { %1326 = vmatpush.bf16.msrb.mxu1 %v3684_v49  ;;  %1340 = vmatpush.bf16.msrb.mxu3 %v3876_v50  ;;  %v3804_v29 = vor.u32 %v4724_v22, %v3803_v21  ;;  %v3587_v30 = vld [vmem:[%s7073_s5 + $0x98] sm:$0xf]  ;;  %v3947_v31 = vld [vmem:[%s7073_s5 + $0x368] sm:$0xf]  ;;  %v4760_v32 = vld [vmem:[%s7073_s5 + $0x37c] sm:$0xf0]  ;;  %v3688_v33 = vor.u32 %v4691_v24, %v3685_v25 }
  0x3c   : > { %1302 = vmatpush.bf16.msrb.mxu2 %v3776_v46  ;;  %1264 = vmatmul.bf16.vlgmr.msra.gmra.mxu1 %v5507_v14  ;;  %v4670_v34 = vld [vmem:[%s7073_s5 + $0xac] sm:$0xf0]  ;;  %v3779_v35 = vld [vmem:[%s7073_s5 + $0x218] sm:$0xf]  ;;  %v4685_v37 = vld [vmem:[%s7073_s5 + $0x12c] sm:$0xf]  ;;  %v3948_v39 = vor.u32 %v4760_v32, %v3947_v31 }
  0x3d   : > { %v4718_v36 = vld [vmem:[%s7073_s5 + $0x22c] sm:$0xf0]  ;;  %v3661_v38 = vld [vmem:[%s7073_s5 + $0x140] sm:$0xf0]  ;;  %v3588_v40 = vor.u32 %v4670_v34, %v3587_v30  ;;  %v3563_v43 = vld [vmem:[%s7073_s5 + $0x68] sm:$0xf] }
  0x3e   : > { %1317 = vmatpush.bf16.msrb.mxu0 %v3944_v58  ;;  %v3780_v42 = vor.u32 %v4718_v36, %v3779_v35  ;;  %v3923_v44 = vld [vmem:[%s7073_s5 + $0x338] sm:$0xf]  ;;  %v4754_v45 = vld [vmem:[%s7073_s5 + $0x34c] sm:$0xf0]  ;;  %v3664_v46 = vor.u32 %v4685_v37, %v3661_v38  ;;  %v4664_v47 = vld [vmem:[%s7073_s5 + $0x7c] sm:$0xf0] }
  0x3f   : > { %1327 = vmatpush.bf16.msrb.mxu1 %v3660_v63  ;;  %1341 = vmatpush.bf16.msrb.mxu3 %v3852_v0  ;;  %v3755_v48 = vld [vmem:[%s7073_s5 + $0x1e8] sm:$0xf]  ;;  %v4712_v49 = vld [vmem:[%s7073_s5 + $0x1fc] sm:$0xf0]  ;;  %v4679_v50 = vld [vmem:[%s7073_s5 + $0xfc] sm:$0xf]  ;;  %v3924_v52 = vor.u32 %v4754_v45, %v3923_v44  ;;  %v3564_v54 = vor.u32 %v4664_v47, %v3563_v43 }
  0x40   : > { %1303 = vmatpush.bf16.msrb.mxu2 %v3752_v59  ;;  %v3637_v51 = vld [vmem:[%s7073_s5 + $0x110] sm:$0xf0]  ;;  %v3539_v53 = vld [vmem:[%s7073_s5 + $0x38] sm:$0xf]  ;;  %v3756_v55 = vor.u32 %v4712_v49, %v3755_v48  ;;  %v4658_v56 = vld [vmem:[%s7073_s5 + $0x4c] sm:$0xf0] }
  0x41   : > { %v3899_v58 = vld [vmem:[%s7073_s5 + $0x308] sm:$0xf]  ;;  %v4748_v59 = vld [vmem:[%s7073_s5 + $0x31c] sm:$0xf0]  ;;  %v3640_v60 = vor.u32 %v4679_v50, %v3637_v51  ;;  %v3731_v61 = vld [vmem:[%s7073_s5 + $0x1b8] sm:$0xf]  ;;  %v3540_v4 = vor.u32 %v4658_v56, %v3539_v53 }
  0x42   : > { %1318 = vmatpush.bf16.msrb.mxu0 %v3920_v7  ;;  %v4706_v62 = vld [vmem:[%s7073_s5 + $0x1cc] sm:$0xf0]  ;;  %v4673_v63 = vld [vmem:[%s7073_s5 + $0xcc] sm:$0xf]  ;;  %v3613_v0 = vld [vmem:[%s7073_s5 + $0xe0] sm:$0xf0]  ;;  %v3900_v3 = vor.u32 %v4748_v59, %v3899_v58 }
  0x43   : > { %1328 = vmatpush.bf16.msrb.mxu1 %v3636_v15  ;;  %1342 = vmatpush.bf16.msrb.mxu3 %v3828_v16  ;;  %v4739_v1 = vld [vmem:[%s7073_s5 + $0x2dc] sm:$0xf]  ;;  %v3877_v2 = vld [vmem:[%s7073_s5 + $0x2f0] sm:$0xf0]  ;;  %v3732_v5 = vor.u32 %v4706_v62, %v3731_v61  ;;  %v3515_v6 = vld [vmem:[%s7073_s5 + $0x8] sm:$0xf]  ;;  %v3616_v9 = vor.u32 %v4673_v63, %v3613_v0 }
  0x44   : > { %1304 = vmatpush.bf16.msrb.mxu2 %v3728_v10  ;;  %v4652_v7 = vld [vmem:[%s7073_s5 + $0x1c] sm:$0xf0]  ;;  %v3707_v8 = vld [vmem:[%s7073_s5 + $0x188] sm:$0xf]  ;;  %v3880_v10 = vor.u32 %v4739_v1, %v3877_v2  ;;  %v4763_v12 = vld [vmem:[%s7073_s5 + $0x39c] sm:$0xf] }
  0x45   : > { %v4700_v11 = vld [vmem:[%s7073_s5 + $0x19c] sm:$0xf0]  ;;  %v3973_v13 = vld [vmem:[%s7073_s5 + $0x3b0] sm:$0xf0]  ;;  %v4695_v16 = vld [vmem:[%s7073_s5 + $0x174] sm:$0xf0]  ;;  %v3516_v21 = vor.u32 %v4652_v7, %v3515_v6 }
  0x46   : > { %1319 = vmatpush.bf16.msrb.mxu0 %v3896_v23  ;;  %v3691_v15 = vld [vmem:[%s7073_s5 + $0x160] sm:$0xf]  ;;  %v4667_v17 = vld [vmem:[%s7073_s5 + $0x9c] sm:$0xf]  ;;  %v3589_v18 = vld [vmem:[%s7073_s5 + $0xb0] sm:$0xf0]  ;;  %v3708_v22 = vor.u32 %v4700_v11, %v3707_v8  ;;  %v3976_v23 = vor.u32 %v4763_v12, %v3973_v13 }
  0x47   : > { %1329 = vmatpush.bf16.msrb.mxu1 %v3612_v28  ;;  %1343 = vmatpush.bf16.msrb.mxu3 %v3804_v29  ;;  %v4733_v19 = vld [vmem:[%s7073_s5 + $0x2ac] sm:$0xf]  ;;  %v3853_v20 = vld [vmem:[%s7073_s5 + $0x2c0] sm:$0xf0]  ;;  %v3692_v24 = vor.u32 %v4695_v16, %v3691_v15  ;;  %v3667_v29 = vld [vmem:[%s7073_s5 + $0x130] sm:$0xf] }
  0x48   : > { %1305 = vmatpush.bf16.msrb.mxu2 %v3704_v26  ;;  %v4757_v25 = vld [vmem:[%s7073_s5 + $0x36c] sm:$0xf]  ;;  %v3949_v26 = vld [vmem:[%s7073_s5 + $0x380] sm:$0xf0]  ;;  %v3856_v28 = vor.u32 %v4733_v19, %v3853_v20  ;;  %v4689_v30 = vld [vmem:[%s7073_s5 + $0x144] sm:$0xf0] }
  0x49   : > { %3986 = vmatmul.msk.bf16.vlgmr.msrb.gmra.mxu0 %vm1238_vm0, %v5435_v41  ;;  %v4661_v31 = vld [vmem:[%s7073_s5 + $0x6c] sm:$0xf]  ;;  %v3565_v32 = vld [vmem:[%s7073_s5 + $0x80] sm:$0xf0]  ;;  %v3829_v34 = vld [vmem:[%s7073_s5 + $0x290] sm:$0xf0]  ;;  %v3952_v35 = vor.u32 %v4757_v25, %v3949_v26  ;;  %v3668_v36 = vor.u32 %v4689_v30, %v3667_v29 }
  0x4a   : > { %1358 = vmatpush.bf16.msra.mxu0 %v3972_v27  ;;  %v3592_v27 = vor.u32 %v4667_v17, %v3589_v18  ;;  %v4751_v37 = vld [vmem:[%s7073_s5 + $0x33c] sm:$0xf]  ;;  %v3925_v38 = vld [vmem:[%s7073_s5 + $0x350] sm:$0xf0]  ;;  %v4683_v43 = vld [vmem:[%s7073_s5 + $0x114] sm:$0xf0] }
  0x4b   : > { %1306 = vmatmul.bf16.vlgmr.msrb.gmra.mxu2 %v5507_v14  ;;  %1330 = vmatpush.bf16.msrb.mxu1 %v3588_v40  ;;  %v4655_v44 = vld [vmem:[%s7073_s5 + $0x3c] sm:$0xf]  ;;  %v3541_v45 = vld [vmem:[%s7073_s5 + $0x50] sm:$0xf0]  ;;  %v3805_v47 = vld [vmem:[%s7073_s5 + $0x260] sm:$0xf0]  ;;  %v3928_v48 = vor.u32 %v4751_v37, %v3925_v38 }
  0x4c   : > { %1368 = vmatpush.bf16.msra.mxu2 %v3688_v33  ;;  %1344 = vmatpush.bf16.msrb.mxu3 %v3780_v42  ;;  %v4727_v33 = vld [vmem:[%s7073_s5 + $0x27c] sm:$0xf]  ;;  %v3643_v42 = vld [vmem:[%s7073_s5 + $0x100] sm:$0xf]  ;;  %v4745_v50 = vld [vmem:[%s7073_s5 + $0x30c] sm:$0xf]  ;;  %v3544_v53 = vor.u32 %v4655_v44, %v3541_v45 }
  0x4d   : > { %v3832_v40 = vor.u32 %v4727_v33, %v3829_v34  ;;  %v3644_v49 = vor.u32 %v4683_v43, %v3643_v42  ;;  %v3901_v51 = vld [vmem:[%s7073_s5 + $0x320] sm:$0xf0]  ;;  %v4649_v56 = vld [vmem:[%s7073_s5 + $0xc] sm:$0xf]  ;;  %v4715_v59 = vld [vmem:[%s7073_s5 + $0x21c] sm:$0xf] }
  0x4e   : > { %1359 = vmatpush.bf16.msra.mxu0 %v3948_v39  ;;  %v3568_v39 = vor.u32 %v4661_v31, %v3565_v32  ;;  %v3517_v58 = vld [vmem:[%s7073_s5 + $0x20] sm:$0xf0]  ;;  %v3883_v61 = vld [vmem:[%s7073_s5 + $0x2e0] sm:$0xf]  ;;  %v4743_v62 = vld [vmem:[%s7073_s5 + $0x2f4] sm:$0xf0]  ;;  %v3904_v1 = vor.u32 %v4745_v50, %v3901_v51 }
  0x4f   : > { %1331 = vmatpush.bf16.msrb.mxu1 %v3564_v54  ;;  %v3979_v63 = vld [vmem:[%s7073_s5 + $0x3a0] sm:$0xf]  ;;  %v4767_v0 = vld [vmem:[%s7073_s5 + $0x3b4] sm:$0xf0]  ;;  %v3884_v7 = vor.u32 %v4743_v62, %v3883_v61  ;;  %v3859_v11 = vld [vmem:[%s7073_s5 + $0x2b0] sm:$0xf] }
  0x50   : > { %1369 = vmatpush.bf16.msra.mxu2 %v3664_v46  ;;  %1345 = vmatpush.bf16.msrb.mxu3 %v3756_v55  ;;  %v4721_v46 = vld [vmem:[%s7073_s5 + $0x24c] sm:$0xf]  ;;  %v4677_v55 = vld [vmem:[%s7073_s5 + $0xe4] sm:$0xf0]  ;;  %v4671_v6 = vld [vmem:[%s7073_s5 + $0xb4] sm:$0xf0]  ;;  %v3980_v8 = vor.u32 %v4767_v0, %v3979_v63 }
  0x51   : > { %v3808_v54 = vor.u32 %v4721_v46, %v3805_v47  ;;  %v4737_v12 = vld [vmem:[%s7073_s5 + $0x2c4] sm:$0xf0]  ;;  %v3955_v13 = vld [vmem:[%s7073_s5 + $0x370] sm:$0xf]  ;;  %v4731_v25 = vld [vmem:[%s7073_s5 + $0x294] sm:$0xf0] }
  0x52   : > { %1360 = vmatpush.bf16.msra.mxu0 %v3924_v52  ;;  %v3619_v52 = vld [vmem:[%s7073_s5 + $0xd0] sm:$0xf]  ;;  %v4761_v15 = vld [vmem:[%s7073_s5 + $0x384] sm:$0xf0]  ;;  %v3860_v20 = vor.u32 %v4737_v12, %v3859_v11  ;;  %v3931_v26 = vld [vmem:[%s7073_s5 + $0x340] sm:$0xf] }
  0x53   : > { %1332 = vmatpush.bf16.msrb.mxu1 %v3540_v4  ;;  %v3620_v2 = vor.u32 %v4677_v55, %v3619_v52  ;;  %v3571_v18 = vld [vmem:[%s7073_s5 + $0x70] sm:$0xf]  ;;  %v4665_v19 = vld [vmem:[%s7073_s5 + $0x84] sm:$0xf0]  ;;  %v3547_v30 = vld [vmem:[%s7073_s5 + $0x40] sm:$0xf] }
  0x54   : > { %1370 = vmatpush.bf16.msra.mxu2 %v3640_v60  ;;  %1346 = vmatpush.bf16.msrb.mxu3 %v3732_v5  ;;  %v3781_v60 = vld [vmem:[%s7073_s5 + $0x230] sm:$0xf0]  ;;  %v3595_v5 = vld [vmem:[%s7073_s5 + $0xa0] sm:$0xf]  ;;  %v4659_v31 = vld [vmem:[%s7073_s5 + $0x54] sm:$0xf0] }
  0x55   : > { %v3784_v4 = vor.u32 %v4715_v59, %v3781_v60  ;;  %v3596_v16 = vor.u32 %v4671_v6, %v3595_v5  ;;  %v4697_v32 = vld [vmem:[%s7073_s5 + $0x18c] sm:$0xf]  ;;  %v4725_v37 = vld [vmem:[%s7073_s5 + $0x264] sm:$0xf0]  ;;  %v3907_v38 = vld [vmem:[%s7073_s5 + $0x310] sm:$0xf]  ;;  %v3548_v42 = vor.u32 %v4659_v31, %v3547_v30 }
  0x56   : > { %1361 = vmatpush.bf16.msra.mxu0 %v3900_v3  ;;  %v3520_v3 = vor.u32 %v4649_v56, %v3517_v58  ;;  %v3693_v43 = vld [vmem:[%s7073_s5 + $0x178] sm:$0xf0]  ;;  %v4740_v44 = vld [vmem:[%s7073_s5 + $0x2e4] sm:$0xf]  ;;  %v3523_v47 = vld [vmem:[%s7073_s5 + $0x10] sm:$0xf] }
  0x57   : > { %1333 = vmatpush.bf16.msrb.mxu1 %v3516_v21  ;;  %v3956_v21 = vor.u32 %v4761_v15, %v3955_v13  ;;  %v3885_v45 = vld [vmem:[%s7073_s5 + $0x2f8] sm:$0xf0]  ;;  %v4764_v51 = vld [vmem:[%s7073_s5 + $0x3a4] sm:$0xf]  ;;  %v3787_v55 = vld [vmem:[%s7073_s5 + $0x220] sm:$0xf] }
  0x58   : > { %1371 = vmatpush.bf16.msra.mxu2 %v3616_v9  ;;  %1347 = vmatpush.bf16.msrb.mxu3 %v3708_v22  ;;  %v4709_v9 = vld [vmem:[%s7073_s5 + $0x1ec] sm:$0xf]  ;;  %v4703_v22 = vld [vmem:[%s7073_s5 + $0x1bc] sm:$0xf]  ;;  %v4719_v56 = vld [vmem:[%s7073_s5 + $0x234] sm:$0xf0] }
  0x59   : > { %3987 = vmatmul.msk.bf16.vlgmr.msra.gmra.mxu0 %vm1238_vm0, %v5435_v41  ;;  %v3981_v52 = vld [vmem:[%s7073_s5 + $0x3b8] sm:$0xf0]  ;;  %v4686_v58 = vld [vmem:[%s7073_s5 + $0x134] sm:$0xf]  ;;  %v3669_v60 = vld [vmem:[%s7073_s5 + $0x148] sm:$0xf0]  ;;  %v3788_v0 = vor.u32 %v4719_v56, %v3787_v55 }
  0x5a   : > { %1382 = vmatpush.bf16.msrb.mxu0 %v3880_v10  ;;  %1334 = vmatmul.bf16.vlgmr.msrb.gmra.mxu1 %v5465_v57  ;;  %v3757_v10 = vld [vmem:[%s7073_s5 + $0x200] sm:$0xf0]  ;;  %v4734_v61 = vld [vmem:[%s7073_s5 + $0x2b4] sm:$0xf]  ;;  %v3861_v62 = vld [vmem:[%s7073_s5 + $0x2c8] sm:$0xf0]  ;;  %v3984_v63 = vor.u32 %v4764_v51, %v3981_v52 }
  0x5b   : > { %1400 = vmatpush.bf16.msra.mxu1 %v3976_v23  ;;  %1348 = vmatmul.bf16.vlgmr.msrb.gmra.mxu3 %v5507_v14  ;;  %v3760_v17 = vor.u32 %v4709_v9, %v3757_v10  ;;  %v3733_v23 = vld [vmem:[%s7073_s5 + $0x1d0] sm:$0xf0]  ;;  %v3763_v5 = vld [vmem:[%s7073_s5 + $0x1f0] sm:$0xf]  ;;  %v4713_v6 = vld [vmem:[%s7073_s5 + $0x204] sm:$0xf0] }
  0x5c   : > { %1410 = vmatpush.bf16.msra.mxu3 %v3692_v24  ;;  %1372 = vmatpush.bf16.msra.mxu2 %v3592_v27  ;;  %v3835_v24 = vld [vmem:[%s7073_s5 + $0x280] sm:$0xf]  ;;  %v4755_v27 = vld [vmem:[%s7073_s5 + $0x354] sm:$0xf0]  ;;  %v3736_v29 = vor.u32 %v4703_v22, %v3733_v23  ;;  %v4728_v9 = vld [vmem:[%s7073_s5 + $0x284] sm:$0xf]  ;;  %v3764_v12 = vor.u32 %v4713_v6, %v3763_v5 }
  0x5d   : > { %v3836_v33 = vor.u32 %v4731_v25, %v3835_v24  ;;  %v3932_v34 = vor.u32 %v4755_v27, %v3931_v26  ;;  %v3837_v10 = vld [vmem:[%s7073_s5 + $0x298] sm:$0xf0]  ;;  %v4752_v13 = vld [vmem:[%s7073_s5 + $0x344] sm:$0xf]  ;;  %v4722_v22 = vld [vmem:[%s7073_s5 + $0x254] sm:$0xf] }
  0x5e   : > { %1383 = vmatpush.bf16.msrb.mxu0 %v3856_v28  ;;  %v3572_v28 = vor.u32 %v4665_v19, %v3571_v18  ;;  %v3933_v15 = vld [vmem:[%s7073_s5 + $0x358] sm:$0xf0]  ;;  %v3739_v18 = vld [vmem:[%s7073_s5 + $0x1c0] sm:$0xf]  ;;  %v4707_v19 = vld [vmem:[%s7073_s5 + $0x1d4] sm:$0xf0] }
  0x5f   : > { %1401 = vmatpush.bf16.msra.mxu1 %v3952_v35  ;;  %v3709_v35 = vld [vmem:[%s7073_s5 + $0x1a0] sm:$0xf0]  ;;  %v3813_v23 = vld [vmem:[%s7073_s5 + $0x268] sm:$0xf0]  ;;  %v3936_v24 = vor.u32 %v4752_v13, %v3933_v15  ;;  %v3715_v25 = vld [vmem:[%s7073_s5 + $0x190] sm:$0xf]  ;;  %v3740_v26 = vor.u32 %v4707_v19, %v3739_v18 }
  0x60   : > { %1411 = vmatpush.bf16.msra.mxu3 %v3668_v36  ;;  %1373 = vmatpush.bf16.msra.mxu2 %v3568_v39  ;;  %v3811_v36 = vld [vmem:[%s7073_s5 + $0x250] sm:$0xf]  ;;  %v4749_v39 = vld [vmem:[%s7073_s5 + $0x324] sm:$0xf0]  ;;  %v3712_v46 = vor.u32 %v4697_v32, %v3709_v35  ;;  %v3816_v31 = vor.u32 %v4722_v22, %v3813_v23  ;;  %v4668_v32 = vld [vmem:[%s7073_s5 + $0xa4] sm:$0xf] }
  0x61   : > { %v3908_v50 = vor.u32 %v4749_v39, %v3907_v38  ;;  %v4701_v27 = vld [vmem:[%s7073_s5 + $0x1a4] sm:$0xf0]  ;;  %v3597_v35 = vld [vmem:[%s7073_s5 + $0xb8] sm:$0xf0]  ;;  %v4716_v39 = vld [vmem:[%s7073_s5 + $0x224] sm:$0xf] }
  0x62   : > { %1384 = vmatpush.bf16.msrb.mxu0 %v3832_v40  ;;  %v4692_v40 = vld [vmem:[%s7073_s5 + $0x164] sm:$0xf]  ;;  %v4077_v51 = vld [vmem:[%s7072_s4 + $0x90] sm:$0xf]  ;;  %v4790_v52 = vld [vmem:[%s7072_s4 + $0x98] sm:$0xf0] }
  0x63   : > { %1402 = vmatpush.bf16.msra.mxu1 %v3928_v48  ;;  %v4653_v48 = vld [vmem:[%s7073_s5 + $0x24] sm:$0xf0]  ;;  %v4650_v5 = vld [vmem:[%s7073_s5 + $0x14] sm:$0xf]  ;;  %v4784_v13 = vld [vmem:[%s7072_s4 + $0x68] sm:$0xf0] }
  0x64   : > { %1412 = vmatpush.bf16.msra.mxu3 %v3644_v49  ;;  %1374 = vmatpush.bf16.msra.mxu2 %v3544_v53  ;;  %v3812_v49 = vor.u32 %v4725_v37, %v3811_v36  ;;  %v3696_v53 = vor.u32 %v4692_v40, %v3693_v43  ;;  %v3524_v59 = vor.u32 %v4653_v48, %v3523_v47  ;;  %v4089_v36 = vld [vmem:[%s7072_s4 + $0xa8] sm:$0xf]  ;;  %v4793_v37 = vld [vmem:[%s7072_s4 + $0xb0] sm:$0xf0]  ;;  %v3789_v40 = vld [vmem:[%s7073_s5 + $0x238] sm:$0xf0] }
  0x65   : > { %v4173_v47 = vld [vmem:[%s7072_s4 + $0x150] sm:$0xf]  ;;  %v4814_v48 = vld [vmem:[%s7072_s4 + $0x158] sm:$0xf0]  ;;  %v4698_v15 = vld [vmem:[%s7073_s5 + $0x194] sm:$0xf] }
  0x66   : > { %1385 = vmatpush.bf16.msrb.mxu0 %v3808_v54  ;;  %v3888_v54 = vor.u32 %v4740_v44, %v3885_v45  ;;  %v3600_v44 = vor.u32 %v4668_v32, %v3597_v35  ;;  %v4090_v45 = vor.u32 %v4793_v37, %v4089_v36  ;;  %v4174_v55 = vor.u32 %v4814_v48, %v4173_v47  ;;  %v4829_v18 = vld [vmem:[%s7072_s4 + $0x1d0] sm:$0xf0]  ;;  %v4137_v23 = vld [vmem:[%s7072_s4 + $0x108] sm:$0xf]  ;;  %v4125_v36 = vld [vmem:[%s7072_s4 + $0xf0] sm:$0xf] }
  0x67   : > { %1403 = vmatpush.bf16.msra.mxu1 %v3904_v1  ;;  %v4758_v1 = vld [vmem:[%s7073_s5 + $0x374] sm:$0xf]  ;;  %v4802_v37 = vld [vmem:[%s7072_s4 + $0xf8] sm:$0xf0]  ;;  %v4067_v47 = vld [vmem:[%s7072_s4 + $0x84] sm:$0xf0] }
  0x68   : > { %1413 = vmatpush.bf16.msra.mxu3 %v3620_v2  ;;  %1375 = vmatpush.bf16.msra.mxu2 %v3520_v3  ;;  %v3957_v2 = vld [vmem:[%s7073_s5 + $0x388] sm:$0xf0]  ;;  %v3672_v3 = vor.u32 %v4686_v58, %v3669_v60  ;;  %v4078_v58 = vor.u32 %v4790_v52, %v4077_v51  ;;  %v4161_v60 = vld [vmem:[%s7072_s4 + $0x138] sm:$0xf]  ;;  %v4799_v51 = vld [vmem:[%s7072_s4 + $0xe0] sm:$0xf0] }
  0x69   : > { %v3960_v11 = vor.u32 %v4758_v1, %v3957_v2  ;;  %v4787_v1 = vld [vmem:[%s7072_s4 + $0x80] sm:$0xf0]  ;;  %s7088_s17 = smul.u32 24, %s5384_s30  ;;  %s4644_s11 = sshll.u32 %s5384_s30, 4  ;;  %vm1515_vm2 = vcmask 0   ;;  %vm2173_vm3 = vcmask 130048  }
  0x6a   : > { %1386 = vmatpush.bf16.msrb.mxu0 %v3784_v4  ;;  %3988 = vmatmul.msk.bf16.vlgmr.msra.gmra.mxu1 %vm1238_vm0, %v5435_v41  ;;  %v3864_v4 = vor.u32 %v4734_v61, %v3861_v62  ;;  %v4811_v61 = vld [vmem:[%s7072_s4 + $0x140] sm:$0xf0]  ;;  %s460_s27 = scalar_lea.vmem %s7070_s2, %s4644_s11  ;;  %s4930_s24 = smul.u32 3, %s5384_s30  ;;  %vm3034_vm12 = vcmask 1040384   ;;  %vm3036_vm13 = vcmask 1041408  }
  0x6b   : > { %1424 = vmatpush.bf16.msrb.mxu1 %v3884_v7  ;;  %1376 = vmatmul.bf16.vlgmr.msra.gmra.mxu2 %v5465_v57  ;;  %v4680_v7 = vld [vmem:[%s7073_s5 + $0x104] sm:$0xf]  ;;  %s6122_s20 = scalar_lea.vmem %s7089_s0, %s7088_s17  ;;  %s464_s0 = scalar_lea.vmem %s7071_s3, %s5384_s30 }
  0x6c   : > { %1442 = vmatpush.bf16.msrb.mxu2 %v3980_v8  ;;  %1414 = vmatpush.bf16.msra.mxu3 %v3596_v16  ;;  %v3645_v8 = vld [vmem:[%s7073_s5 + $0x118] sm:$0xf0]  ;;  %v4704_v2 = vld [vmem:[%s7073_s5 + $0x1c4] sm:$0xf]  ;;  %s6920_s19 = scalar_lea.vmem %s7077_s9, %s4930_s24 }
  0x6d   : > { %v3648_v16 = vor.u32 %v4680_v7, %v3645_v8  ;;  %v3525_v8 = vld [vmem:[%s7073_s5 + $0x28] sm:$0xf0] }
  0x6e   : > { %1387 = vmatpush.bf16.msrb.mxu0 %v3760_v17  ;;  %v3840_v17 = vor.u32 %v4728_v9, %v3837_v10  ;;  %v4149_v9 = vld [vmem:[%s7072_s4 + $0x120] sm:$0xf]  ;;  %v4808_v10 = vld [vmem:[%s7072_s4 + $0x128] sm:$0xf0] }
  0x6f   : > { %1425 = vmatpush.bf16.msrb.mxu1 %v3860_v20  ;;  %v4674_v20 = vld [vmem:[%s7073_s5 + $0xd4] sm:$0xf]  ;;  %v4150_v19 = vor.u32 %v4808_v10, %v4149_v9  ;;  %v4780_v9 = vld [vmem:[%s7072_s4 + $0x4c] sm:$0xf]  ;;  %v4043_v10 = vld [vmem:[%s7072_s4 + $0x54] sm:$0xf0] }
  0x70   : > { %1443 = vmatpush.bf16.msrb.mxu2 %v3956_v21  ;;  %1415 = vmatpush.bf16.msra.mxu3 %v3572_v28  ;;  %v3621_v21 = vld [vmem:[%s7073_s5 + $0xe8] sm:$0xf0]  ;;  %v4746_v28 = vld [vmem:[%s7073_s5 + $0x314] sm:$0xf] }
  0x71   : > { %v3624_v30 = vor.u32 %v4674_v20, %v3621_v21  ;;  %v4792_v20 = vld [vmem:[%s7072_s4 + $0xac] sm:$0xf]  ;;  %v3528_v21 = vor.u32 %v4650_v5, %v3525_v8  ;;  %v4097_v5 = vld [vmem:[%s7072_s4 + $0xb0] sm:$0xf] }
  0x72   : > { %1388 = vmatpush.bf16.msrb.mxu0 %v3736_v29  ;;  %v3909_v29 = vld [vmem:[%s7073_s5 + $0x328] sm:$0xf0] }
  0x73   : > { %1426 = vmatpush.bf16.msrb.mxu1 %v3836_v33  ;;  %v4185_v33 = vld [vmem:[%s7072_s4 + $0x168] sm:$0xf]  ;;  %v3912_v38 = vor.u32 %v4746_v28, %v3909_v29  ;;  %v4781_v28 = vld [vmem:[%s7072_s4 + $0x50] sm:$0xf0] }
  0x74   : > { %1444 = vmatpush.bf16.msrb.mxu2 %v3932_v34  ;;  %1416 = vmatpush.bf16.msra.mxu3 %v3548_v42  ;;  %v4817_v34 = vld [vmem:[%s7072_s4 + $0x170] sm:$0xf0]  ;;  %v3716_v42 = vor.u32 %v4701_v27, %v3715_v25  ;;  %v4041_v27 = vld [vmem:[%s7072_s4 + $0x48] sm:$0xf] }
  0x75   : > { %v4186_v43 = vor.u32 %v4817_v34, %v4185_v33  ;;  %v4789_v33 = vld [vmem:[%s7072_s4 + $0x94] sm:$0xf]  ;;  %v4079_v34 = vld [vmem:[%s7072_s4 + $0x9c] sm:$0xf0]  ;;  %v4042_v35 = vor.u32 %v4781_v28, %v4041_v27 }
  0x76   : > { %1389 = vmatpush.bf16.msrb.mxu0 %v3712_v46  ;;  %v4662_v46 = vld [vmem:[%s7073_s5 + $0x74] sm:$0xf]  ;;  %v4223_v28 = vld [vmem:[%s7072_s4 + $0x1bc] sm:$0xf0] }
  0x77   : > { %1427 = vmatpush.bf16.msrb.mxu1 %v3812_v49  ;;  %v3792_v49 = vor.u32 %v4716_v39, %v3789_v40  ;;  %v4029_v39 = vld [vmem:[%s7072_s4 + $0x30] sm:$0xf]  ;;  %v4778_v40 = vld [vmem:[%s7072_s4 + $0x38] sm:$0xf0]  ;;  %v4825_v27 = vld [vmem:[%s7072_s4 + $0x1b4] sm:$0xf] }
  0x78   : > { %1445 = vmatpush.bf16.msrb.mxu2 %v3908_v50  ;;  %1417 = vmatpush.bf16.msra.mxu3 %v3524_v59  ;;  %v3573_v50 = vld [vmem:[%s7073_s5 + $0x88] sm:$0xf0]  ;;  %v4656_v59 = vld [vmem:[%s7073_s5 + $0x44] sm:$0xf]  ;;  %v4030_v48 = vor.u32 %v4778_v40, %v4029_v39 }
  0x79   : > { %1390 = vmatmul.bf16.vlgmr.msrb.gmra.mxu0 %v5507_v14  ;;  %v3576_v56 = vor.u32 %v4662_v46, %v3573_v50  ;;  %v4786_v46 = vld [vmem:[%s7072_s4 + $0x7c] sm:$0xf]  ;;  %v4113_v50 = vld [vmem:[%s7072_s4 + $0xd8] sm:$0xf]  ;;  %v4788_v39 = vld [vmem:[%s7072_s4 + $0x88] sm:$0xf0] }
  0x7a   : > { %1452 = vmatpush.bf16.msra.mxu0 %v3696_v53  ;;  %v4710_v53 = vld [vmem:[%s7073_s5 + $0x1f4] sm:$0xf] }
  0x7b   : > { %1428 = vmatpush.bf16.msrb.mxu1 %v3788_v0  ;;  %1418 = vmatmul.bf16.vlgmr.msra.gmra.mxu3 %v5465_v57  ;;  %v4065_v0 = vld [vmem:[%s7072_s4 + $0x78] sm:$0xf] }
  0x7c   : > { %1466 = vmatpush.bf16.msra.mxu2 %v3888_v54  ;;  %1484 = vmatpush.bf16.msrb.mxu3 %v3984_v63  ;;  %v3765_v54 = vld [vmem:[%s7073_s5 + $0x208] sm:$0xf0]  ;;  %v3549_v63 = vld [vmem:[%s7073_s5 + $0x58] sm:$0xf0]  ;;  %v4066_v7 = vor.u32 %v4787_v1, %v4065_v0  ;;  %v4101_v0 = vld [vmem:[%s7072_s4 + $0xc0] sm:$0xf] }
  0x7d   : > { %3989 = vmatmul.msk.bf16.vlgmr.msrb.gmra.mxu2 %vm1238_vm0, %v5435_v41  ;;  %v3768_v62 = vor.u32 %v4710_v53, %v3765_v54  ;;  %v3552_v6 = vor.u32 %v4656_v59, %v3549_v63  ;;  %v4820_v53 = vld [vmem:[%s7072_s4 + $0x188] sm:$0xf0]  ;;  %v4070_v54 = vor.u32 %v4786_v46, %v4067_v47  ;;  %v4114_v59 = vor.u32 %v4799_v51, %v4113_v50  ;;  %v4019_v46 = vld [vmem:[%s7072_s4 + $0x24] sm:$0xf0]  ;;  %v4807_v47 = vld [vmem:[%s7072_s4 + $0x124] sm:$0xf] }
  0x7e   : > { %1453 = vmatpush.bf16.msra.mxu0 %v3672_v3  ;;  %v3741_v3 = vld [vmem:[%s7073_s5 + $0x1d8] sm:$0xf0]  ;;  %v4796_v1 = vld [vmem:[%s7072_s4 + $0xc8] sm:$0xf0]  ;;  %v4819_v51 = vld [vmem:[%s7072_s4 + $0x184] sm:$0xf] }
  0x7f   : > { %1429 = vmatpush.bf16.msrb.mxu1 %v3764_v12  ;;  %v4053_v12 = vld [vmem:[%s7072_s4 + $0x60] sm:$0xf] }
  0x80   : > { %1467 = vmatpush.bf16.msra.mxu2 %v3864_v4  ;;  %1485 = vmatpush.bf16.msrb.mxu3 %v3960_v11  ;;  %v4162_v4 = vor.u32 %v4811_v61, %v4161_v60  ;;  %v3744_v11 = vor.u32 %v4704_v2, %v3741_v3  ;;  %v4054_v22 = vor.u32 %v4784_v13, %v4053_v12  ;;  %v4187_v60 = vld [vmem:[%s7072_s4 + $0x174] sm:$0xf0]  ;;  %v4005_v61 = vld [vmem:[%s7072_s4] sm:$0xf]  ;;  %v4828_v2 = vld [vmem:[%s7072_s4 + $0x1cc] sm:$0xf] }
  0x81   : > { %v4102_v12 = vor.u32 %v4796_v1, %v4101_v0  ;;  %v4175_v13 = vld [vmem:[%s7072_s4 + $0x15c] sm:$0xf0]  ;;  %v4830_v0 = vld [vmem:[%s7072_s4 + $0x1d8] sm:$0xf0] }
  0x82   : > { %1454 = vmatpush.bf16.msra.mxu0 %v3648_v16  ;;  %v3717_v16 = vld [vmem:[%s7073_s5 + $0x1a8] sm:$0xf0] }
  0x83   : > { %1430 = vmatpush.bf16.msrb.mxu1 %v3740_v26  ;;  %v3720_v25 = vor.u32 %v4698_v15, %v3717_v16  ;;  %v4768_v15 = vld [vmem:[%s6122_s20 + $0x4] sm:$0xf]  ;;  %v3995_v16 = vld [vmem:[%s6122_s20 + $0xc] sm:$0xf0] }
  0x84   : > { %1468 = vmatpush.bf16.msra.mxu2 %v3840_v17  ;;  %1486 = vmatpush.bf16.msrb.mxu3 %v3936_v24  ;;  %v4233_v17 = vld [vmem:[%s7072_s4 + $0x1c8] sm:$0xf]  ;;  %v4805_v24 = vld [vmem:[%s7072_s4 + $0x110] sm:$0xf0] }
  0x85   : > { %v4234_v26 = vor.u32 %v4829_v18, %v4233_v17  ;;  %v4138_v32 = vor.u32 %v4805_v24, %v4137_v23  ;;  %v4001_v23 = vld [vmem:[%s6122_s20 + $0x8] sm:$0xf]  ;;  %v4770_v24 = vld [vmem:[%s6122_s20 + $0x10] sm:$0xf0] }
  0x86   : > { %1455 = vmatpush.bf16.msra.mxu0 %v3624_v30  ;;  %v4221_v30 = vld [vmem:[%s7072_s4 + $0x1b0] sm:$0xf] }
  0x87   : > { %1431 = vmatpush.bf16.msrb.mxu1 %v3716_v42  ;;  %v4082_v42 = vor.u32 %v4789_v33, %v4079_v34  ;;  %v4810_v33 = vld [vmem:[%s7072_s4 + $0x13c] sm:$0xf]  ;;  %v4163_v34 = vld [vmem:[%s7072_s4 + $0x144] sm:$0xf0] }
  0x88   : > { %1469 = vmatpush.bf16.msra.mxu2 %v3816_v31  ;;  %1487 = vmatpush.bf16.msrb.mxu3 %v3912_v38  ;;  %v4826_v31 = vld [vmem:[%s7072_s4 + $0x1b8] sm:$0xf0] }
  0x89   : > { %v4222_v38 = vor.u32 %v4826_v31, %v4221_v30  ;;  %v6175_v30 = vor.u32 %v4768_v15, %v3995_v16  ;;  %v4827_v15 = vld [vmem:[%s7072_s4 + $0x1c0] sm:$0xf0]  ;;  %v4037_v16 = vld [vmem:[%s7072_s4 + $0x38] sm:$0xf] }
  0x8a   : > { %1456 = vmatpush.bf16.msra.mxu0 %v3600_v44  ;;  %1432 = vmatmul.bf16.vlgmr.msrb.gmra.mxu1 %v5507_v14  ;;  %v4823_v44 = vld [vmem:[%s7072_s4 + $0x1a0] sm:$0xf0] }
  0x8b   : > { %1950 = vmatpush.bf16.msra.mxu1 %v4090_v45  ;;  %3990 = vmatmul.msk.bf16.vlgmr.msrb.gmra.mxu3 %vm1238_vm0, %v5435_v41  ;;  %v4091_v41 = vld [vmem:[%s7072_s4 + $0xb4] sm:$0xf0]  ;;  %v4126_v45 = vor.u32 %v4802_v37, %v4125_v36  ;;  %v6188_v36 = vor.u32 %v4770_v24, %v4001_v23  ;;  %v4226_v37 = vor.u32 %v4825_v27, %v4223_v28  ;;  %v4812_v24 = vld [vmem:[%s7072_s4 + $0x148] sm:$0xf0]  ;;  %v4025_v27 = vld [vmem:[%s7072_s4 + $0x20] sm:$0xf] }
  0x8c   : > { %1964 = vmatpush.bf16.msra.mxu3 %v4186_v43  ;;  %1470 = vmatpush.bf16.msra.mxu2 %v3792_v49  ;;  %v4094_v29 = vor.u32 %v4792_v20, %v4091_v41  ;;  %v4209_v43 = vld [vmem:[%s7072_s4 + $0x198] sm:$0xf]  ;;  %v4769_v20 = vld [vmem:[%s6122_s20 + $0x8] sm:$0xf0] }
  0x8d   : > { %v4017_v49 = vld [vmem:[%s7072_s4 + $0x18] sm:$0xf]  ;;  %v4210_v52 = vor.u32 %v4823_v44, %v4209_v43  ;;  %v4822_v43 = vld [vmem:[%s7072_s4 + $0x19c] sm:$0xf]  ;;  %v4211_v44 = vld [vmem:[%s7072_s4 + $0x1a4] sm:$0xf0] }
  0x8e   : > { %1457 = vmatpush.bf16.msra.mxu0 %v3576_v56  ;;  %v4055_v56 = vld [vmem:[%s7072_s4 + $0x6c] sm:$0xf0]  ;;  %v4085_v41 = vld [vmem:[%s7072_s4 + $0x98] sm:$0xf]  ;;  %v4214_v50 = vor.u32 %v4822_v43, %v4211_v44  ;;  %v4776_v28 = vld [vmem:[%s7072_s4 + $0x28] sm:$0xf0] }
  0x8f   : > { %1951 = vmatpush.bf16.msra.mxu1 %v4078_v58  ;;  %v4816_v58 = vld [vmem:[%s7072_s4 + $0x16c] sm:$0xf]  ;;  %v4013_v43 = vld [vmem:[%s7072_s4 + $0x8] sm:$0xf]  ;;  %v4773_v44 = vld [vmem:[%s7072_s4 + $0x10] sm:$0xf0] }
  0x90   : > { %1965 = vmatpush.bf16.msra.mxu3 %v4174_v55  ;;  %1471 = vmatpush.bf16.msra.mxu2 %v3768_v62  ;;  %v4783_v55 = vld [vmem:[%s7072_s4 + $0x64] sm:$0xf]  ;;  %v4772_v62 = vld [vmem:[%s7072_s4 + $0x8] sm:$0xf0]  ;;  %v4190_v8 = vor.u32 %v4816_v58, %v4187_v60  ;;  %v4193_v60 = vld [vmem:[%s7072_s4 + $0x170] sm:$0xf] }
  0x91   : > { %v4006_v17 = vor.u32 %v4772_v62, %v4005_v61  ;;  %v4804_v58 = vld [vmem:[%s7072_s4 + $0x10c] sm:$0xf]  ;;  %v4818_v62 = vld [vmem:[%s7072_s4 + $0x178] sm:$0xf0] }
  0x92   : > { %1458 = vmatpush.bf16.msra.mxu0 %v3552_v6  ;;  %v4794_v6 = vld [vmem:[%s7072_s4 + $0xb8] sm:$0xf0] }
  0x93   : > { %1952 = vmatpush.bf16.msra.mxu1 %v4066_v7  ;;  %v4058_v7 = vor.u32 %v4783_v55, %v4055_v56  ;;  %v4098_v18 = vor.u32 %v4794_v6, %v4097_v5  ;;  %v4771_v55 = vld [vmem:[%s7072_s4 + $0x4] sm:$0xf]  ;;  %v4007_v56 = vld [vmem:[%s7072_s4 + $0xc] sm:$0xf0]  ;;  %v4194_v6 = vor.u32 %v4818_v62, %v4193_v60  ;;  %v4800_v60 = vld [vmem:[%s7072_s4 + $0xe8] sm:$0xf0] }
  0x94   : > { %1966 = vmatpush.bf16.msra.mxu3 %v4162_v4  ;;  %1472 = vmatpush.bf16.msra.mxu2 %v3744_v11  ;;  %v4235_v4 = vld [vmem:[%s7072_s4 + $0x1d4] sm:$0xf0]  ;;  %v4813_v11 = vld [vmem:[%s7072_s4 + $0x154] sm:$0xf] }
  0x96   : > { %1459 = vmatpush.bf16.msra.mxu0 %v3528_v21  ;;  %v4238_v21 = vor.u32 %v4828_v2, %v4235_v4  ;;  %v4049_v2 = vld [vmem:[%s7072_s4 + $0x50] sm:$0xf]  ;;  %v4010_v4 = vor.u32 %v4771_v55, %v4007_v56  ;;  %v4803_v55 = vld [vmem:[%s7072_s4 + $0x100] sm:$0xf0] }
  0x97   : > { %1953 = vmatpush.bf16.msra.mxu1 %v4054_v22  ;;  %v4791_v22 = vld [vmem:[%s7072_s4 + $0xa0] sm:$0xf0] }
  0x98   : > { %1967 = vmatpush.bf16.msra.mxu3 %v4150_v19  ;;  %1473 = vmatpush.bf16.msra.mxu2 %v3720_v25  ;;  %v3993_v19 = vld [vmem:[%s6122_s20] sm:$0xf]  ;;  %v4046_v25 = vor.u32 %v4780_v9, %v4043_v10  ;;  %v4181_v9 = vld [vmem:[%s7072_s4 + $0x158] sm:$0xf] }
  0x99   : > { %1460 = vmatmul.bf16.vlgmr.msra.gmra.mxu0 %v5465_v57  ;;  %v4775_v57 = vld [vmem:[%s7072_s4 + $0x20] sm:$0xf0]  ;;  %v6177_v31 = vor.u32 %v4769_v20, %v3993_v19  ;;  %v4798_v20 = vld [vmem:[%s7072_s4 + $0xdc] sm:$0xf] }
  0x9a   : > { %1982 = vmatpush.bf16.msrb.mxu0 %v4234_v26  ;;  %v4018_v63 = vor.u32 %v4775_v57, %v4017_v49  ;;  %v4178_v26 = vor.u32 %v4813_v11, %v4175_v13  ;;  %v4785_v57 = vld [vmem:[%s7072_s4 + $0x70] sm:$0xf0]  ;;  %v4229_v13 = vld [vmem:[%s7072_s4 + $0x1b8] sm:$0xf] }
  0x9b   : > { %1954 = vmatpush.bf16.msra.mxu1 %v4042_v35  ;;  %1474 = vmatmul.bf16.vlgmr.msra.gmra.mxu2 %v5507_v14  ;;  %v4197_v14 = vld [vmem:[%s7072_s4 + $0x180] sm:$0xf]  ;;  %v4086_v35 = vor.u32 %v4791_v22, %v4085_v41  ;;  %v4115_v41 = vld [vmem:[%s7072_s4 + $0xe4] sm:$0xf0]  ;;  %v4230_v22 = vor.u32 %v4827_v15, %v4229_v13 }
  0x9c   : > { %1992 = vmatpush.bf16.msrb.mxu2 %v4094_v29  ;;  %1968 = vmatpush.bf16.msra.mxu3 %v4138_v32  ;;  %v4198_v3 = vor.u32 %v4820_v53, %v4197_v14  ;;  %v4777_v29 = vld [vmem:[%s7072_s4 + $0x34] sm:$0xf]  ;;  %v4031_v32 = vld [vmem:[%s7072_s4 + $0x3c] sm:$0xf0] }
  0x9d   : > { %v4034_v40 = vor.u32 %v4777_v29, %v4031_v32  ;;  %v4118_v29 = vor.u32 %v4798_v20, %v4115_v41 }
  0x9e   : > { %1983 = vmatpush.bf16.msrb.mxu0 %v4222_v38  ;;  %v4073_v38 = vld [vmem:[%s7072_s4 + $0x80] sm:$0xf] }
  0x9f   : > { %1955 = vmatpush.bf16.msra.mxu1 %v4030_v48  ;;  %v4151_v48 = vld [vmem:[%s7072_s4 + $0x12c] sm:$0xf0]  ;;  %v4074_v49 = vor.u32 %v4788_v39, %v4073_v38  ;;  %v4026_v38 = vor.u32 %v4776_v28, %v4025_v27  ;;  %v4809_v39 = vld [vmem:[%s7072_s4 + $0x130] sm:$0xf0] }
  0xa0   : > { %1993 = vmatpush.bf16.msrb.mxu2 %v4082_v42  ;;  %1969 = vmatpush.bf16.msra.mxu3 %v4126_v45  ;;  %v4166_v42 = vor.u32 %v4810_v33, %v4163_v34  ;;  %v4774_v45 = vld [vmem:[%s7072_s4 + $0x1c] sm:$0xf]  ;;  %v4154_v53 = vor.u32 %v4807_v47, %v4151_v48  ;;  %v4795_v33 = vld [vmem:[%s7072_s4 + $0xc4] sm:$0xf]  ;;  %v4103_v34 = vld [vmem:[%s7072_s4 + $0xcc] sm:$0xf0]  ;;  %v4014_v48 = vor.u32 %v4773_v44, %v4013_v43 }
  0xa1   : > { %v4022_v14 = vor.u32 %v4774_v45, %v4019_v46  ;;  %v4106_v45 = vor.u32 %v4795_v33, %v4103_v34 }
  0xa2   : > { %1984 = vmatpush.bf16.msrb.mxu0 %v4210_v52  ;;  %v4061_v52 = vld [vmem:[%s7072_s4 + $0x68] sm:$0xf] }
  0xa3   : > { %1956 = vmatpush.bf16.msra.mxu1 %v4018_v63  ;;  %v4062_v61 = vor.u32 %v4785_v57, %v4061_v52  ;;  %v4241_v63 = vld [vmem:[%s7072_s4 + $0x1d0] sm:$0xf] }
  0xa4   : > { %1994 = vmatpush.bf16.msrb.mxu2 %v4070_v54  ;;  %1970 = vmatpush.bf16.msra.mxu3 %v4114_v59  ;;  %v4199_v54 = vld [vmem:[%s7072_s4 + $0x18c] sm:$0xf0]  ;;  %v4139_v59 = vld [vmem:[%s7072_s4 + $0x114] sm:$0xf0]  ;;  %v4242_v10 = vor.u32 %v4830_v0, %v4241_v63 }
  0xa5   : > { %v4202_v1 = vor.u32 %v4819_v51, %v4199_v54  ;;  %v4142_v5 = vor.u32 %v4804_v58, %v4139_v59  ;;  %v4133_v54 = vld [vmem:[%s7072_s4 + $0xf8] sm:$0xf]  ;;  %v4121_v59 = vld [vmem:[%s7072_s4 + $0xe0] sm:$0xf] }
  0xa6   : > { %1985 = vmatpush.bf16.msrb.mxu0 %v4198_v3  ;;  %v4782_v3 = vld [vmem:[%s7072_s4 + $0x58] sm:$0xf0]  ;;  %v4134_v58 = vor.u32 %v4803_v55, %v4133_v54  ;;  %v4122_v63 = vor.u32 %v4800_v60, %v4121_v59 }
  0xa7   : > { %1957 = vmatpush.bf16.msra.mxu1 %v4006_v17  ;;  %v4050_v11 = vor.u32 %v4782_v3, %v4049_v2  ;;  %v4779_v17 = vld [vmem:[%s7072_s4 + $0x40] sm:$0xf0] }
  0xa8   : > { %1995 = vmatpush.bf16.msrb.mxu2 %v4058_v7  ;;  %1971 = vmatpush.bf16.msra.mxu3 %v4102_v12  ;;  %v4801_v7 = vld [vmem:[%s7072_s4 + $0xf4] sm:$0xf]  ;;  %v4815_v12 = vld [vmem:[%s7072_s4 + $0x160] sm:$0xf0]  ;;  %v4038_v23 = vor.u32 %v4779_v17, %v4037_v16 }
  0xa9   : > { %4243 = vmatmul.msk.bf16.vlgmr.msrb.gmra.mxu0 %vm1238_vm0, %v6188_v36  ;;  %v4182_v19 = vor.u32 %v4815_v12, %v4181_v9 }
  0xaa   : > { %2006 = vmatpush.bf16.msra.mxu0 %v4190_v8  ;;  %1958 = vmatmul.bf16.vlgmr.msra.gmra.mxu1 %v6177_v31  ;;  %v4127_v8 = vld [vmem:[%s7072_s4 + $0xfc] sm:$0xf0] }
  0xab   : > { %2024 = vmatpush.bf16.msrb.mxu1 %v4238_v21  ;;  %1972 = vmatmul.bf16.vlgmr.msra.gmra.mxu3 %v6175_v30  ;;  %v4169_v21 = vld [vmem:[%s7072_s4 + $0x140] sm:$0xf] }
  0xac   : > { %2034 = vmatpush.bf16.msrb.mxu3 %v4098_v18  ;;  %1996 = vmatpush.bf16.msrb.mxu2 %v4046_v25  ;;  %v4130_v18 = vor.u32 %v4801_v7, %v4127_v8  ;;  %v4217_v25 = vld [vmem:[%s7072_s4 + $0x1a0] sm:$0xf]  ;;  %v4170_v32 = vor.u32 %v4812_v24, %v4169_v21 }
  0xae   : > { %2007 = vmatpush.bf16.msra.mxu0 %v4178_v26  ;;  %v4824_v26 = vld [vmem:[%s7072_s4 + $0x1a8] sm:$0xf0] }
  0xaf   : > { %2025 = vmatpush.bf16.msrb.mxu1 %v4226_v37  ;;  %v4218_v37 = vor.u32 %v4824_v26, %v4217_v25 }
  0xb0   : > { %2035 = vmatpush.bf16.msrb.mxu3 %v4086_v35  ;;  %1997 = vmatpush.bf16.msrb.mxu2 %v4034_v40  ;;  %v4157_v35 = vld [vmem:[%s7072_s4 + $0x128] sm:$0xf] }
  0xb1   : > { %v4205_v40 = vld [vmem:[%s7072_s4 + $0x188] sm:$0xf]  ;;  %v4158_v46 = vor.u32 %v4809_v39, %v4157_v35 }
  0xb2   : > { %2008 = vmatpush.bf16.msra.mxu0 %v4166_v42  ;;  %v4821_v42 = vld [vmem:[%s7072_s4 + $0x190] sm:$0xf0] }
  0xb3   : > { %2026 = vmatpush.bf16.msrb.mxu1 %v4214_v50  ;;  %v4206_v47 = vor.u32 %v4821_v42, %v4205_v40  ;;  %v4806_v50 = vld [vmem:[%s7072_s4 + $0x118] sm:$0xf0] }
  0xb4   : > { %2036 = vmatpush.bf16.msrb.mxu3 %v4074_v49  ;;  %1998 = vmatpush.bf16.msrb.mxu2 %v4022_v14  ;;  %v4145_v49 = vld [vmem:[%s7072_s4 + $0x110] sm:$0xf] }
  0xb5   : > { %v4146_v52 = vor.u32 %v4806_v50, %v4145_v49  ;;  %v1279_v57 = vpop.f32.mrf.mxu2  ;;  %v3488_v14 = vld [vmem:[%s7076_s8 + $0x1] ss:$8 sm:$0xf] }
  0xb6   : > { %2009 = vmatpush.bf16.msra.mxu0 %v4154_v53  ;;  %v1251_v51 = vpop.f32.mrf.mxu0  ;;  %v3489_v53 = vld [vmem:[%s7076_s8 + $0x1] ss:$8 sm:$0x30] }
  0xb7   : > { %2027 = vmatpush.bf16.msrb.mxu1 %v4202_v1  ;;  %v6354_v56 = vor.u32 %v3489_v53, %v3488_v14  ;;  %v4797_v1 = vld [vmem:[%s7072_s4 + $0xd0] sm:$0xf0] }
  0xb8   : > { %2037 = vmatpush.bf16.msrb.mxu3 %v4062_v61  ;;  %1999 = vmatpush.bf16.msrb.mxu2 %v4010_v4 }
  0xb9   : > { %v611_v61 = vperm.slane %v6354_v56, 0  ;;  %v1265_v2 = vpop.f32.mrf.mxu1  ;;  %v614_v54 = vperm.slane %v6354_v56, 3  ;;  %v615_v55 = vperm.slane %v6354_v56, 4 }
  0xba   : > { %2010 = vmatpush.bf16.msra.mxu0 %v4142_v5  ;;  %4244 = vmatmul.msk.bf16.vlgmr.msrb.gmra.mxu1 %vm1238_vm0, %v6188_v36  ;;  %v612_v5 = vperm.slane %v6354_v56, 1 }
  0xbb   : > { %2048 = vmatpush.bf16.msra.mxu1 %v4194_v6  ;;  %2000 = vmatmul.bf16.vlgmr.msrb.gmra.mxu2 %v6177_v31  ;;  %v1252_v4 = vadd.f32 %v1251_v51, %v611_v61 }
  0xbc   : > { %2066 = vmatpush.bf16.msra.mxu2 %v4242_v10  ;;  %2038 = vmatpush.bf16.msrb.mxu3 %v4050_v11 }
  0xbd   : > { %v1281_v0 = vpop.f32.mrf.mxu2  ;;  %v1293_v3 = vpop.f32.mrf.mxu3  ;;  %v1266_v6 = vadd.f32 %v1265_v2, %v1252_v4 }
  0xbe   : > { %2011 = vmatpush.bf16.msra.mxu0 %v4130_v18  ;;  %v1253_v62 = vpop.f32.mrf.mxu0  ;;  %v1294_v7 = vadd.f32 %v1293_v3, %v612_v5 }
  0xbf   : > { %2049 = vmatpush.bf16.msra.mxu1 %v4182_v19  ;;  %v1280_v10 = vadd.f32 %v1279_v57, %v1266_v6  ;;  %v1254_v15 = vadd.f32 %v1253_v62, %v611_v61 }
  0xc0   : > { %2067 = vmatpush.bf16.msra.mxu2 %v4230_v22  ;;  %2039 = vmatpush.bf16.msrb.mxu3 %v4038_v23  ;;  %v613_v22 = vperm.slane %v6354_v56, 2 }
  0xc1   : > { %v1267_v12 = vpop.f32.mrf.mxu1 }
  0xc2   : > { %2012 = vmatpush.bf16.msra.mxu0 %v4118_v29  ;;  %v1268_v20 = vadd.f32 %v1267_v12, %v1254_v15  ;;  %v616_v15 = vperm.slane %v6354_v56, 5 }
  0xc3   : > { %2050 = vmatpush.bf16.msra.mxu1 %v4170_v32 }
  0xc4   : > { %2068 = vmatpush.bf16.msra.mxu2 %v4218_v37  ;;  %2040 = vmatpush.bf16.msrb.mxu3 %v4026_v38  ;;  %v1282_v23 = vadd.f32 %v1281_v0, %v1268_v20 }
  0xc5   : > { %v1295_v13 = vpop.f32.mrf.mxu3 }
  0xc6   : > { %2013 = vmatpush.bf16.msra.mxu0 %v4106_v45  ;;  %v1321_v8 = vpop.f32.mrf.mxu0  ;;  %v1296_v18 = vadd.f32 %v1295_v13, %v612_v5 }
  0xc7   : > { %2051 = vmatpush.bf16.msra.mxu1 %v4158_v46 }
  0xc8   : > { %2069 = vmatpush.bf16.msra.mxu2 %v4206_v47  ;;  %2041 = vmatpush.bf16.msrb.mxu3 %v4014_v48 }
  0xc9   : > { %2014 = vmatmul.bf16.vlgmr.msra.gmra.mxu0 %v6175_v30 }
  0xcb   : > { %2052 = vmatpush.bf16.msra.mxu1 %v4146_v52  ;;  %2042 = vmatmul.bf16.vlgmr.msrb.gmra.mxu3 %v6177_v31  ;;  %v4109_v31 = vld [vmem:[%s7072_s4 + $0xc8] sm:$0xf] }
  0xcc   : > { %4245 = vmatmul.msk.bf16.vlgmr.msra.gmra.mxu2 %vm1238_vm0, %v6188_v36  ;;  %v4110_v36 = vor.u32 %v4797_v1, %v4109_v31 }
  0xce   : > { %v1307_v9 = vpop.f32.mrf.mxu2  ;;  %v1323_v19 = vpop.f32.mrf.mxu0 }
  0xcf   : > { %2053 = vmatpush.bf16.msra.mxu1 %v4134_v58  ;;  %v1308_v11 = vadd.f32 %v1307_v9, %v1294_v7 }
  0xd1   : > { %v1322_v16 = vadd.f32 %v1321_v8, %v1308_v11 }
  0xd3   : > { %2054 = vmatpush.bf16.msra.mxu1 %v4122_v63  ;;  %v1494_v17 = vpack.c.bf16 %v1322_v16, %v1280_v10 }
  0xd5   : > { %1498 = vst [vmem:[#allocation2] sm:$0xff] %v1494_v17 }
  0xd6   : > { %v1309_v41 = vpop.f32.mrf.mxu2 }
  0xd7   : > { %2055 = vmatpush.bf16.msra.mxu1 %v4110_v36  ;;  %v1310_v21 = vadd.f32 %v1309_v41, %v1296_v18  ;;  %v1335_v25 = vpop.f32.mrf.mxu1 }
  0xd8   : > { %v1336_v27 = vadd.f32 %v1335_v25, %v613_v22 }
  0xd9   : > { %v1324_v24 = vadd.f32 %v1323_v19, %v1310_v21 }
  0xda   : > { %2056 = vmatmul.bf16.vlgmr.msra.gmra.mxu1 %v6175_v30  ;;  %v1363_v30 = vpop.f32.mrf.mxu0 }
  0xdb   : > { %v1496_v26 = vpack.c.bf16 %v1324_v24, %v1282_v23 }
  0xdc   : > { %v4248_v34 = vld [vmem:[#allocation2] sm:$0xf]  ;;  %v4831_v39 = vld [vmem:[#allocation2 + $0x4] sm:$0xf] }
  0xdd   : > { %1500 = vst [vmem:[#allocation2 + $0xc] sm:$0xff] %v1496_v26 }
  0xde   : > { %v1349_v28 = vpop.f32.mrf.mxu3 }
  0xdf   : > { %v1350_v29 = vadd.f32 %v1349_v28, %v1336_v27  ;;  %v1337_v32 = vpop.f32.mrf.mxu1 }
  0xe0   : > { %v1338_v37 = vadd.f32 %v1337_v32, %v613_v22 }
  0xe1   : > { %v1364_v33 = vadd.f32 %v1363_v30, %v1350_v29 }
  0xe2   : > { %v1365_v45 = vpop.f32.mrf.mxu0 }
  0xe3   : > { %v1495_v35 = vpack.c.bf16 %v1364_v33, %v1364_v33 }
  0xe4   : > { %v4832_v38 = vld [vmem:[#allocation2 + $0x8] sm:$0xf0]  ;;  %v4250_v40 = vld [vmem:[#allocation2 + $0xc] sm:$0xf0] }
  0xe5   : > { %v4249_v42 = vor.u32 %v4832_v38, %v4248_v34  ;;  %v4253_v43 = vor.u32 %v4831_v39, %v4250_v40  ;;  %1499 = vst [vmem:[#allocation2 + $0x8] sm:$0xf] %v1495_v35 }
  0xe6   : > { %v1351_v44 = vpop.f32.mrf.mxu3 }
  0xe7   : > { %2138 = vmatpush.bf16.xpose.msrb.mxu0 %v4249_v42  ;;  %2152 = vmatpush.bf16.xpose.msrb.mxu2 %v4253_v43  ;;  %v1352_v46 = vadd.f32 %v1351_v44, %v1338_v37  ;;  %v1405_v50 = vpop.f32.mrf.mxu1 }
  0xe9   : > { %v1366_v47 = vadd.f32 %v1365_v45, %v1352_v46  ;;  %v6389_v45 = vld [vmem:[%s7076_s8] ss:$8 sm:$0x7] }
  0xeb   : > { %v1497_v48 = vpack.c.bf16 %v1366_v47, %v1366_v47  ;;  %v1606_v47 = vperm.slane %v6389_v45, 1 }
  0xec   : > { %v4256_v51 = vld [vmem:[#allocation2 + $0x8] sm:$0xf] }
  0xed   : > { %1501 = vst [vmem:[#allocation2 + $0x14] sm:$0xf] %v1497_v48  ;;  %v5092_v48 = vmov 0  }
  0xee   : > { %v1377_v49 = vpop.f32.mrf.mxu2  ;;  %4989 = vset.pattern.permute.xlu0 %v5092_v48  ;;  %4990 = vset.pattern.permute.xlu2 %v5092_v48 }
  0xef   : > { %v1407_v53 = vpop.f32.mrf.mxu1  ;;  %v1378_v60 = vadd.f32 %v1377_v49, %v614_v54  ;;  %v1521_v49 = vld [vmem:[%s460_s27] sm:$0xff] }
  0xf0   : > { %2086 = vperm.xlu0 %4989, %v1521_v49  }
  0xf4   : > { %v4833_v52 = vld [vmem:[#allocation2 + $0x10] sm:$0xf0] }
  0xf5   : > { %v4257_v57 = vor.u32 %v4833_v52, %v4256_v51 }
  0xf6   : > { %v1379_v14 = vpop.f32.mrf.mxu2  ;;  %v1391_v59 = vpop.f32.mrf.mxu0 }
  0xf7   : > { %2166 = vmatpush.bf16.xpose.msra.mxu3 %v4257_v57  ;;  %v1392_v63 = vadd.f32 %v1391_v59, %v1378_v60  ;;  %v1380_v3 = vadd.f32 %v1379_v14, %v614_v54  ;;  %v1522_v59 = vld [vmem:[%s460_s27 + $0x8] sm:$0xff] }
  0xf8   : > { %2091 = vperm.xlu0 %4989, %v1522_v59  }
  0xf9   : > { %v1406_v2 = vadd.f32 %v1405_v50, %v1392_v63  ;;  %v1605_v50 = vperm.slane %v6389_v45, 0  ;;  %v3048_v63 = vsel %vm3046_vm1, %v1522_v59, 0.0 }
  0xfe   : > { %v1419_v58 = vpop.f32.mrf.mxu3  ;;  %v1393_v5 = vpop.f32.mrf.mxu0 }
  0xff   : > { %v1420_v61 = vadd.f32 %v1419_v58, %v615_v55  ;;  %v1394_v7 = vadd.f32 %v1393_v5, %v1380_v3 }
 0x100   : > { %v1447_v62 = vpop.f32.mrf.mxu2 }
 0x101   : > { %v1408_v11 = vadd.f32 %v1407_v53, %v1394_v7 }
 0x106   : > { %v1421_v1 = vpop.f32.mrf.mxu3 }
 0x107   : > { %v1433_v0 = vpop.f32.mrf.mxu1  ;;  %v1422_v6 = vadd.f32 %v1421_v1, %v615_v55  ;;  %v3047_v55 = vsel %vm3046_vm1, %v1521_v49, 0.0 }
 0x108   : > { %v1434_v31 = vadd.f32 %v1433_v0, %v1420_v61  ;;  %v1449_v9 = vpop.f32.mrf.mxu2  ;;  %v3049_v0 = vadd.f32 %v3048_v63, %v3047_v55 }
 0x10a   : > { %v1448_v4 = vadd.f32 %v1447_v62, %v1434_v31  ;;  %v5093_v62 = vmov 0.0  }
 0x10b   : > { %1516 = vst.msk [vmem:[#allocation4] sm:$0x1] %vm1515_vm2, %v5093_v62 }
 0x10c   : > { %v1502_v36 = vpack.c.bf16 %v1448_v4, %v1406_v2  ;;  %v3050_v4 = vrot.slane %v3049_v0, 4 }
 0x10e   : > { %1506 = vst [vmem:[#allocation3] sm:$0xff] %v1502_v36  ;;  %v1489_v18 = vpop.f32.mrf.mxu3  ;;  %v3051_v7 = vadd.f32 %v3050_v4, %v3049_v0 }
 0x10f   : > { %v1435_v8 = vpop.f32.mrf.mxu1 }
 0x110   : > { %v1436_v10 = vadd.f32 %v1435_v8, %v1422_v6 }
 0x112   : > { %v1450_v12 = vadd.f32 %v1449_v9, %v1436_v10 }
 0x114   : > { %v1504_v13 = vpack.c.bf16 %v1450_v12, %v1408_v11  ;;  %v1607_v12 = vperm.slane %v6389_v45, 2  ;;  %v4991_v45 = vld [vmem:[%s464_s0] ss:$0 sm:$0xff]  ;;  %s3340_s0 = scalar_lea.hbm %s7078_s10, %s5082_s16 }
 0x115   : > { %v4260_v20 = vld [vmem:[#allocation3] sm:$0xf]  ;;  %v4834_v22 = vld [vmem:[#allocation3 + $0x4] sm:$0xf]  ;;  %s3344_s27 = sshll.u32 %s3340_s0, 4  ;;  %s3345_s27 = int_to_ptr.hbm [resolvable:$true] %s3344_s27 }
 0x116   : > { %v1461_v16 = vpop.f32.mrf.mxu0  ;;  %1508 = vst [vmem:[#allocation3 + $0xc] sm:$0xff] %v1504_v13  ;;  %v1491_v32 = vpop.f32.mrf.mxu3  ;;  %v3052_v13 = vrot.slane %v3051_v7, 2  ;;  %s5026_s21 = sshra.s32 %s3345_s27, 4  ;;  %s5027_s21 = int_to_ptr.hbm [resolvable:$true] %s5026_s21 }
 0x117   : > { %v1462_v17 = vadd.f32 %v1461_v16, %v616_v15  ;;  %s5028_s26 = scalar_lea.hbm %s5027_s21, 1  ;;  %p5033_p1 = scmp.lt.s32.totalorder %s5027_s21, %s7078_s10 }
 0x118   : > { %v3053_v16 = vadd.f32 %v3052_v13, %v3051_v7  ;;  %v4455_v13 = vld [vmem:[%s7074_s6 + $0x168] sm:$0xf]  ;;  %p5029_p12 = scmp.ne.s32.totalorder %s5027_s21, %s5028_s26  ;;  %p5034_p2 = scmp.lt.s32.totalorder %s5032_s29, %s5028_s26 }
 0x11a   : > { %p5030_p13 = pnand %p5029_p12, %p5190_p4  ;;  %p5035_p3 = por %p5034_p2, %p5033_p1 }
 0x11c   : > { %p5031_p0 = pneg %p5030_p13 }
 0x11d   : > { %v4835_v21 = vld [vmem:[#allocation3 + $0x8] sm:$0xf0]  ;;  %v4262_v23 = vld [vmem:[#allocation3 + $0xc] sm:$0xf0] }
 0x11e   : > { %v1475_v19 = vpop.f32.mrf.mxu2  ;;  %v4261_v24 = vor.u32 %v4835_v21, %v4260_v20  ;;  %v4265_v25 = vor.u32 %v4834_v22, %v4262_v23  ;;  %v1463_v27 = vpop.f32.mrf.mxu0  ;;  %v3054_v21 = vrot.slane %v3053_v16, 1  ;;  %p5036_p5 = pnand %p5035_p3, %p5031_p0 }
 0x11f   : > { %v1476_v41 = vadd.f32 %v1475_v19, %v1462_v17  ;;  %v1464_v28 = vadd.f32 %v1463_v27, %v616_v15 }
 0x120   : > { %2233 = vmatpush.bf16.msra.mxu0 %v4261_v24  ;;  %2247 = vmatpush.bf16.msrb.mxu1 %v4265_v25  ;;  %v3055_v27 = vadd.f32 %v3054_v21, %v3053_v16  ;;  %v4883_v16 = vld [vmem:[%s7074_s6 + $0x170] sm:$0xf0] }
 0x121   : > { %v1490_v26 = vadd.f32 %v1489_v18, %v1476_v41 }
 0x123   : > { %v1503_v30 = vpack.c.bf16 %v1490_v26, %v1490_v26  ;;  %v3045_v26 = vld [vmem:[#allocation4] sm:$0x1] }
 0x125   : > { %1507 = vst [vmem:[#allocation3 + $0x8] sm:$0xf] %v1503_v30 }
 0x126   : > { %v1477_v56 = vpop.f32.mrf.mxu2  ;;  %v1987_v37 = vpop.f32.mrf.mxu0 }
 0x127   : > { %v1478_v29 = vadd.f32 %v1477_v56, %v1464_v28  ;;  %v1959_v35 = vpop.f32.mrf.mxu1  ;;  %v3056_v28 = vadd.f32 %v3055_v27, %v3045_v26  ;;  %v4323_v26 = vld [vmem:[%s7074_s6 + $0x60] sm:$0xf] }
 0x128   : > { %v1960_v14 = vadd.f32 %v1959_v35, %v1605_v50 }
 0x129   : > { %v1492_v33 = vadd.f32 %v1491_v32, %v1478_v29  ;;  %3058 = vst.msk [vmem:[#allocation4] sm:$0x1] %vm1515_vm2, %v3056_v28  ;;  %v4551_v28 = vld [vmem:[%s7074_s6 + $0x228] sm:$0xf] }
 0x12b   : > { %v1505_v34 = vpack.c.bf16 %v1492_v33, %v1492_v33 }
 0x12c   : > { %v4268_v38 = vld [vmem:[#allocation3 + $0x8] sm:$0xf] }
 0x12d   : > { %1509 = vst [vmem:[#allocation3 + $0x14] sm:$0xf] %v1505_v34 }
 0x12e   : > { %v1989_v43 = vpop.f32.mrf.mxu0  ;;  %v1973_v44 = vpop.f32.mrf.mxu3 }
 0x12f   : > { %v1961_v42 = vpop.f32.mrf.mxu1  ;;  %v1974_v60 = vadd.f32 %v1973_v44, %v1960_v14 }
 0x130   : > { %v1962_v61 = vadd.f32 %v1961_v42, %v1605_v50 }
 0x131   : > { %v1988_v5 = vadd.f32 %v1987_v37, %v1974_v60 }
 0x134   : > { %v4836_v39 = vld [vmem:[#allocation3 + $0x10] sm:$0xf0] }
 0x135   : > { %v4269_v40 = vor.u32 %v4836_v39, %v4268_v38 }
 0x136   : > { %v1975_v53 = vpop.f32.mrf.mxu3 }
 0x137   : > { %2261 = vmatpush.bf16.msra.mxu2 %v4269_v40  ;;  %v2029_v51 = vpop.f32.mrf.mxu1  ;;  %v1976_v31 = vadd.f32 %v1975_v53, %v1962_v61 }
 0x139   : > { %v1990_v8 = vadd.f32 %v1989_v43, %v1976_v31 }
 0x13e   : > { %v2001_v46 = vpop.f32.mrf.mxu2 }
 0x13f   : > { %v2002_v52 = vadd.f32 %v2001_v46, %v1606_v47  ;;  %v2031_v36 = vpop.f32.mrf.mxu1 }
 0x146   : > { %v2015_v57 = vpop.f32.mrf.mxu0  ;;  %v2003_v58 = vpop.f32.mrf.mxu2 }
 0x147   : > { %v2016_v54 = vadd.f32 %v2015_v57, %v2002_v52  ;;  %v2004_v2 = vadd.f32 %v2003_v58, %v1606_v47 }
 0x149   : > { %v2030_v1 = vadd.f32 %v2029_v51, %v2016_v54 }
 0x14b   : > { %v2076_v9 = vpack.c.bf16 %v2030_v1, %v1988_v5 }
 0x14d   : > { %v2103_v17 = vunpack.c.l.b16 %v2076_v9  ;;  %v2104_v18 = vunpack.c.h.b16 %v2076_v9  ;;  %v4859_v9 = vld [vmem:[%s7074_s6 + $0xb0] sm:$0xf0] }
 0x14e   : > { %v2017_v3 = vpop.f32.mrf.mxu0  ;;  %v2043_v11 = vpop.f32.mrf.mxu3 }
 0x14f   : > { %v2018_v6 = vadd.f32 %v2017_v3, %v2004_v2  ;;  %v2044_v41 = vadd.f32 %v2043_v11, %v1607_v12  ;;  %v2071_v22 = vpop.f32.mrf.mxu2 }
 0x151   : > { %v2032_v10 = vadd.f32 %v2031_v36, %v2018_v6 }
 0x153   : > { %v2078_v15 = vpack.c.bf16 %v2032_v10, %v1990_v8  ;;  %v4359_v8 = vld [vmem:[%s7074_s6 + $0xa8] sm:$0xf]  ;;  %v4347_v10 = vld [vmem:[%s7074_s6 + $0x90] sm:$0xf] }
 0x154   : > { %v4360_v11 = vor.u32 %v4859_v9, %v4359_v8 }
 0x155   : > { %v2106_v19 = vunpack.c.l.b16 %v2078_v15  ;;  %v2107_v20 = vunpack.c.h.b16 %v2078_v15 }
 0x156   : > { %v2045_v56 = vpop.f32.mrf.mxu3  ;;  %2758 = vmatpush.bf16.msrb.mxu3 %v4360_v11  ;;  %v4395_v11 = vld [vmem:[%s7074_s6 + $0xf0] sm:$0xf] }
 0x157   : > { %v2057_v23 = vpop.f32.mrf.mxu1  ;;  %v2109_v24 = vpack.c.b16 %v2106_v19, %v2103_v17  ;;  %v2110_v25 = vpack.c.b16 %v2107_v20, %v2104_v18  ;;  %v2046_v32 = vadd.f32 %v2045_v56, %v1607_v12  ;;  %v2073_v35 = vpop.f32.mrf.mxu2  ;;  %v4856_v12 = vld [vmem:[%s7074_s6 + $0x98] sm:$0xf0]  ;;  %v4858_v17 = vld [vmem:[%s7074_s6 + $0xac] sm:$0xf]  ;;  %v4361_v18 = vld [vmem:[%s7074_s6 + $0xb4] sm:$0xf0] }
 0x158   : > { %v2058_v30 = vadd.f32 %v2057_v23, %v2044_v41  ;;  %v4348_v15 = vor.u32 %v4856_v12, %v4347_v10  ;;  %v4335_v19 = vld [vmem:[%s7074_s6 + $0x78] sm:$0xf]  ;;  %v4853_v20 = vld [vmem:[%s7074_s6 + $0x80] sm:$0xf0]  ;;  %v4456_v41 = vor.u32 %v4883_v16, %v4455_v13  ;;  %v4364_v21 = vor.u32 %v4858_v17, %v4361_v18  ;;  %v4880_v23 = vld [vmem:[%s7074_s6 + $0x158] sm:$0xf0] }
 0x159   : > { %2139 = vmatmul.bf16.vlgmr.msrb.gmra.mxu0 %v2109_v24  ;;  %2153 = vmatmul.bf16.vlgmr.msrb.gmra.mxu2 %v2110_v25  ;;  %v4855_v24 = vld [vmem:[%s7074_s6 + $0x94] sm:$0xf]  ;;  %v4349_v25 = vld [vmem:[%s7074_s6 + $0x9c] sm:$0xf0]  ;;  %v4503_v12 = vld [vmem:[%s7074_s6 + $0x1c8] sm:$0xf] }
 0x15a   : > { %v2072_v29 = vadd.f32 %v2071_v22, %v2058_v30  ;;  %v4443_v22 = vld [vmem:[%s7074_s6 + $0x150] sm:$0xf]  ;;  %2772 = vmatpush.bf16.msrb.mxu0 %v4456_v41  ;;  %2800 = vmatpush.bf16.msrb.mxu2 %v4364_v21  ;;  %v4352_v30 = vor.u32 %v4855_v24, %v4349_v25  ;;  %v4907_v56 = vld [vmem:[%s7074_s6 + $0x230] sm:$0xf0]  ;;  %v4868_v17 = vld [vmem:[%s7074_s6 + $0xf8] sm:$0xf0] }
 0x15b   : > { %v4444_v27 = vor.u32 %v4880_v23, %v4443_v22  ;;  %2759 = vmatpush.bf16.msrb.mxu3 %v4348_v15  ;;  %v4895_v13 = vld [vmem:[%s7074_s6 + $0x1d0] sm:$0xf0]  ;;  %v4396_v22 = vor.u32 %v4868_v17, %v4395_v11  ;;  %v4383_v24 = vld [vmem:[%s7074_s6 + $0xd8] sm:$0xf]  ;;  %v4491_v25 = vld [vmem:[%s7074_s6 + $0x1b0] sm:$0xf] }
 0x15c   : > { %v2077_v37 = vpack.c.bf16 %v2072_v29, %v2072_v29  ;;  %v4843_v18 = vld [vmem:[%s7074_s6 + $0x34] sm:$0xf]  ;;  %v4504_v41 = vor.u32 %v4895_v13, %v4503_v12  ;;  %v4409_v11 = vld [vmem:[%s7074_s6 + $0x114] sm:$0xf0] }
 0x15d   : > { %v4903_v13 = vld [vmem:[%s7074_s6 + $0x214] sm:$0xf] }
 0x15e   : > { %v2105_v40 = vunpack.c.l.b16 %v2077_v37  ;;  %v4877_v37 = vld [vmem:[%s7074_s6 + $0x140] sm:$0xf0]  ;;  %2773 = vmatpush.bf16.msrb.mxu0 %v4444_v27  ;;  %2801 = vmatpush.bf16.msrb.mxu2 %v4352_v30 }
 0x15f   : > { %v2059_v33 = vpop.f32.mrf.mxu1 }
 0x160   : > { %v2060_v34 = vadd.f32 %v2059_v33, %v2046_v32  ;;  %v4336_v32 = vor.u32 %v4853_v20, %v4335_v19  ;;  %v4850_v33 = vld [vmem:[%s7074_s6 + $0x68] sm:$0xf0]  ;;  %v4301_v19 = vld [vmem:[%s7074_s6 + $0x3c] sm:$0xf0]  ;;  %v4287_v20 = vld [vmem:[%s7074_s6 + $0x18] sm:$0xf] }
 0x161   : > { %v4304_v23 = vor.u32 %v4843_v18, %v4301_v19  ;;  %v4881_v18 = vld [vmem:[%s7074_s6 + $0x160] sm:$0xf0]  ;;  %v4467_v19 = vld [vmem:[%s7074_s6 + $0x180] sm:$0xf] }
 0x162   : > { %v2074_v38 = vadd.f32 %v2073_v35, %v2060_v34  ;;  %v6397_v44 = vpop.permute.xlu0 %2086  ;;  %v4552_v34 = vor.u32 %v4907_v56, %v4551_v28  ;;  %v4431_v35 = vld [vmem:[%s7074_s6 + $0x138] sm:$0xf]  ;;  %2760 = vmatpush.bf16.msrb.mxu3 %v4336_v32  ;;  %v4865_v56 = vld [vmem:[%s7074_s6 + $0xe0] sm:$0xf0]  ;;  %v4289_v32 = vld [vmem:[%s7074_s6 + $0x24] sm:$0xf0] }
 0x163   : > { %v2097_v47 = vmul.f32 %v4991_v45, %v6397_v44 }
 0x164   : > { %v2079_v39 = vpack.c.bf16 %v2074_v38, %v2074_v38  ;;  %v4852_v38 = vld [vmem:[%s7074_s6 + $0x7c] sm:$0xf]  ;;  %2786 = vmatpush.bf16.msra.mxu1 %v4552_v34 }
 0x166   : > { %v2108_v42 = vunpack.c.l.b16 %v2079_v39  ;;  %v4337_v39 = vld [vmem:[%s7074_s6 + $0x84] sm:$0xf0] }
 0x168   : > { %v2111_v43 = vpack.c.b16 %v2108_v42, %v2105_v40  ;;  %v4539_v40 = vld [vmem:[%s7074_s6 + $0x210] sm:$0xf]  ;;  %v4904_v42 = vld [vmem:[%s7074_s6 + $0x218] sm:$0xf0] }
 0x16a   : > { %2167 = vmatmul.bf16.vlgmr.msra.gmra.mxu3 %v2111_v43  ;;  %v6405_v50 = vpop.permute.xlu0 %2091  ;;  %v4432_v43 = vor.u32 %v4877_v37, %v4431_v35  ;;  %v4882_v35 = vld [vmem:[%s7074_s6 + $0x16c] sm:$0xf]  ;;  %v4457_v37 = vld [vmem:[%s7074_s6 + $0x174] sm:$0xf0] }
 0x16b   : > { %v2098_v57 = vmul.f32 %v4991_v45, %v6405_v50  ;;  %v4340_v45 = vor.u32 %v4852_v38, %v4337_v39  ;;  %v4371_v39 = vld [vmem:[%s7074_s6 + $0xc0] sm:$0xf] }
 0x16c   : > { %2774 = vmatpush.bf16.msrb.mxu0 %v4432_v43  ;;  %v4862_v43 = vld [vmem:[%s7074_s6 + $0xc8] sm:$0xf0] }
 0x16d   : > { %2802 = vmatpush.bf16.msrb.mxu2 %v4340_v45  ;;  %v4479_v45 = vld [vmem:[%s7074_s6 + $0x198] sm:$0xf] }
 0x1d6   : > { %v2140_v46 = vpop.f32.mrf.mxu0 }
 0x1d7   : > { %v2141_v49 = vadd.f32 %v2140_v46, %v2097_v47  ;;  %v4540_v46 = vor.u32 %v4904_v42, %v4539_v40  ;;  %v4419_v47 = vld [vmem:[%s7074_s6 + $0x120] sm:$0xf]  ;;  %v4384_v40 = vor.u32 %v4865_v56, %v4383_v24 }
 0x1d8   : > { %v4439_v56 = vld [vmem:[%s7074_s6 + $0x140] sm:$0xf] }
 0x1d9   : > { %2787 = vmatpush.bf16.msra.mxu1 %v4540_v46  ;;  %v4889_v46 = vld [vmem:[%s7074_s6 + $0x1a0] sm:$0xf0] }
 0x1dc   : > { %v2154_v48 = vpop.f32.mrf.mxu2 }
 0x1dd   : > { %v2155_v51 = vadd.f32 %v2154_v48, %v2141_v49  ;;  %v4874_v48 = vld [vmem:[%s7074_s6 + $0x128] sm:$0xf0]  ;;  %v4849_v49 = vld [vmem:[%s7074_s6 + $0x64] sm:$0xf] }
 0x1de   : > { %v2142_v53 = vpop.f32.mrf.mxu0 }
 0x1df   : > { %v2143_v58 = vadd.f32 %v2142_v53, %v2098_v57  ;;  %v4527_v57 = vld [vmem:[%s7074_s6 + $0x1f8] sm:$0xf]  ;;  %v4311_v53 = vld [vmem:[%s7074_s6 + $0x48] sm:$0xf] }
 0x1e4   : > { %v2156_v55 = vpop.f32.mrf.mxu2 }
 0x1e5   : > { %v2157_v59 = vadd.f32 %v2156_v55, %v2143_v58  ;;  %v4420_v58 = vor.u32 %v4874_v48, %v4419_v47 }
 0x1e7   : > { %2775 = vmatpush.bf16.msrb.mxu0 %v4420_v58  ;;  %v4460_v58 = vor.u32 %v4882_v35, %v4457_v37  ;;  %v4864_v35 = vld [vmem:[%s7074_s6 + $0xdc] sm:$0xf]  ;;  %v4385_v37 = vld [vmem:[%s7074_s6 + $0xe4] sm:$0xf0] }
 0x1ed   : > { %v2168_v52 = vpop.f32.mrf.mxu3 }
 0x1ee   : > { %v2169_v14 = vadd.f32 %v2168_v52, %v2155_v51  ;;  %v4324_v51 = vor.u32 %v4850_v33, %v4323_v26  ;;  %v4325_v52 = vld [vmem:[%s7074_s6 + $0x6c] sm:$0xf0]  ;;  %v4892_v26 = vld [vmem:[%s7074_s6 + $0x1b8] sm:$0xf0]  ;;  %v4275_v33 = vld [vmem:[%s7074_s6] sm:$0xf] }
 0x1ef   : > { %v4492_v38 = vor.u32 %v4892_v26, %v4491_v25  ;;  %v4397_v25 = vld [vmem:[%s7074_s6 + $0xfc] sm:$0xf0]  ;;  %v4900_v26 = vld [vmem:[%s7074_s6 + $0x1fc] sm:$0xf] }
 0x1f0   : > { %v2174_v54 = vsel %vm2173_vm3, %v2169_v14, -inf  ;;  %2761 = vmatpush.bf16.msrb.mxu3 %v4324_v51  ;;  %v4277_v51 = vld [vmem:[%s7074_s6 + $0xc] sm:$0xf0] }
 0x1f1   : > { %2175 = vmax.xlane.f32.xlu1 %v2174_v54  ;;  %v4847_v54 = vld [vmem:[%s7074_s6 + $0x50] sm:$0xf0] }
 0x1f5   : > { %v2170_v60 = vpop.f32.mrf.mxu3 }
 0x1f6   : > { %v2171_v61 = vadd.f32 %v2170_v60, %v2157_v59  ;;  %v4328_v59 = vor.u32 %v4849_v49, %v4325_v52  ;;  %v4407_v60 = vld [vmem:[%s7074_s6 + $0x108] sm:$0xf]  ;;  %v4837_v49 = vld [vmem:[%s7074_s6 + $0x4] sm:$0xf]  ;;  %v4906_v52 = vld [vmem:[%s7074_s6 + $0x22c] sm:$0xf] }
 0x1f8   : > { %v2177_v63 = vsel %vm2173_vm3, %v2171_v61, -inf  ;;  %2803 = vmatpush.bf16.msrb.mxu2 %v4328_v59  ;;  %v4480_v59 = vor.u32 %v4889_v46, %v4479_v45  ;;  %v4875_v45 = vld [vmem:[%s7074_s6 + $0x130] sm:$0xf0] }
 0x1f9   : > { %2178 = vmax.xlane.f32.xlu1 %v2177_v63  ;;  %v4515_v63 = vld [vmem:[%s7074_s6 + $0x1e0] sm:$0xf] }
 0x264   : > { %v2176_v0 = vpop.xlane.xlu1 %2175 }
 0x265   : > { %v2180_v31 = vsub.f32 %v2169_v14, %v2176_v0  ;;  %v4901_v14 = vld [vmem:[%s7074_s6 + $0x200] sm:$0xf0] }
 0x266   : > { %v4528_v55 = vor.u32 %v4901_v14, %v4527_v57  ;;  %v4553_v14 = vld [vmem:[%s7074_s6 + $0x234] sm:$0xf0] }
 0x267   : > { %v2182_v1 = vmul.f32 1.442695, %v2180_v31  ;;  %v4312_v31 = vor.u32 %v4847_v54, %v4311_v53  ;;  %v4463_v53 = vld [vmem:[%s7074_s6 + $0x170] sm:$0xf]  ;;  %v4884_v54 = vld [vmem:[%s7074_s6 + $0x178] sm:$0xf0] }
 0x268   : > { %2788 = vmatpush.bf16.msra.mxu1 %v4528_v55 }
 0x269   : > { %4992 = vpow2.f32 %v2182_v1  ;;  %v4846_v1 = vld [vmem:[%s7074_s6 + $0x4c] sm:$0xf]  ;;  %2762 = vmatpush.bf16.msrb.mxu3 %v4312_v31  ;;  %v4556_v31 = vor.u32 %v4906_v52, %v4553_v14  ;;  %v4373_v52 = vld [vmem:[%s7074_s6 + $0xcc] sm:$0xf0] }
 0x26a   : > { %v4894_v14 = vld [vmem:[%s7074_s6 + $0x1cc] sm:$0xf] }
 0x26c   : > { %v2179_v2 = vpop.xlane.xlu1 %2178 }
 0x26d   : > { %v2181_v3 = vsub.f32 %v2171_v61, %v2179_v2  ;;  %v4871_v61 = vld [vmem:[%s7074_s6 + $0x110] sm:$0xf0]  ;;  %v4313_v2 = vld [vmem:[%s7074_s6 + $0x54] sm:$0xf0] }
 0x26e   : > { %v4408_v9 = vor.u32 %v4871_v61, %v4407_v60  ;;  %v4316_v10 = vor.u32 %v4846_v1, %v4313_v2  ;;  %v4879_v60 = vld [vmem:[%s7074_s6 + $0x154] sm:$0xf]  ;;  %v4445_v61 = vld [vmem:[%s7074_s6 + $0x15c] sm:$0xf0]  ;;  %v4464_v1 = vor.u32 %v4884_v54, %v4463_v53  ;;  %v4505_v53 = vld [vmem:[%s7074_s6 + $0x1d4] sm:$0xf0] }
 0x26f   : > { %v6410_v4 = vpop.eup %4992  ;;  %v2184_v5 = vmul.f32 1.442695, %v2181_v3  ;;  %v4898_v3 = vld [vmem:[%s7074_s6 + $0x1e8] sm:$0xf0]  ;;  %v4448_v2 = vor.u32 %v4879_v60, %v4445_v61  ;;  %v4415_v54 = vld [vmem:[%s7074_s6 + $0x110] sm:$0xf] }
 0x270   : > { %v2186_v36 = vsel %vm2173_vm3, %v6410_v4, 0.0  ;;  %v4516_v8 = vor.u32 %v4898_v3, %v4515_v63  ;;  %2776 = vmatpush.bf16.msrb.mxu0 %v4408_v9  ;;  %2804 = vmatpush.bf16.msrb.mxu2 %v4316_v10  ;;  %v4372_v63 = vor.u32 %v4862_v43, %v4371_v39  ;;  %v4876_v3 = vld [vmem:[%s7074_s6 + $0x13c] sm:$0xf]  ;;  %v4870_v10 = vld [vmem:[%s7074_s6 + $0x10c] sm:$0xf] }
 0x271   : > { %4994 = vpow2.f32 %v2184_v5  ;;  %2187 = vadd.xlane.f32.xlu2 %v2186_v36  ;;  %v4299_v36 = vld [vmem:[%s7074_s6 + $0x30] sm:$0xf]  ;;  %v4412_v12 = vor.u32 %v4870_v10, %v4409_v11  ;;  %v4897_v39 = vld [vmem:[%s7074_s6 + $0x1e4] sm:$0xf]  ;;  %v4331_v60 = vld [vmem:[%s7074_s6 + $0x68] sm:$0xf] }
 0x272   : > { %2789 = vmatpush.bf16.msra.mxu1 %v4516_v8  ;;  %v4421_v8 = vld [vmem:[%s7074_s6 + $0x12c] sm:$0xf0]  ;;  %v4851_v61 = vld [vmem:[%s7074_s6 + $0x70] sm:$0xf0]  ;;  %v4481_v10 = vld [vmem:[%s7074_s6 + $0x1a4] sm:$0xf0] }
 0x273   : > { %v4391_v11 = vld [vmem:[%s7074_s6 + $0xe0] sm:$0xf] }
 0x274   : > { %2777 = vmatpush.bf16.msrb.mxu0 %v4396_v22  ;;  %2805 = vmatpush.bf16.msrb.mxu2 %v4304_v23  ;;  %v4860_v22 = vld [vmem:[%s7074_s6 + $0xb8] sm:$0xf0]  ;;  %v4867_v23 = vld [vmem:[%s7074_s6 + $0xf4] sm:$0xf] }
 0x276   : > { %2790 = vmatpush.bf16.msra.mxu1 %v4504_v41 }
 0x277   : > { %v6414_v6 = vpop.eup %4994 }
 0x278   : > { %v2189_v7 = vsel %vm2173_vm3, %v6414_v6, 0.0  ;;  %2778 = vmatpush.bf16.msrb.mxu0 %v4384_v40  ;;  %v4517_v40 = vld [vmem:[%s7074_s6 + $0x1ec] sm:$0xf0] }
 0x279   : > { %2190 = vadd.xlane.f32.xlu2 %v2189_v7  ;;  %v4844_v7 = vld [vmem:[%s7074_s6 + $0x38] sm:$0xf0]  ;;  %v4520_v43 = vor.u32 %v4897_v39, %v4517_v40  ;;  %v4547_v39 = vld [vmem:[%s7074_s6 + $0x218] sm:$0xf]  ;;  %v4905_v40 = vld [vmem:[%s7074_s6 + $0x220] sm:$0xf0] }
 0x27a   : > { %v4300_v16 = vor.u32 %v4844_v7, %v4299_v36  ;;  %2791 = vmatpush.bf16.msra.mxu1 %v4492_v38  ;;  %v4873_v7 = vld [vmem:[%s7074_s6 + $0x124] sm:$0xf]  ;;  %v4388_v38 = vor.u32 %v4864_v35, %v4385_v37 }
 0x27b   : > { %v4424_v9 = vor.u32 %v4873_v7, %v4421_v8  ;;  %v4848_v7 = vld [vmem:[%s7074_s6 + $0x58] sm:$0xf0] }
 0x27c   : > { %2763 = vmatpush.bf16.msrb.mxu3 %v4300_v16  ;;  %2779 = vmatpush.bf16.msrb.mxu0 %v4372_v63  ;;  %v4451_v16 = vld [vmem:[%s7074_s6 + $0x158] sm:$0xf]  ;;  %v4332_v63 = vor.u32 %v4851_v61, %v4331_v60  ;;  %v4890_v60 = vld [vmem:[%s7074_s6 + $0x1a8] sm:$0xf0] }
 0x27e   : > { %2792 = vmatpush.bf16.msra.mxu1 %v4480_v59 }
 0x2e4   : > { %v2188_v29 = vpop.xlane.xlu2 %2187 }
 0x2e5   : > { %4996 = vrcp.f32 %v2188_v29  ;;  %v4840_v29 = vld [vmem:[%s7074_s6 + $0x1c] sm:$0xf] }
 0x2e6   : > { %v4292_v42 = vor.u32 %v4840_v29, %v4289_v32  ;;  %v4878_v29 = vld [vmem:[%s7074_s6 + $0x148] sm:$0xf0] }
 0x2e7   : > { %v4440_v32 = vor.u32 %v4878_v29, %v4439_v56  ;;  %v4559_v29 = vld [vmem:[%s7074_s6 + $0x230] sm:$0xf] }
 0x2e8   : > { %2806 = vmatpush.bf16.msrb.mxu2 %v4292_v42  ;;  %v4427_v42 = vld [vmem:[%s7074_s6 + $0x128] sm:$0xf] }
 0x2e9   : > { %v4428_v46 = vor.u32 %v4875_v45, %v4427_v42  ;;  %v4548_v42 = vor.u32 %v4905_v40, %v4547_v39  ;;  %v4902_v45 = vld [vmem:[%s7074_s6 + $0x208] sm:$0xf0] }
 0x2eb   : > { %v4997_v5 = vpop.eup %4996 }
 0x2ec   : > { %v2191_v0 = vpop.xlane.xlu2 %2190  ;;  %v2194_v15 = vmul.f32 %v4997_v5, %v6410_v4  ;;  %v4841_v4 = vld [vmem:[%s7074_s6 + $0x20] sm:$0xf0]  ;;  %v4433_v5 = vld [vmem:[%s7074_s6 + $0x144] sm:$0xf0] }
 0x2ed   : > { %4998 = vrcp.f32 %v2191_v0  ;;  %v4288_v28 = vor.u32 %v4841_v4, %v4287_v20  ;;  %v4280_v0 = vor.u32 %v4837_v49, %v4277_v51  ;;  %v4436_v36 = vor.u32 %v4876_v3, %v4433_v5  ;;  %v4886_v20 = vld [vmem:[%s7074_s6 + $0x188] sm:$0xf0]  ;;  %v4861_v51 = vld [vmem:[%s7074_s6 + $0xc4] sm:$0xf] }
 0x2ee   : > { %v2196_v27 = vpack.c.bf16 %v2194_v15, %v2194_v15  ;;  %v4541_v15 = vld [vmem:[%s7074_s6 + $0x21c] sm:$0xf0]  ;;  %v4452_v4 = vor.u32 %v4881_v18, %v4451_v16  ;;  %v4468_v41 = vor.u32 %v4886_v20, %v4467_v19  ;;  %v4869_v3 = vld [vmem:[%s7074_s6 + $0x100] sm:$0xf0]  ;;  %v4307_v16 = vld [vmem:[%s7074_s6 + $0x38] sm:$0xf] }
 0x2ef   : > { %2764 = vmatpush.bf16.msrb.mxu3 %v4288_v28  ;;  %2807 = vmatpush.bf16.msrb.mxu2 %v4280_v0  ;;  %v4544_v17 = vor.u32 %v4903_v13, %v4541_v15  ;;  %v4891_v0 = vld [vmem:[%s7074_s6 + $0x1b4] sm:$0xf]  ;;  %v4866_v13 = vld [vmem:[%s7074_s6 + $0xe8] sm:$0xf0]  ;;  %v4885_v18 = vld [vmem:[%s7074_s6 + $0x184] sm:$0xf] }
 0x2f0   : > { %v2204_v47 = vunpack.c.l.b16 %v2196_v27  ;;  %v4529_v27 = vld [vmem:[%s7074_s6 + $0x204] sm:$0xf0]  ;;  %2793 = vmatpush.bf16.msra.mxu1 %v4468_v41  ;;  %v4392_v15 = vor.u32 %v4866_v13, %v4391_v11  ;;  %v4469_v20 = vld [vmem:[%s7074_s6 + $0x18c] sm:$0xf0]  ;;  %v4863_v41 = vld [vmem:[%s7074_s6 + $0xd0] sm:$0xf0] }
 0x2f1   : > { %v4532_v28 = vor.u32 %v4900_v26, %v4529_v27  ;;  %v4283_v26 = vld [vmem:[%s7074_s6 + $0x8] sm:$0xf]  ;;  %v4839_v27 = vld [vmem:[%s7074_s6 + $0x10] sm:$0xf0] }
 0x2f3   : > { %v4999_v21 = vpop.eup %4998 }
 0x2f4   : > { %v2195_v30 = vmul.f32 %v4999_v21, %v6414_v6  ;;  %v4838_v6 = vld [vmem:[%s7074_s6 + $0x8] sm:$0xf0]  ;;  %v4367_v21 = vld [vmem:[%s7074_s6 + $0xb0] sm:$0xf] }
 0x2f5   : > { %v4276_v57 = vor.u32 %v4838_v6, %v4275_v33  ;;  %v4368_v24 = vor.u32 %v4860_v22, %v4367_v21  ;;  %v4355_v33 = vld [vmem:[%s7074_s6 + $0x98] sm:$0xf]  ;;  %v4857_v6 = vld [vmem:[%s7074_s6 + $0xa0] sm:$0xf0]  ;;  %v4472_v21 = vor.u32 %v4885_v18, %v4469_v20 }
 0x2f6   : > { %v2197_v34 = vpack.c.bf16 %v2195_v30, %v2195_v30  ;;  %v4400_v30 = vor.u32 %v4867_v23, %v4397_v25  ;;  %v4295_v23 = vld [vmem:[%s7074_s6 + $0x20] sm:$0xf] }
 0x2f7   : > { %2765 = vmatpush.bf16.msrb.mxu3 %v4276_v57  ;;  %v4376_v57 = vor.u32 %v4861_v51, %v4373_v52  ;;  %v4899_v51 = vld [vmem:[%s7074_s6 + $0x1f0] sm:$0xf0] }
 0x2f8   : > { %v2205_v48 = vunpack.c.l.b16 %v2197_v34  ;;  %v4356_v34 = vor.u32 %v4857_v6, %v4355_v33 }
 0x2fa   : > { %v2206_v55 = vpack.c.b16 %v2205_v48, %v2204_v47  ;;  %v4343_v47 = vld [vmem:[%s7074_s6 + $0x80] sm:$0xf]  ;;  %v4854_v48 = vld [vmem:[%s7074_s6 + $0x88] sm:$0xf0] }
 0x2fb   : > { %2814 = vmatpush.bf16.msra.mxu3 %v4460_v58  ;;  %v4344_v49 = vor.u32 %v4854_v48, %v4343_v47  ;;  %v4872_v58 = vld [vmem:[%s7074_s6 + $0x118] sm:$0xf0] }
 0x2fc   : > { %4270 = vmatmul.msk.bf16.vlgmr.msra.gmra.mxu0 %vm2173_vm3, %v2206_v55  ;;  %4271 = vmatmul.msk.bf16.vlgmr.msrb.gmra.mxu1 %vm2173_vm3, %v2206_v55  ;;  %v4416_v59 = vor.u32 %v4872_v58, %v4415_v54  ;;  %v4499_v54 = vld [vmem:[%s7074_s6 + $0x1b8] sm:$0xf] }
 0x2fd   : > { %4272 = vmatmul.msk.bf16.vlgmr.msra.gmra.mxu2 %vm2173_vm3, %v2206_v55  ;;  %2828 = vmatpush.bf16.msra.mxu0 %v4556_v31  ;;  %v4508_v55 = vor.u32 %v4894_v14, %v4505_v53  ;;  %v4493_v31 = vld [vmem:[%s7074_s6 + $0x1bc] sm:$0xf0]  ;;  %v4896_v14 = vld [vmem:[%s7074_s6 + $0x1d8] sm:$0xf0] }
 0x2fe   : > { %2856 = vmatpush.bf16.msra.mxu2 %v4464_v1  ;;  %2842 = vmatpush.bf16.msrb.mxu1 %v4368_v24  ;;  %v4403_v1 = vld [vmem:[%s7074_s6 + $0xf8] sm:$0xf]  ;;  %v4842_v24 = vld [vmem:[%s7074_s6 + $0x28] sm:$0xf0] }
 0x2ff   : > { %2815 = vmatpush.bf16.msra.mxu3 %v4448_v2  ;;  %v4496_v2 = vor.u32 %v4891_v0, %v4493_v31  ;;  %v4404_v5 = vor.u32 %v4869_v3, %v4403_v1  ;;  %v4296_v25 = vor.u32 %v4842_v24, %v4295_v23  ;;  %v4887_v0 = vld [vmem:[%s7074_s6 + $0x190] sm:$0xf0] }
 0x301   : > { %2829 = vmatpush.bf16.msra.mxu0 %v4544_v17  ;;  %v4845_v17 = vld [vmem:[%s7074_s6 + $0x40] sm:$0xf0] }
 0x302   : > { %2857 = vmatpush.bf16.msra.mxu2 %v4452_v4  ;;  %2843 = vmatpush.bf16.msrb.mxu1 %v4356_v34  ;;  %v4308_v19 = vor.u32 %v4845_v17, %v4307_v16  ;;  %v4379_v4 = vld [vmem:[%s7074_s6 + $0xc8] sm:$0xf] }
 0x303   : > { %2816 = vmatpush.bf16.msra.mxu3 %v4436_v36  ;;  %v4319_v36 = vld [vmem:[%s7074_s6 + $0x50] sm:$0xf]  ;;  %v4380_v22 = vor.u32 %v4863_v41, %v4379_v4 }
 0x304   : > { %v4320_v8 = vor.u32 %v4848_v7, %v4319_v36 }
 0x305   : > { %2830 = vmatpush.bf16.msra.mxu0 %v4532_v28 }
 0x306   : > { %2858 = vmatpush.bf16.msra.mxu2 %v4440_v32  ;;  %2844 = vmatpush.bf16.msrb.mxu1 %v4344_v49  ;;  %v4908_v32 = vld [vmem:[%s7074_s6 + $0x238] sm:$0xf0]  ;;  %v4523_v49 = vld [vmem:[%s7074_s6 + $0x1e8] sm:$0xf] }
 0x307   : > { %2817 = vmatpush.bf16.msra.mxu3 %v4424_v9  ;;  %v4888_v9 = vld [vmem:[%s7074_s6 + $0x19c] sm:$0xf]  ;;  %v4560_v35 = vor.u32 %v4908_v32, %v4559_v29  ;;  %v4524_v52 = vor.u32 %v4899_v51, %v4523_v49 }
 0x309   : > { %2831 = vmatpush.bf16.msra.mxu0 %v4520_v43  ;;  %v4535_v43 = vld [vmem:[%s7074_s6 + $0x200] sm:$0xf] }
 0x30a   : > { %2859 = vmatpush.bf16.msra.mxu2 %v4428_v46  ;;  %2845 = vmatpush.bf16.msrb.mxu1 %v4332_v63  ;;  %v4536_v48 = vor.u32 %v4902_v45, %v4535_v43  ;;  %v4475_v63 = vld [vmem:[%s7074_s6 + $0x188] sm:$0xf] }
 0x30b   : > { %2818 = vmatpush.bf16.msra.mxu3 %v4412_v12  ;;  %v4484_v12 = vor.u32 %v4888_v9, %v4481_v10  ;;  %v4476_v31 = vor.u32 %v4887_v0, %v4475_v63  ;;  %v3062_v63 = vld [vmem:[#allocation4] sm:$0x1] }
 0x30c   : > { %v3063_v0 = vmax.f32 %v3062_v63, 1e-06 }
 0x30d   : > { %2832 = vmatpush.bf16.msra.mxu0 %v4508_v55  ;;  %v4893_v55 = vld [vmem:[%s7074_s6 + $0x1c0] sm:$0xf0] }
 0x30e   : > { %2860 = vmatpush.bf16.msra.mxu2 %v4416_v59  ;;  %2846 = vmatpush.bf16.msrb.mxu1 %v4320_v8  ;;  %v4500_v58 = vor.u32 %v4893_v55, %v4499_v54  ;;  %v4487_v59 = vld [vmem:[%s7074_s6 + $0x1a0] sm:$0xf] }
 0x30f   : > { %2819 = vmatpush.bf16.msra.mxu3 %v4400_v30  ;;  %v4284_v30 = vor.u32 %v4839_v27, %v4283_v26  ;;  %v4488_v61 = vor.u32 %v4890_v60, %v4487_v59  ;;  %v3490_v8 = vld [vmem:[%s7076_s8 + $0x2] ss:$8 sm:$0x7] }
 0x310   : > { %v2368_v11 = vperm.slane %v3490_v8, 0  ;;  %v2370_v18 = vperm.slane %v3490_v8, 2 }
 0x311   : > { %2833 = vmatpush.bf16.msra.mxu0 %v4496_v2 }
 0x312   : > { %2861 = vmatpush.bf16.msra.mxu2 %v4404_v5  ;;  %2847 = vmatpush.bf16.msrb.mxu1 %v4308_v19 }
 0x313   : > { %2820 = vmatpush.bf16.msra.mxu3 %v4388_v38 }
 0x315   : > { %2834 = vmatpush.bf16.msra.mxu0 %v4484_v12  ;;  %v2369_v12 = vperm.slane %v3490_v8, 1 }
 0x316   : > { %2862 = vmatpush.bf16.msra.mxu2 %v4392_v15  ;;  %2848 = vmatpush.bf16.msrb.mxu1 %v4296_v25 }
 0x317   : > { %2821 = vmatpush.bf16.msra.mxu3 %v4376_v57  ;;  %v4511_v57 = vld [vmem:[%s7074_s6 + $0x1d0] sm:$0xf] }
 0x318   : > { %v4512_v53 = vor.u32 %v4896_v14, %v4511_v57 }
 0x319   : > { %2835 = vmatpush.bf16.msra.mxu0 %v4472_v21 }
 0x31a   : > { %2863 = vmatpush.bf16.msra.mxu2 %v4380_v22  ;;  %2849 = vmatpush.bf16.msrb.mxu1 %v4284_v30 }
 0x379   : > { %v2235_v28 = vpop.f32.mrf.mxu0  ;;  %v2249_v56 = vpop.f32.mrf.mxu1 }
 0x380   : > { %v2263_v33 = vpop.f32.mrf.mxu2 }
 0x381   : > { %v2237_v6 = vpop.f32.mrf.mxu0  ;;  %v2251_v34 = vpop.f32.mrf.mxu1 }
 0x382   : > { %v2268_v37 = vpack.c.bf16 %v2237_v6, %v2235_v28  ;;  %v2269_v38 = vpack.c.bf16 %v2251_v34, %v2249_v56 }
 0x384   : > { %2766 = vmatmul.bf16.vlgmr.msrb.gmra.mxu3 %v2268_v37  ;;  %2780 = vmatmul.bf16.vlgmr.msrb.gmra.mxu0 %v2269_v38 }
 0x385   : > { %2808 = vmatmul.bf16.vlgmr.msrb.gmra.mxu2 %v2268_v37  ;;  %2870 = vmatpush.bf16.msrb.mxu3 %v4560_v35 }
 0x388   : > { %v2265_v46 = vpop.f32.mrf.mxu2 }
 0x389   : > { %v2270_v47 = vpack.c.bf16 %v2265_v46, %v2263_v33  ;;  %2871 = vmatpush.bf16.msrb.mxu3 %v4548_v42 }
 0x38b   : > { %2794 = vmatmul.bf16.vlgmr.msra.gmra.mxu1 %v2270_v47 }
 0x38d   : > { %2872 = vmatpush.bf16.msrb.mxu3 %v4536_v48 }
 0x391   : > { %2873 = vmatpush.bf16.msrb.mxu3 %v4524_v52 }
 0x394   : > { %2822 = vmatmul.bf16.vlgmr.msra.gmra.mxu3 %v2269_v38  ;;  %2836 = vmatmul.bf16.vlgmr.msra.gmra.mxu0 %v2270_v47 }
 0x395   : > { %2864 = vmatmul.bf16.vlgmr.msra.gmra.mxu2 %v2269_v38  ;;  %2874 = vmatpush.bf16.msrb.mxu3 %v4512_v53 }
 0x399   : > { %2875 = vmatpush.bf16.msrb.mxu3 %v4500_v58 }
 0x39b   : > { %2850 = vmatmul.bf16.vlgmr.msrb.gmra.mxu1 %v2268_v37 }
 0x39d   : > { %2876 = vmatpush.bf16.msrb.mxu3 %v4488_v61 }
 0x3a1   : > { %2877 = vmatpush.bf16.msrb.mxu3 %v4476_v31  ;;  %v5094_v31 = vmov 320.0  }
 0x3a2   : > { %5000 = vrcp.f32 %v5094_v31  ;;  %v4912_v31 = vld [vmem:[%s7075_s7 + $0x18] sm:$0xff] }
 0x3a4   : > { %2878 = vmatmul.bf16.vlgmr.msrb.gmra.mxu3 %v2270_v47 }
 0x401   : > { %v2781_v3 = vpop.f32.mrf.mxu0 }
 0x407   : > { %v2767_v1 = vpop.f32.mrf.mxu3 }
 0x408   : > { %v2795_v2 = vpop.f32.mrf.mxu1  ;;  %v2809_v5 = vpop.f32.mrf.mxu2  ;;  %v2768_v15 = vadd.f32 %v2767_v1, %v2368_v11 }
 0x409   : > { %v2783_v10 = vpop.f32.mrf.mxu0  ;;  %v2810_v16 = vadd.f32 %v2809_v5, %v2369_v12  ;;  %v5001_v1 = vpop.eup %5000 }
 0x40a   : > { %v2782_v4 = vadd.f32 %v2781_v3, %v2768_v15  ;;  %vm2899_vm4 = vweird.f32 %v5001_v1 }
 0x40c   : > { %v6860_v24 = vadd.f32 %v2795_v2, %v2782_v4  ;;  %v2895_v2 = vmul.f32 320.0, %v5001_v1 }
 0x40e   : > { %v2903_v32 = vmul.f32 %v6860_v24, %v6860_v24  ;;  %v2896_v3 = vsub.f32 1.0, %v2895_v2 }
 0x40f   : > { %v2769_v36 = vpop.f32.mrf.mxu3 }
 0x410   : > { %v2797_v7 = vpop.f32.mrf.mxu1  ;;  %v2811_v13 = vpop.f32.mrf.mxu2  ;;  %v2770_v26 = vadd.f32 %v2769_v36, %v2368_v11  ;;  %v2897_v5 = vmul.f32 %v5001_v1, %v2896_v3 }
 0x411   : > { %v2837_v41 = vpop.f32.mrf.mxu0  ;;  %v2812_v27 = vadd.f32 %v2811_v13, %v2369_v12 }
 0x412   : > { %v2784_v38 = vadd.f32 %v2783_v10, %v2770_v26  ;;  %v2898_v36 = vadd.f32 %v5001_v1, %v2897_v5 }
 0x414   : > { %v6877_v49 = vadd.f32 %v2797_v7, %v2784_v38  ;;  %v2900_v7 = vsel %vm2899_vm4, %v5001_v1, %v2898_v36  ;;  %v1510_v38 = vlaneseq  ;;  %v4920_v1 = vld [vmem:[%s7075_s7 + $0x58] sm:$0xff] }
 0x416   : > { %v2906_v58 = vmul.f32 %v6877_v49, %v6877_v49  ;;  %vm6929_vm8 = vcmp.lt.s32.totalorder %v1510_v38, 320  ;;  %v4918_v38 = vld [vmem:[%s7075_s7 + $0x48] sm:$0xff] }
 0x417   : > { %v2823_v9 = vpop.f32.mrf.mxu3  ;;  %1514 = vst.msk [vmem:[%s6920_s19] sm:$0x7] %vm6929_vm8, %v5093_v62  ;;  %v4913_v62 = vld [vmem:[%s7075_s7 + $0x20] sm:$0xff] }
 0x418   : > { %v2851_v17 = vpop.f32.mrf.mxu1  ;;  %v2824_v19 = vadd.f32 %v2823_v9, %v2810_v16  ;;  %v2865_v23 = vpop.f32.mrf.mxu2 }
 0x419   : > { %v2852_v21 = vadd.f32 %v2851_v17, %v2370_v18  ;;  %v2839_v42 = vpop.f32.mrf.mxu0 }
 0x41a   : > { %v6858_v22 = vadd.f32 %v2837_v41, %v2824_v19 }
 0x41b   : > { %v2866_v25 = vadd.f32 %v2865_v23, %v2852_v21 }
 0x41c   : > { %v2904_v56 = vmul.f32 %v6858_v22, %v6858_v22  ;;  %v2884_v6 = vadd.f32 %v6858_v22, %v6860_v24 }
 0x41e   : > { %v2909_v40 = vadd.f32 %v2904_v56, %v2903_v32  ;;  %v4924_v56 = vld [vmem:[%s7075_s7 + $0x78] sm:$0xff] }
 0x41f   : > { %v2825_v20 = vpop.f32.mrf.mxu3  ;;  %3273 = vmatpush.bf16.msra.mxu1 %v4924_v56 }
 0x420   : > { %v2853_v30 = vpop.f32.mrf.mxu1  ;;  %v2826_v33 = vadd.f32 %v2825_v20, %v2812_v27  ;;  %v2867_v46 = vpop.f32.mrf.mxu2 }
 0x421   : > { %v2854_v34 = vadd.f32 %v2853_v30, %v2370_v18 }
 0x422   : > { %v6875_v45 = vadd.f32 %v2839_v42, %v2826_v33  ;;  %v4914_v42 = vld [vmem:[%s7075_s7 + $0x28] sm:$0xff] }
 0x423   : > { %v2868_v48 = vadd.f32 %v2867_v46, %v2854_v34  ;;  %v4923_v34 = vld [vmem:[%s7075_s7 + $0x70] sm:$0xff] }
 0x424   : > { %v2889_v57 = vadd.f32 %v6875_v45, %v6877_v49  ;;  %v2907_v55 = vmul.f32 %v6875_v45, %v6875_v45  ;;  %3274 = vmatpush.bf16.msra.mxu1 %v4923_v34 }
 0x426   : > { %v2914_v60 = vadd.f32 %v2907_v55, %v2906_v58 }
 0x427   : > { %v2879_v28 = vpop.f32.mrf.mxu3 }
 0x428   : > { %v6864_v29 = vadd.f32 %v2879_v28, %v2866_v25  ;;  %v4916_v28 = vld [vmem:[%s7075_s7 + $0x38] sm:$0xff] }
 0x429   : > { %3260 = vmatpush.bf16.msrb.mxu0 %v4916_v28 }
 0x42a   : > { %v2885_v35 = vsel %vm1238_vm0, %v6864_v29, 0.0  ;;  %v2905_v37 = vmul.f32 %v6864_v29, %v6864_v29 }
 0x42b   : > { %v2886_v39 = vadd.f32 %v2885_v35, %v2884_v6  ;;  %v4915_v6 = vld [vmem:[%s7075_s7 + $0x30] sm:$0xff] }
 0x42c   : > { %v2910_v43 = vsel %vm1238_vm0, %v2905_v37, 0.0  ;;  %v6915_v35 = vld [vmem:[%s7076_s8 + $0x3] ss:$8 sm:$0x7] }
 0x42d   : > { %2887 = vadd.xlane.f32.xlu0 %v2886_v39  ;;  %v2911_v47 = vadd.f32 %v2910_v43, %v2909_v40  ;;  %3261 = vmatpush.bf16.msrb.mxu0 %v4915_v6  ;;  %v4922_v43 = vld [vmem:[%s7075_s7 + $0x68] sm:$0xff]  ;;  %v2963_v55 = vperm.slane %v6915_v35, 1 }
 0x42e   : > { %3275 = vmatpush.bf16.msra.mxu1 %v4922_v43 }
 0x42f   : > { %v2881_v51 = vpop.f32.mrf.mxu3  ;;  %2912 = vadd.xlane.f32.xlu2 %v2911_v47 }
 0x430   : > { %v6879_v52 = vadd.f32 %v2881_v51, %v2868_v48  ;;  %v2964_v48 = vperm.slane %v6915_v35, 2 }
 0x431   : > { %3262 = vmatpush.bf16.msrb.mxu0 %v4914_v42 }
 0x432   : > { %v2890_v14 = vsel %vm1238_vm0, %v6879_v52, 0.0  ;;  %v2908_v54 = vmul.f32 %v6879_v52, %v6879_v52 }
 0x433   : > { %v2891_v53 = vadd.f32 %v2890_v14, %v2889_v57  ;;  %v6944_v14 = vld [vmem:[%s7076_s8 + $0x4] ss:$8 sm:$0x7] }
 0x434   : > { %v2915_v59 = vsel %vm1238_vm0, %v2908_v54, 0.0  ;;  %v2975_v2 = vperm.slane %v6944_v14, 0  ;;  %v2976_v36 = vperm.slane %v6944_v14, 1 }
 0x435   : > { %2892 = vadd.xlane.f32.xlu1 %v2891_v53  ;;  %v2916_v61 = vadd.f32 %v2915_v59, %v2914_v60  ;;  %v1518_v59 = vld [vmem:[%s6122_s20 + $0x8] sm:$0xf]  ;;  %v2977_v60 = vperm.slane %v6944_v14, 2  ;;  %3263 = vmatpush.bf16.msrb.mxu0 %v4913_v62 }
 0x439   : > { %3264 = vmatpush.bf16.msrb.mxu0 %v4912_v31 }
 0x43d   : > { %2917 = vadd.xlane.f32.xlu1 %v2916_v61 }
 0x447   : > { %3067 = vperm.xlu2 %4990, %v3063_v0   ;;  %v4928_v0 = vld [vmem:[%s7075_s7 + $0x98] sm:$0xff] }
 0x448   : > { %3290 = vmatpush.bf16.msrb.mxu2 %v4928_v0 }
 0x4a0   : > { %v2888_v8 = vpop.xlane.xlu0 %2887 }
 0x4a1   : > { %v2901_v9 = vmul.f32 %v2900_v7, %v2888_v8 }
 0x4a2   : > { %v2913_v10 = vpop.xlane.xlu2 %2912 }
 0x4a3   : > { %v2919_v11 = vmul.f32 %v2913_v10, %v2900_v7  ;;  %v2921_v12 = vmul.f32 %v2901_v9, %v2901_v9  ;;  %v2929_v39 = vsub.f32 %v6864_v29, %v2901_v9  ;;  %v2927_v47 = vsub.f32 %v6860_v24, %v2901_v9 }
 0x4a4   : > { %v2928_v57 = vsub.f32 %v6858_v22, %v2901_v9  ;;  %v2962_v24 = vperm.slane %v6915_v35, 0  ;;  %v4921_v22 = vld [vmem:[%s7075_s7 + $0x60] sm:$0xff]  ;;  %v4927_v9 = vld [vmem:[%s7075_s7 + $0x90] sm:$0xff]  ;;  %v2989_v10 = vunpack.c.l.bf16 %v1518_v59 }
 0x4a5   : > { %v2923_v13 = vsub.f32 %v2919_v11, %v2921_v12  ;;  %3276 = vmatpush.bf16.msra.mxu1 %v4921_v22  ;;  %v1519_v12 = vld [vmem:[%s6122_s20 + $0xc] sm:$0xff]  ;;  %3291 = vmatpush.bf16.msrb.mxu2 %v4927_v9  ;;  %v4925_v35 = vld [vmem:[%s7075_s7 + $0x80] sm:$0xff] }
 0x4a6   : > { %v2991_v28 = vunpack.c.h.bf16 %v1519_v12 }
 0x4a7   : > { %v2925_v15 = vmax.f32 %v2923_v13, 0.0 }
 0x4a8   : > { %v2893_v16 = vpop.xlane.xlu1 %2892 }
 0x4a9   : > { %v2933_v17 = vadd.f32 1e-05, %v2925_v15  ;;  %v6892_v18 = vmul.f32 %v2900_v7, %v2893_v16  ;;  %3277 = vmatpush.bf16.msra.mxu1 %v4920_v1 }
 0x4aa   : > { %v3068_v34 = vpop.permute.xlu2 %3067 }
 0x4ab   : > { %5002 = vrsqrt.f32 %v2933_v17  ;;  %v2922_v20 = vmul.f32 %v6892_v18, %v6892_v18  ;;  %vm2941_vm6 = vweird.f32 %v2933_v17  ;;  %v2930_v15 = vsub.f32 %v6877_v49, %v6892_v18 }
 0x4ac   : > { %v2931_v16 = vsub.f32 %v6875_v45, %v6892_v18 }
 0x4b0   : > { %v2918_v19 = vpop.xlane.xlu1 %2917 }
 0x4b1   : > { %v2920_v4 = vmul.f32 %v2918_v19, %v2900_v7  ;;  %v5003_v41 = vpop.eup %5002  ;;  %v1517_v7 = vld [vmem:[%s6122_s20] sm:$0xff]  ;;  %v4911_v19 = vld [vmem:[%s7075_s7 + $0x10] sm:$0xff] }
 0x4b2   : > { %v2936_v21 = vmul.f32 %v5003_v41, %v2933_v17  ;;  %vm2942_vm5 = vweird.f32 %v5003_v41  ;;  %v2932_v17 = vsub.f32 %v6879_v52, %v6892_v18  ;;  %v2988_v49 = vunpack.c.h.bf16 %v1517_v7  ;;  %v4926_v18 = vld [vmem:[%s7075_s7 + $0x88] sm:$0xff]  ;;  %3265 = vmatpush.bf16.msrb.mxu0 %v4911_v19 }
 0x4b3   : > { %v2924_v23 = vsub.f32 %v2920_v4, %v2922_v20  ;;  %vm2943_vm7 = vmor %vm2941_vm6, %vm2942_vm5  ;;  %v4919_v20 = vld [vmem:[%s7075_s7 + $0x50] sm:$0xff]  ;;  %3292 = vmatpush.bf16.msrb.mxu2 %v4926_v18 }
 0x4b4   : > { %v2937_v25 = vmul.f32 %v5003_v41, %v2936_v21  ;;  %v1520_v21 = vld [vmem:[%s6122_s20 + $0x14] sm:$0xf]  ;;  %3278 = vmatpush.bf16.msra.mxu1 %v4919_v20 }
 0x4b5   : > { %v2926_v26 = vmax.f32 %v2924_v23, 0.0  ;;  %v2992_v56 = vunpack.c.l.bf16 %v1520_v21  ;;  %v2999_v21 = vld [vmem:[%s6920_s19] sm:$0x7] }
 0x4b6   : > { %v2938_v27 = vmul.f32 0.5, %v2937_v25 }
 0x4b7   : > { %v6896_v30 = vadd.f32 1e-05, %v2926_v26  ;;  %3293 = vmatpush.bf16.msrb.mxu2 %v4925_v35 }
 0x4b8   : > { %v2939_v32 = vsub.f32 1.5, %v2938_v27  ;;  %3279 = vmatpush.bf16.msra.mxu1 %v4918_v38 }
 0x4b9   : > { %5004 = vrsqrt.f32 %v6896_v30  ;;  %vm2951_vm10 = vweird.f32 %v6896_v30 }
 0x4ba   : > { %v2940_v33 = vmul.f32 %v5003_v41, %v2939_v32 }
 0x4bc   : > { %v2944_v37 = vsel %vm2943_vm7, %v5003_v41, %v2940_v33  ;;  %v2987_v41 = vunpack.c.l.bf16 %v1517_v7 }
 0x4bd   : > { %v2957_v51 = vmul.f32 %v2944_v37, %v2929_v39  ;;  %v2955_v53 = vmul.f32 %v2944_v37, %v2927_v47  ;;  %v2956_v58 = vmul.f32 %v2944_v37, %v2928_v57  ;;  %v4910_v37 = vld [vmem:[%s7075_s7 + $0x8] sm:$0xff] }
 0x4be   : > { %3266 = vmatpush.bf16.msrb.mxu0 %v4910_v37 }
 0x4bf   : > { %v5005_v40 = vpop.eup %5004  ;;  %v2970_v61 = vmul.f32 %v2964_v48, %v2957_v51  ;;  %v2968_v3 = vmul.f32 %v2962_v24, %v2955_v53  ;;  %v2969_v8 = vmul.f32 %v2963_v55, %v2956_v58  ;;  %v3070_v51 = vperm.slane %v3068_v34, 0  ;;  %v4917_v53 = vld [vmem:[%s7075_s7 + $0x40] sm:$0xff] }
 0x4c0   : > { %v2946_v29 = vmul.f32 %v5005_v40, %v6896_v30  ;;  %vm2952_vm9 = vweird.f32 %v5005_v40  ;;  %v2990_v30 = vunpack.c.l.bf16 %v1519_v12  ;;  %3280 = vmatpush.bf16.msra.mxu1 %v4917_v53 }
 0x4c1   : > { %v2983_v11 = vadd.f32 %v2977_v60, %v2970_v61  ;;  %vm2953_vm11 = vmor %vm2951_vm10, %vm2952_vm9  ;;  %v2981_v4 = vadd.f32 %v2975_v2, %v2968_v3  ;;  %v2982_v45 = vadd.f32 %v2976_v36, %v2969_v8  ;;  %5006 = vrcp.f32 %v3070_v51 }
 0x4c2   : > { %v2947_v54 = vmul.f32 %v5005_v40, %v2946_v29  ;;  %vm3076_vm14 = vweird.f32 %v3070_v51 }
 0x4c3   : > { %v2995_v27 = vadd.f32 %v2989_v10, %v2983_v11  ;;  %v2993_v39 = vadd.f32 %v2987_v41, %v2981_v4 }
 0x4c4   : > { %v2948_v63 = vmul.f32 0.5, %v2947_v54 }
 0x4c5   : > { %v3000_v54 = vmul.f32 %v2993_v39, %v6397_v44 }
 0x4c6   : > { %v2949_v5 = vsub.f32 1.5, %v2948_v63 }
 0x4c8   : > { %v2950_v13 = vmul.f32 %v5005_v40, %v2949_v5  ;;  %v5007_v5 = vpop.eup %5006 }
 0x4c9   : > { %v3072_v11 = vmul.f32 %v5007_v5, %v3070_v51  ;;  %vm3077_vm15 = vweird.f32 %v5007_v5 }
 0x4ca   : > { %v2954_v23 = vsel %vm2953_vm11, %v5005_v40, %v2950_v13  ;;  %v2994_v40 = vadd.f32 %v2988_v49, %v2982_v45  ;;  %vm3078_vm1 = vmor %vm3076_vm14, %vm3077_vm15 }
 0x4cb   : > { %v2958_v25 = vmul.f32 %v2954_v23, %v2930_v15  ;;  %v2959_v26 = vmul.f32 %v2954_v23, %v2931_v16  ;;  %v2960_v52 = vmul.f32 %v2954_v23, %v2932_v17  ;;  %v3073_v19 = vsub.f32 1.0, %v3072_v11 }
 0x4cd   : > { %v2971_v32 = vmul.f32 %v2962_v24, %v2958_v25  ;;  %v2972_v33 = vmul.f32 %v2963_v55, %v2959_v26  ;;  %v2973_v6 = vmul.f32 %v2964_v48, %v2960_v52  ;;  %v3002_v48 = vmul.f32 %v2995_v27, %v6397_v44  ;;  %v4909_v24 = vld [vmem:[%s7075_s7] sm:$0xff] }
 0x4ce   : > { %v3001_v55 = vmul.f32 %v2994_v40, %v6397_v44  ;;  %3267 = vmatpush.bf16.msrb.mxu0 %v4909_v24  ;;  %v3074_v45 = vmul.f32 %v5007_v5, %v3073_v19  ;;  %v3082_v52 = vand.u32 2147483648, %v3070_v51  ;;  %v3080_v27 = vand.u32 2147483647, %v3070_v51 }
 0x4cf   : > { %v2984_v42 = vadd.f32 %v2975_v2, %v2971_v32  ;;  %v2985_v43 = vadd.f32 %v2976_v36, %v2972_v33  ;;  %v2986_v47 = vadd.f32 %v2977_v60, %v2973_v6  ;;  %v3020_v59 = vsel %vm1238_vm0, %v3002_v48, 0.0 }
 0x4d0   : > { %v3075_v18 = vadd.f32 %v5007_v5, %v3074_v45  ;;  %vm3081_vm2 = vcmp.eq.f32.partialorder %v3080_v27, 8.507059e+37 }
 0x4d1   : > { %v2996_v29 = vadd.f32 %v2990_v30, %v2984_v42  ;;  %v2997_v57 = vadd.f32 %v2991_v28, %v2985_v43  ;;  %v2998_v14 = vadd.f32 %v2992_v56, %v2986_v47  ;;  %v3083_v30 = vor.u32 1.1754944e-38, %v3082_v52  ;;  %v481_v42 = vld [vmem:[%s7076_s8 + $0x5] ss:$0 sm:$0xff] }
 0x4d2   : > { %v3079_v28 = vsel %vm3078_vm1, %v5007_v5, %v3075_v18 }
 0x4d3   : > { %v3003_v58 = vmul.f32 %v2996_v29, %v6405_v50  ;;  %v3004_v62 = vmul.f32 %v2997_v57, %v6405_v50  ;;  %v3005_v22 = vmul.f32 %v2998_v14, %v6405_v50  ;;  %v3084_v56 = vsel %vm3081_vm2, %v3083_v30, %v3079_v28 }
 0x4d5   : > { %v3006_v60 = vadd.f32 %v3003_v58, %v3000_v54  ;;  %v3013_v61 = vadd.f32 %v3004_v62, %v3001_v55  ;;  %v3021_v63 = vsel %vm1238_vm0, %v3005_v22, 0.0 }
 0x4d6   : > { %v3022_v0 = vadd.f32 %v3021_v63, %v3020_v59 }
 0x4d7   : > { %v3007_v31 = vrot.slane %v3006_v60, 4  ;;  %v3014_v1 = vrot.slane %v3013_v61, 4 }
 0x4d8   : > { %v3023_v44 = vrot.slane %v3022_v0, 4 }
 0x4d9   : > { %v3008_v2 = vadd.f32 %v3007_v31, %v3006_v60  ;;  %v3015_v3 = vadd.f32 %v3014_v1, %v3013_v61 }
 0x4da   : > { %v3024_v36 = vadd.f32 %v3023_v44, %v3022_v0 }
 0x4db   : > { %v3009_v7 = vrot.slane %v3008_v2, 2  ;;  %v3016_v50 = vrot.slane %v3015_v3, 2 }
 0x4dc   : > { %v3025_v8 = vrot.slane %v3024_v36, 2 }
 0x4dd   : > { %v3010_v9 = vadd.f32 %v3009_v7, %v3008_v2  ;;  %v3017_v10 = vadd.f32 %v3016_v50, %v3015_v3 }
 0x4de   : > { %v3026_v12 = vadd.f32 %v3025_v8, %v3024_v36 }
 0x4df   : > { %v3011_v13 = vrot.slane %v3010_v9, 1  ;;  %v3018_v15 = vrot.slane %v3017_v10, 1 }
 0x4e0   : > { %v3027_v16 = vrot.slane %v3026_v12, 1 }
 0x4e1   : > { %v3019_v17 = vadd.f32 %v3018_v15, %v3017_v10  ;;  %v3012_v4 = vadd.f32 %v3011_v13, %v3010_v9 }
 0x4e2   : > { %v3028_v20 = vadd.f32 %v3027_v16, %v3026_v12 }
 0x4e3   : > { %v3032_v41 = vrot.slane %v3019_v17, 7 }
 0x4e4   : > { %v3033_v49 = vrot.slane %v3028_v20, 6 }
 0x4e5   : > { %v3035_v23 = vsel %vm3034_vm12, %v3012_v4, %v3032_v41 }
 0x4e6   : > { %v3037_v25 = vsel %vm3036_vm13, %v3035_v23, %v3033_v49 }
 0x4e7   : > { %v3039_v26 = vadd.f32 %v3037_v25, %v2999_v21 }
 0x4e9   : > { %3044 = vst.msk [vmem:[%s6920_s19] sm:$0x7] %vm6929_vm8, %v3039_v26 }
 0x4f0   : > { %v3064_v32 = vld [vmem:[%s6920_s19] sm:$0x7] }
 0x4f1   : > { %v3085_v33 = vmul.f32 %v3084_v56, %v3064_v32 }
 0x4f3   : > { %3086 = vst.msk [vmem:[%s6920_s19] sm:$0x7] %vm6929_vm8, %v3085_v33  ;;  %v3088_v6 = vperm.slane %v3085_v33, 0  ;;  %v3089_v34 = vperm.slane %v3085_v33, 1  ;;  %v3090_v37 = vperm.slane %v3085_v33, 2  ;;  %s434_s19 = sand.u32 1, %s5074_s14  }
 0x4f4   : > { %s435_s11 = scalar_lea.vmem [#allocation5], %s434_s19  ;;  %s3329_s24 = scalar_lea.sflag [#allocation6], %s434_s19 }
 0x4f5   : > { %v3094_v38 = vpack.c.bf16 %v3088_v6, %v3088_v6  ;;  %v3095_v39 = vpack.c.bf16 %v3089_v34, %v3089_v34  ;;  %v3096_v40 = vpack.c.bf16 %v3090_v37, %v3090_v37  ;;  %s3342_s22 = sshll.u32 %s435_s11, 4  ;;  %s3343_s22 = int_to_ptr.vmem [resolvable:$true] %s3342_s22 }
 0x4f7   : > { %3268 = vmatmul.bf16.vlgmr.msrb.gmra.mxu0 %v3094_v38  ;;  %3281 = vmatmul.bf16.vlgmr.msra.gmra.mxu1 %v3095_v39 }
 0x4f8   : > { %4641 = vmatmul.msk.bf16.vlgmr.msrb.gmra.mxu2 %vm1238_vm0, %v3096_v40 }
 0x574   : > { %v3269_v43 = vpop.f32.mrf.mxu0  ;;  %v3282_v47 = vpop.f32.mrf.mxu1 }
 0x575   : > { %v3270_v35 = vadd.f32 %v3269_v43, %v481_v42 }
 0x577   : > { %v3283_v48 = vadd.f32 %v3282_v47, %v3270_v35 }
 0x57b   : > { %v3295_v46 = vpop.f32.mrf.mxu2 }
 0x57c   : > { %v3296_v51 = vadd.f32 %v3295_v46, %v3283_v48  ;;  %v3271_v29 = vpop.f32.mrf.mxu0  ;;  %v3284_v57 = vpop.f32.mrf.mxu1 }
 0x57e   : > { %v3299_v14 = vsel %vm3034_vm12, %v3296_v51, -inf }
 0x57f   : > { %3300 = vmax.xlane.f32.xlu1 %v3299_v14 }
 0x583   : > { %v3297_v24 = vpop.f32.mrf.mxu2 }
 0x5f2   : > { %v3301_v53 = vpop.xlane.xlu1 %3300 }
 0x5f3   : > { %v3302_v54 = vsub.f32 %v3296_v51, %v3301_v53 }
 0x5f5   : > { %v3303_v55 = vmul.f32 1.442695, %v3302_v54 }
 0x5f7   : > { %5008 = vpow2.f32 %v3303_v55 }
 0x5fd   : > { %v5009_v58 = vpop.eup %5008 }
 0x5fe   : > { %v3305_v62 = vsel %vm3034_vm12, %v5009_v58, 0.0 }
 0x5ff   : > { %3306 = vadd.xlane.f32.xlu1 %v3305_v62 }
 0x672   : > { %v3307_v22 = vpop.xlane.xlu1 %3306 }
 0x673   : > { %5010 = vrcp.f32 %v3307_v22  ;;  %v3319_v63 = vand.u32 2147483648, %v3307_v22  ;;  %v3317_v31 = vand.u32 2147483647, %v3307_v22  ;;  %vm3313_vm3 = vweird.f32 %v3307_v22 }
 0x675   : > { %v3320_v44 = vor.u32 1.1754944e-38, %v3319_v63  ;;  %vm3318_vm5 = vcmp.eq.f32.partialorder %v3317_v31, 8.507059e+37 }
 0x679   : > { %v5011_v59 = vpop.eup %5010 }
 0x67a   : > { %v3309_v60 = vmul.f32 %v5011_v59, %v3307_v22  ;;  %vm3314_vm0 = vweird.f32 %v5011_v59 }
 0x67b   : > { %vm3315_vm4 = vmor %vm3313_vm3, %vm3314_vm0 }
 0x67c   : > { %v3310_v61 = vsub.f32 1.0, %v3309_v60 }
 0x67e   : > { %v3311_v0 = vmul.f32 %v5011_v59, %v3310_v61 }
 0x680   : > { %v3312_v1 = vadd.f32 %v5011_v59, %v3311_v0 }
 0x682   : > { %v3316_v2 = vsel %vm3315_vm4, %v5011_v59, %v3312_v1 }
 0x683   : > { %v3321_v3 = vsel %vm3318_vm5, %v3320_v44, %v3316_v2 }
 0x684   : > { %v3322_v5 = vmul.f32 %v5009_v58, %v3321_v3 }
 0x686   : > { %3323 = vst [vmem:[%s435_s11] sm:$0x1] %v3322_v5 }
 0x687   : > { %5039 = shalt.err (!%p5036_p5)
}
 0x688   : > { %4931 = dma.vmem_to_hbm [thread:$0]  (%p5190_p4), %s3343_s22, 16, %s3345_s27, %s3329_s24  }
 0x689 PF: > { %p4937_p6 = scmp.ge.s32.totalorder %s5090_s18, 2  ;;  %s3363_s19 = sand.u32 1, %s5070_s13  }
 0x68a   : > { %s3364_s12 = scalar_lea.sflag [#allocation6], %s3363_s19 }
 0x68b   : > { %p4934_p7 = pnand %p4937_p6, %p5197_p8 }
 0x68d   : > { %p4935_p9 = pneg %p4934_p7 }
 0x68f   : > { %5065 = dma.done.wait (%p4935_p9), %s3364_s12, 16  }
 0x690   : > { %5067 = vsyncadd (%p4935_p9), %s3364_s12, 4294967280  ;;  %s24_s18 = sadd.s32 1, %s5090_s18   ;;  %s7092_s20 = sld [smem:[#allocation10_spill]] }
 0x691   : > { %p21_p10 = scmp.ge.s32.totalorder %s24_s18, 4   ;;  %s7093_s16 = sld [smem:[#allocation8_spill]] }
 0x692   : > { %s7094_s17 = sld [smem:[#allocation9_spill]]  ;;  %s7095_s13 = smov %s5074_s14 }
 0x693   : > { %s7096_s14 = smov %s5078_s15  ;;  %23 = sbr.rel (!%p21_p10) target bundleno = 6 (0x6), region = 124 }
 0x696   : > { %s7097_s15 = smov %s7092_s20 }
 0x698   :  { %3369 = vsyncpa [#allocation6], 1 }
 0x699   :  { %3371 = vsyncpa [#allocation6 + $0x1], 1 }

</bundles_post_ra>
